<compile_context>
chip_gen: v7x
topology: tpu7x:2x2x1
jax: 0.10.0
libtpu: 0.0.40
codegen_flags: <defaults>
</compile_context>

<pallas_src>
import functools

import numpy as np
import jax
import jax.numpy as jnp
from jax.experimental import pallas as pl
from jax.experimental.pallas import tpu as pltpu


# ----------------------------- in-kernel helpers -----------------------------

def _layernorm(x, gamma, beta, eps=1e-5):
    mu = jnp.mean(x, axis=-1, keepdims=True)
    var = jnp.mean((x - mu) ** 2, axis=-1, keepdims=True)
    return (x - mu) * jax.lax.rsqrt(var + eps) * gamma + beta


# ------------------------------ fused block kernel ----------------------------

def block_kernel(x_ref, g1_ref, be1_ref, wqkv_ref, hmask_ref, wp_ref, bp_ref,
                 g2_ref, be2_ref, w1_ref, b1_ref, shift_ref, wdw_ref, bdw_ref,
                 w2_ref, b2_ref, o_ref, *, num_heads):
    f32 = jnp.float32
    bf16 = jnp.bfloat16

    nb, N, C = x_ref.shape
    BN = nb * N
    g = nb * num_heads

    x = x_ref[...].reshape(BN, C)                                   # (BN, C) f32

    # ---------------- attention + residual ----------------
    xn = _layernorm(x, g1_ref[0], be1_ref[0]).astype(bf16)
    # one fused qkv projection (softmax scale pre-folded into the q columns)
    qkv = jnp.dot(xn, wqkv_ref[...], preferred_element_type=f32)    # (BN, 3C)
    q = qkv[:, :C].astype(bf16).reshape(nb, 1, N, C)
    k = qkv[:, C:2 * C].astype(bf16).reshape(nb, 1, N, C)
    v = qkv[:, 2 * C:].astype(bf16).reshape(nb, 1, N, C)

    # per-head 0/1 column masks (h, C): head structure via masking, not slicing
    hmask = hmask_ref[...][None, :, None, :]                        # (1, h, 1, C)
    q_g = jnp.broadcast_to(q, (nb, num_heads, N, C)).reshape(g, N, C)
    k_g = (k * hmask).reshape(g, N, C)        # other heads' columns zeroed
    v_g = (v * hmask).reshape(g, N, C)

    # per-(batch, head) scores: k_g mask turns the full-C contraction per-head
    s = jnp.einsum("gnc,gmc->gnm", q_g, k_g, preferred_element_type=f32)
    s = s - jnp.max(s, axis=-1, keepdims=True)
    p = jnp.exp(s)
    p = p * pl.reciprocal(jnp.sum(p, axis=-1, keepdims=True), approx=True)

    # context: columns outside each group's own head are exactly zero (v_g mask),
    # so summing over heads == "concat heads" with no relayout.
    ctx = jnp.einsum("gnm,gmc->gnc", p.astype(bf16), v_g,
                     preferred_element_type=f32)                    # (g, N, C)
    ctx = jnp.sum(ctx.reshape(nb, num_heads, N, C), axis=1).reshape(BN, C)

    attn = jnp.dot(ctx.astype(bf16), wp_ref[...],
                   preferred_element_type=f32) + bp_ref[0]
    x = x + attn                                                    # residual 1

    # ---------------- MLP + residual ----------------
    xn2 = _layernorm(x, g2_ref[0], be2_ref[0]).astype(bf16)
    h1 = jnp.dot(xn2, w1_ref[...], preferred_element_type=f32) + b1_ref[0]

    # depthwise 3x3 conv: ONE merged shift matmul (9*BN, BN) @ (BN, hid), then
    # per-tap channel weights on the VPU (weights hoisted, tap-axis reduction).
    sh = jnp.dot(shift_ref[...], h1.astype(bf16), preferred_element_type=f32)
    sh = sh.reshape(9, BN, h1.shape[-1])
    conv = jnp.sum(sh * wdw_ref[...][:, None, :], axis=0) + bdw_ref[0]

    # TODO(synk): tanh-approx GELU here vs. exact erf GELU in nn.GELU (~1e-3 diff).
    y = jax.nn.gelu(conv, approximate=True).astype(bf16)
    y = jnp.dot(y, w2_ref[...], preferred_element_type=f32) + b2_ref[0]
    o_ref[...] = (x + y).reshape(nb, N, C)                          # residual 2


# --------------------------------- wrapper ------------------------------------

def _dw_shift_matrix(H, W, nb):
    """Block-diagonal 0/1 shift matrix: row (t, b, i, j) selects valid input
    pixel (b, i+kh-1, j+kw-1) for tap t = kh*3+kw (boundary zeros baked in)."""
    N = H * W
    BN = nb * N
    S = np.zeros((9, BN, BN), np.float32)
    for kh in range(3):
        for kw in range(3):
            t = kh * 3 + kw
            for i in range(H):
                si = i + kh - 1
                if not (0 <= si < H):
                    continue
                for j in range(W):
                    sj = j + kw - 1
                    if not (0 <= sj < W):
                        continue
                    for b in range(nb):
                        S[t, b * N + i * W + j, b * N + si * W + sj] = 1.0
    return S.reshape(9 * BN, BN)


def _batch_block(B):
    # v7x has 2 TensorCores/chip -> keep a parallel batch grid so both are used;
    # v5e/v6e are single-TC -> fold the whole batch into one grid step
    # (bigger 128-row matmuls, no per-step pipeline overhead).
    try:
        kind = jax.devices()[0].device_kind.lower()
    except Exception:
        kind = ""
    if B > 1 and ("v7" in kind or "7x" in kind):
        return 1
    return B


def block_forward(x, params, H, W, num_heads, nb=None):
    B, N, C = x.shape
    hd = C // num_heads
    scale = hd ** (-0.5)
    bf16 = jnp.bfloat16
    if nb is None:
        nb = _batch_block(B)
    assert B % nb == 0

    # ----- host-side weight prep (layout + dtype) -----
    wk = params["wkv"][:, :C]
    wv = params["wkv"][:, C:]
    wqkv = jnp.concatenate([params["wq"] * scale, wk, wv],
                           axis=1).astype(bf16)                     # (C, 3C)
    hmask = (np.arange(C)[None, :] // hd == np.arange(num_heads)[:, None])
    hmask = jnp.asarray(hmask, dtype=bf16)                          # (heads, C)
    wp = params["wp"].astype(bf16)
    w1 = params["w1"].astype(bf16)
    w2 = params["w2"].astype(bf16)
    shift = jnp.asarray(_dw_shift_matrix(H, W, nb), dtype=bf16)     # (9*nb*N, nb*N)

    weights = [params["g1"], params["be1"], wqkv, hmask, wp, params["bp"],
               params["g2"], params["be2"], w1, params["b1"], shift,
               params["wdw9"], params["bdw"], w2, params["b2"]]

    def const_spec(a):
        nd = a.ndim
        return pl.BlockSpec(a.shape, lambda b, _nd=nd: (0,) * _nd)

    xspec = pl.BlockSpec((nb, N, C), lambda b: (b, 0, 0))

    fn = pl.pallas_call(
        functools.partial(block_kernel, num_heads=num_heads),
        out_shape=jax.ShapeDtypeStruct((B, N, C), jnp.float32),
        grid=(B // nb,),
        in_specs=[xspec] + [const_spec(w) for w in weights],
        out_specs=xspec,
        compiler_params=pltpu.CompilerParams(
            dimension_semantics=("parallel",)),
    )
    return fn(x, *weights)


# ----------------------------- pure-JAX reference -----------------------------

def ref_block(x, params, H, W, num_heads):
    B, N, C = x.shape
    hd = C // num_heads
    scale = hd ** (-0.5)

    def ln(v, g, b):
        mu = jnp.mean(v, axis=-1, keepdims=True)
        var = jnp.mean((v - mu) ** 2, axis=-1, keepdims=True)
        return (v - mu) / jnp.sqrt(var + 1e-5) * g + b

    xn = ln(x, params["g1"][0], params["be1"][0])
    q = xn @ params["wq"]
    kv = xn @ params["wkv"]
    k, v = kv[..., :C], kv[..., C:]
    q = q.reshape(B, N, num_heads, hd).transpose(0, 2, 1, 3)
    k = k.reshape(B, N, num_heads, hd).transpose(0, 2, 1, 3)
    v = v.reshape(B, N, num_heads, hd).transpose(0, 2, 1, 3)
    attn = jax.nn.softmax((q @ jnp.swapaxes(k, -1, -2)) * scale, axis=-1)
    out = (attn @ v).transpose(0, 2, 1, 3).reshape(B, N, C)
    out = out @ params["wp"] + params["bp"][0]
    x = x + out

    xn = ln(x, params["g2"][0], params["be2"][0])
    h = xn @ params["w1"] + params["b1"][0]
    hid = h.shape[-1]
    img = h.reshape(B, H, W, hid)
    padded = jnp.pad(img, ((0, 0), (1, 1), (1, 1), (0, 0)))
    acc = jnp.zeros_like(img)
    for kh in range(3):
        for kw in range(3):
            acc = acc + padded[:, kh:kh + H, kw:kw + W, :] * params["wdw9"][kh * 3 + kw]
    acc = acc + params["bdw"][0]
    y = jax.nn.gelu(acc.reshape(B, N, hid), approximate=False)
    y = y @ params["w2"] + params["b2"][0]
    return x + y


# ------------------------------------ main -------------------------------------

if __name__ == "__main__":
    # TODO(synk): Dropout / DropPath (p=0 -> identity) and the sr_ratio>1 spatial
    # reduction branch are not exercised (module is used with sr_ratio=1).
    B, H, W, C = 2, 8, 8, 32
    N = H * W
    num_heads = 4
    mlp_ratio = 4
    hid = int(C * mlp_ratio)

    key = jax.random.PRNGKey(0)
    ks = jax.random.split(key, 16)
    nrm = jax.random.normal

    params = {
        # norm1 / norm2
        "g1": 1.0 + 0.1 * nrm(ks[0], (1, C), jnp.float32),
        "be1": 0.1 * nrm(ks[1], (1, C), jnp.float32),
        "g2": 1.0 + 0.1 * nrm(ks[2], (1, C), jnp.float32),
        "be2": 0.1 * nrm(ks[3], (1, C), jnp.float32),
        # attention (weights stored as (in, out); qkv_bias=False)
        "wq": 0.02 * nrm(ks[4], (C, C), jnp.float32),
        "wkv": 0.02 * nrm(ks[5], (C, 2 * C), jnp.float32),
        "wp": 0.02 * nrm(ks[6], (C, C), jnp.float32),
        "bp": 0.01 * nrm(ks[7], (1, C), jnp.float32),
        # mlp
        "w1": 0.02 * nrm(ks[8], (C, hid), jnp.float32),
        "b1": 0.01 * nrm(ks[9], (1, hid), jnp.float32),
        # depthwise conv weight laid out as (9, hid): tap index = kh*3 + kw
        "wdw9": 0.1 * nrm(ks[10], (9, hid), jnp.float32),
        "bdw": 0.01 * nrm(ks[11], (1, hid), jnp.float32),
        "w2": 0.02 * nrm(ks[12], (hid, C), jnp.float32),
        "b2": 0.01 * nrm(ks[13], (1, C), jnp.float32),
    }

    x = nrm(ks[14], (B, N, C), jnp.float32)
    ref = jax.block_until_ready(ref_block(x, params, H, W, num_heads))

    # Exercise both generation-specific batch layouts:
    #   nb=B : single grid step, batch folded (v5e / v6e path)
    #   nb=1 : grid=(B,) parallel over batch (v7x path)
    for nb in (B, 1):
        out = jax.block_until_ready(block_forward(x, params, H, W, num_heads, nb=nb))
        assert out.shape == (B, N, C)
        err = jnp.max(jnp.abs(out - ref))
        assert jnp.allclose(out, ref, rtol=2e-2, atol=2e-2), (
            f"nb={nb}: max abs err {err}")

    print("KERNEL_OK")
</pallas_src>

<mosaic_0001>
module attributes {stable_mosaic.version = 11 : i64} {
  func.func @block_kernel(%arg0: i32, %arg1: memref<2x64x32xf32, #tpu.memory_space<vmem>>, %arg2: memref<1x32xf32, #tpu.memory_space<vmem>>, %arg3: memref<1x32xf32, #tpu.memory_space<vmem>>, %arg4: memref<32x96xbf16, #tpu.memory_space<vmem>>, %arg5: memref<4x32xbf16, #tpu.memory_space<vmem>>, %arg6: memref<32x32xbf16, #tpu.memory_space<vmem>>, %arg7: memref<1x32xf32, #tpu.memory_space<vmem>>, %arg8: memref<1x32xf32, #tpu.memory_space<vmem>>, %arg9: memref<1x32xf32, #tpu.memory_space<vmem>>, %arg10: memref<32x128xbf16, #tpu.memory_space<vmem>>, %arg11: memref<1x128xf32, #tpu.memory_space<vmem>>, %arg12: memref<1152x128xbf16, #tpu.memory_space<vmem>>, %arg13: memref<9x128xf32, #tpu.memory_space<vmem>>, %arg14: memref<1x128xf32, #tpu.memory_space<vmem>>, %arg15: memref<128x32xbf16, #tpu.memory_space<vmem>>, %arg16: memref<1x32xf32, #tpu.memory_space<vmem>>, %arg17: memref<2x64x32xf32, #tpu.memory_space<vmem>>) attributes {dimension_semantics = [#tpu.dimension_semantics<parallel>], iteration_bounds = array<i64: 1>, scalar_prefetch = 0 : i64, scratch_operands = 0 : i64, tpu.core_type = #tpu.core_type<tc>, window_params = [{transform_indices = @transform_0, window_bounds = array<i64: 2, 64, 32>}, {pipeline_mode = #tpu.pipeline_mode<synchronous>, transform_indices = @transform_1, window_bounds = array<i64: 1, 32>}, {pipeline_mode = #tpu.pipeline_mode<synchronous>, transform_indices = @transform_2, window_bounds = array<i64: 1, 32>}, {pipeline_mode = #tpu.pipeline_mode<synchronous>, transform_indices = @transform_3, window_bounds = array<i64: 32, 96>}, {pipeline_mode = #tpu.pipeline_mode<synchronous>, transform_indices = @transform_4, window_bounds = array<i64: 4, 32>}, {pipeline_mode = #tpu.pipeline_mode<synchronous>, transform_indices = @transform_5, window_bounds = array<i64: 32, 32>}, {pipeline_mode = #tpu.pipeline_mode<synchronous>, transform_indices = @transform_6, window_bounds = array<i64: 1, 32>}, {pipeline_mode = #tpu.pipeline_mode<synchronous>, transform_indices = @transform_7, window_bounds = array<i64: 1, 32>}, {pipeline_mode = #tpu.pipeline_mode<synchronous>, transform_indices = @transform_8, window_bounds = array<i64: 1, 32>}, {pipeline_mode = #tpu.pipeline_mode<synchronous>, transform_indices = @transform_9, window_bounds = array<i64: 32, 128>}, {pipeline_mode = #tpu.pipeline_mode<synchronous>, transform_indices = @transform_10, window_bounds = array<i64: 1, 128>}, {pipeline_mode = #tpu.pipeline_mode<synchronous>, transform_indices = @transform_11, window_bounds = array<i64: 1152, 128>}, {pipeline_mode = #tpu.pipeline_mode<synchronous>, transform_indices = @transform_12, window_bounds = array<i64: 9, 128>}, {pipeline_mode = #tpu.pipeline_mode<synchronous>, transform_indices = @transform_13, window_bounds = array<i64: 1, 128>}, {pipeline_mode = #tpu.pipeline_mode<synchronous>, transform_indices = @transform_14, window_bounds = array<i64: 128, 32>}, {pipeline_mode = #tpu.pipeline_mode<synchronous>, transform_indices = @transform_15, window_bounds = array<i64: 1, 32>}, {transform_indices = @transform_16, window_bounds = array<i64: 2, 64, 32>}]} {
    %c0 = arith.constant 0 : index
    %c0_0 = arith.constant 0 : index
    %c0_1 = arith.constant 0 : index
    %0 = vector.load %arg1[%c0, %c0_0, %c0_1] : memref<2x64x32xf32, #tpu.memory_space<vmem>>, vector<2x64x32xf32>
    %1 = vector.shape_cast %0 : vector<2x64x32xf32> to vector<128x32xf32>
    %c0_2 = arith.constant 0 : index
    %c0_3 = arith.constant 0 : index
    %2 = vector.load %arg2[%c0_2, %c0_3] : memref<1x32xf32, #tpu.memory_space<vmem>>, vector<1x32xf32>
    %3 = vector.shape_cast %2 : vector<1x32xf32> to vector<32xf32>
    %c0_4 = arith.constant 0 : index
    %c0_5 = arith.constant 0 : index
    %4 = vector.load %arg3[%c0_4, %c0_5] : memref<1x32xf32, #tpu.memory_space<vmem>>, vector<1x32xf32>
    %5 = vector.shape_cast %4 : vector<1x32xf32> to vector<32xf32>
    %cst = arith.constant dense<0.000000e+00> : vector<128xf32>
    %6 = vector.multi_reduction <add>, %1, %cst [1] : vector<128x32xf32> to vector<128xf32>
    %7 = vector.shape_cast %6 : vector<128xf32> to vector<128x1xf32>
    %cst_6 = arith.constant 3.200000e+01 : f32
    %8 = vector.broadcast %cst_6 : f32 to vector<128x1xf32>
    %9 = arith.divf %7, %8 : vector<128x1xf32>
    %10 = vector.broadcast %9 : vector<128x1xf32> to vector<128x32xf32>
    %11 = arith.subf %1, %10 : vector<128x32xf32>
    %12 = arith.mulf %11, %11 : vector<128x32xf32>
    %cst_7 = arith.constant dense<0.000000e+00> : vector<128xf32>
    %13 = vector.multi_reduction <add>, %12, %cst_7 [1] : vector<128x32xf32> to vector<128xf32>
    %14 = vector.shape_cast %13 : vector<128xf32> to vector<128x1xf32>
    %cst_8 = arith.constant 3.200000e+01 : f32
    %15 = vector.broadcast %cst_8 : f32 to vector<128x1xf32>
    %16 = arith.divf %14, %15 : vector<128x1xf32>
    %17 = vector.broadcast %9 : vector<128x1xf32> to vector<128x32xf32>
    %18 = arith.subf %1, %17 : vector<128x32xf32>
    %cst_9 = arith.constant 9.99999974E-6 : f32
    %19 = vector.broadcast %cst_9 : f32 to vector<128x1xf32>
    %20 = arith.addf %16, %19 : vector<128x1xf32>
    %21 = math.rsqrt %20 : vector<128x1xf32>
    %22 = vector.broadcast %21 : vector<128x1xf32> to vector<128x32xf32>
    %23 = arith.mulf %18, %22 : vector<128x32xf32>
    %24 = vector.shape_cast %3 : vector<32xf32> to vector<1x32xf32>
    %25 = vector.broadcast %24 : vector<1x32xf32> to vector<128x32xf32>
    %26 = arith.mulf %23, %25 : vector<128x32xf32>
    %27 = vector.shape_cast %5 : vector<32xf32> to vector<1x32xf32>
    %28 = vector.broadcast %27 : vector<1x32xf32> to vector<128x32xf32>
    %29 = arith.addf %26, %28 : vector<128x32xf32>
    %30 = arith.truncf %29 : vector<128x32xf32> to vector<128x32xbf16>
    %c0_10 = arith.constant 0 : index
    %c0_11 = arith.constant 0 : index
    %31 = vector.load %arg4[%c0_10, %c0_11] : memref<32x96xbf16, #tpu.memory_space<vmem>>, vector<32x96xbf16>
    %cst_12 = arith.constant dense<0.000000e+00> : vector<128x96xf32>
    %32 = tpu.matmul %30, %31, %cst_12 {dimension_numbers = #tpu.dot_dimension_numbers<[1], [0], [0], [1], [0, 0, 1, 1], [], []>} : vector<128x32xbf16>, vector<32x96xbf16>, vector<128x96xf32> -> vector<128x96xf32>
    %33 = vector.extract_strided_slice %32 {offsets = [0, 0], sizes = [128, 32], strides = [1, 1]} : vector<128x96xf32> to vector<128x32xf32>
    %34 = arith.truncf %33 : vector<128x32xf32> to vector<128x32xbf16>
    %35 = vector.shape_cast %34 : vector<128x32xbf16> to vector<2x1x64x32xbf16>
    %36 = vector.extract_strided_slice %32 {offsets = [0, 32], sizes = [128, 32], strides = [1, 1]} : vector<128x96xf32> to vector<128x32xf32>
    %37 = arith.truncf %36 : vector<128x32xf32> to vector<128x32xbf16>
    %38 = vector.shape_cast %37 : vector<128x32xbf16> to vector<2x1x64x32xbf16>
    %39 = vector.extract_strided_slice %32 {offsets = [0, 64], sizes = [128, 32], strides = [1, 1]} : vector<128x96xf32> to vector<128x32xf32>
    %40 = arith.truncf %39 : vector<128x32xf32> to vector<128x32xbf16>
    %41 = vector.shape_cast %40 : vector<128x32xbf16> to vector<2x1x64x32xbf16>
    %c0_13 = arith.constant 0 : index
    %c0_14 = arith.constant 0 : index
    %42 = vector.load %arg5[%c0_13, %c0_14] : memref<4x32xbf16, #tpu.memory_space<vmem>>, vector<4x32xbf16>
    %43 = vector.shape_cast %42 : vector<4x32xbf16> to vector<1x4x1x32xbf16>
    %44 = vector.shape_cast %35 : vector<2x1x64x32xbf16> to vector<2x1x64x32xbf16>
    %45 = vector.broadcast %44 : vector<2x1x64x32xbf16> to vector<2x4x64x32xbf16>
    %46 = vector.shape_cast %45 : vector<2x4x64x32xbf16> to vector<8x64x32xbf16>
    %47 = vector.broadcast %38 : vector<2x1x64x32xbf16> to vector<2x4x64x32xbf16>
    %48 = vector.broadcast %43 : vector<1x4x1x32xbf16> to vector<2x4x64x32xbf16>
    %49 = arith.mulf %47, %48 : vector<2x4x64x32xbf16>
    %50 = vector.shape_cast %49 : vector<2x4x64x32xbf16> to vector<8x64x32xbf16>
    %51 = vector.broadcast %41 : vector<2x1x64x32xbf16> to vector<2x4x64x32xbf16>
    %52 = vector.broadcast %43 : vector<1x4x1x32xbf16> to vector<2x4x64x32xbf16>
    %53 = arith.mulf %51, %52 : vector<2x4x64x32xbf16>
    %54 = vector.shape_cast %53 : vector<2x4x64x32xbf16> to vector<8x64x32xbf16>
    "tpu.trace_start"() <{level = 10 : i32, message = "gnc,gmc->gnm"}> : () -> ()
    %cst_15 = arith.constant dense<0.000000e+00> : vector<8x64x64xf32>
    %55 = tpu.matmul %46, %50, %cst_15 {dimension_numbers = #tpu.dot_dimension_numbers<[2], [2], [1], [1], [0, 0, 0, 1, 1, 1], [0], [0]>} : vector<8x64x32xbf16>, vector<8x64x32xbf16>, vector<8x64x64xf32> -> vector<8x64x64xf32>
    "tpu.trace_stop"() : () -> ()
    %cst_16 = arith.constant dense<0xFF800000> : vector<8x64xf32>
    %56 = vector.multi_reduction <maximumf>, %55, %cst_16 [2] : vector<8x64x64xf32> to vector<8x64xf32>
    %57 = vector.shape_cast %56 : vector<8x64xf32> to vector<8x64x1xf32>
    %58 = vector.broadcast %57 : vector<8x64x1xf32> to vector<8x64x64xf32>
    %59 = arith.subf %55, %58 : vector<8x64x64xf32>
    %60 = math.exp %59 : vector<8x64x64xf32>
    %cst_17 = arith.constant dense<0.000000e+00> : vector<8x64xf32>
    %61 = vector.multi_reduction <add>, %60, %cst_17 [2] : vector<8x64x64xf32> to vector<8x64xf32>
    %62 = vector.shape_cast %61 : vector<8x64xf32> to vector<8x64x1xf32>
    %63 = tpu.reciprocal %62 {approx = true} : vector<8x64x1xf32> -> vector<8x64x1xf32>
    %64 = vector.broadcast %63 : vector<8x64x1xf32> to vector<8x64x64xf32>
    %65 = arith.mulf %60, %64 : vector<8x64x64xf32>
    %66 = arith.truncf %65 : vector<8x64x64xf32> to vector<8x64x64xbf16>
    "tpu.trace_start"() <{level = 10 : i32, message = "gnm,gmc->gnc"}> : () -> ()
    %cst_18 = arith.constant dense<0.000000e+00> : vector<8x64x32xf32>
    %67 = tpu.matmul %66, %54, %cst_18 {dimension_numbers = #tpu.dot_dimension_numbers<[2], [1], [1], [2], [0, 0, 0, 1, 1, 2], [0], [0]>} : vector<8x64x64xbf16>, vector<8x64x32xbf16>, vector<8x64x32xf32> -> vector<8x64x32xf32>
    "tpu.trace_stop"() : () -> ()
    %68 = vector.shape_cast %67 : vector<8x64x32xf32> to vector<2x4x64x32xf32>
    %cst_19 = arith.constant dense<0.000000e+00> : vector<2x64x32xf32>
    %69 = vector.multi_reduction <add>, %68, %cst_19 [1] : vector<2x4x64x32xf32> to vector<2x64x32xf32>
    %70 = vector.shape_cast %69 : vector<2x64x32xf32> to vector<128x32xf32>
    %71 = arith.truncf %70 : vector<128x32xf32> to vector<128x32xbf16>
    %c0_20 = arith.constant 0 : index
    %c0_21 = arith.constant 0 : index
    %72 = vector.load %arg6[%c0_20, %c0_21] : memref<32x32xbf16, #tpu.memory_space<vmem>>, vector<32x32xbf16>
    %cst_22 = arith.constant dense<0.000000e+00> : vector<128x32xf32>
    %73 = tpu.matmul %71, %72, %cst_22 {dimension_numbers = #tpu.dot_dimension_numbers<[1], [0], [0], [1], [0, 0, 1, 1], [], []>} : vector<128x32xbf16>, vector<32x32xbf16>, vector<128x32xf32> -> vector<128x32xf32>
    %c0_23 = arith.constant 0 : index
    %c0_24 = arith.constant 0 : index
    %74 = vector.load %arg7[%c0_23, %c0_24] : memref<1x32xf32, #tpu.memory_space<vmem>>, vector<1x32xf32>
    %75 = vector.shape_cast %74 : vector<1x32xf32> to vector<32xf32>
    %76 = vector.shape_cast %75 : vector<32xf32> to vector<1x32xf32>
    %77 = vector.broadcast %76 : vector<1x32xf32> to vector<128x32xf32>
    %78 = arith.addf %73, %77 : vector<128x32xf32>
    %79 = arith.addf %1, %78 : vector<128x32xf32>
    %c0_25 = arith.constant 0 : index
    %c0_26 = arith.constant 0 : index
    %80 = vector.load %arg8[%c0_25, %c0_26] : memref<1x32xf32, #tpu.memory_space<vmem>>, vector<1x32xf32>
    %81 = vector.shape_cast %80 : vector<1x32xf32> to vector<32xf32>
    %c0_27 = arith.constant 0 : index
    %c0_28 = arith.constant 0 : index
    %82 = vector.load %arg9[%c0_27, %c0_28] : memref<1x32xf32, #tpu.memory_space<vmem>>, vector<1x32xf32>
    %83 = vector.shape_cast %82 : vector<1x32xf32> to vector<32xf32>
    %cst_29 = arith.constant dense<0.000000e+00> : vector<128xf32>
    %84 = vector.multi_reduction <add>, %79, %cst_29 [1] : vector<128x32xf32> to vector<128xf32>
    %85 = vector.shape_cast %84 : vector<128xf32> to vector<128x1xf32>
    %cst_30 = arith.constant 3.200000e+01 : f32
    %86 = vector.broadcast %cst_30 : f32 to vector<128x1xf32>
    %87 = arith.divf %85, %86 : vector<128x1xf32>
    %88 = vector.broadcast %87 : vector<128x1xf32> to vector<128x32xf32>
    %89 = arith.subf %79, %88 : vector<128x32xf32>
    %90 = arith.mulf %89, %89 : vector<128x32xf32>
    %cst_31 = arith.constant dense<0.000000e+00> : vector<128xf32>
    %91 = vector.multi_reduction <add>, %90, %cst_31 [1] : vector<128x32xf32> to vector<128xf32>
    %92 = vector.shape_cast %91 : vector<128xf32> to vector<128x1xf32>
    %cst_32 = arith.constant 3.200000e+01 : f32
    %93 = vector.broadcast %cst_32 : f32 to vector<128x1xf32>
    %94 = arith.divf %92, %93 : vector<128x1xf32>
    %95 = vector.broadcast %87 : vector<128x1xf32> to vector<128x32xf32>
    %96 = arith.subf %79, %95 : vector<128x32xf32>
    %cst_33 = arith.constant 9.99999974E-6 : f32
    %97 = vector.broadcast %cst_33 : f32 to vector<128x1xf32>
    %98 = arith.addf %94, %97 : vector<128x1xf32>
    %99 = math.rsqrt %98 : vector<128x1xf32>
    %100 = vector.broadcast %99 : vector<128x1xf32> to vector<128x32xf32>
    %101 = arith.mulf %96, %100 : vector<128x32xf32>
    %102 = vector.shape_cast %81 : vector<32xf32> to vector<1x32xf32>
    %103 = vector.broadcast %102 : vector<1x32xf32> to vector<128x32xf32>
    %104 = arith.mulf %101, %103 : vector<128x32xf32>
    %105 = vector.shape_cast %83 : vector<32xf32> to vector<1x32xf32>
    %106 = vector.broadcast %105 : vector<1x32xf32> to vector<128x32xf32>
    %107 = arith.addf %104, %106 : vector<128x32xf32>
    %108 = arith.truncf %107 : vector<128x32xf32> to vector<128x32xbf16>
    %c0_34 = arith.constant 0 : index
    %c0_35 = arith.constant 0 : index
    %109 = vector.load %arg10[%c0_34, %c0_35] : memref<32x128xbf16, #tpu.memory_space<vmem>>, vector<32x128xbf16>
    %cst_36 = arith.constant dense<0.000000e+00> : vector<128x128xf32>
    %110 = tpu.matmul %108, %109, %cst_36 {dimension_numbers = #tpu.dot_dimension_numbers<[1], [0], [0], [1], [0, 0, 1, 1], [], []>} : vector<128x32xbf16>, vector<32x128xbf16>, vector<128x128xf32> -> vector<128x128xf32>
    %c0_37 = arith.constant 0 : index
    %c0_38 = arith.constant 0 : index
    %111 = vector.load %arg11[%c0_37, %c0_38] : memref<1x128xf32, #tpu.memory_space<vmem>>, vector<1x128xf32>
    %112 = vector.shape_cast %111 : vector<1x128xf32> to vector<128xf32>
    %113 = vector.shape_cast %112 : vector<128xf32> to vector<1x128xf32>
    %114 = vector.broadcast %113 : vector<1x128xf32> to vector<128x128xf32>
    %115 = arith.addf %110, %114 : vector<128x128xf32>
    %c0_39 = arith.constant 0 : index
    %c0_40 = arith.constant 0 : index
    %116 = vector.load %arg12[%c0_39, %c0_40] : memref<1152x128xbf16, #tpu.memory_space<vmem>>, vector<1152x128xbf16>
    %117 = arith.truncf %115 : vector<128x128xf32> to vector<128x128xbf16>
    %cst_41 = arith.constant dense<0.000000e+00> : vector<1152x128xf32>
    %118 = tpu.matmul %116, %117, %cst_41 {dimension_numbers = #tpu.dot_dimension_numbers<[1], [0], [0], [1], [0, 0, 1, 1], [], []>} : vector<1152x128xbf16>, vector<128x128xbf16>, vector<1152x128xf32> -> vector<1152x128xf32>
    %119 = vector.shape_cast %118 : vector<1152x128xf32> to vector<9x128x128xf32>
    %c0_42 = arith.constant 0 : index
    %c0_43 = arith.constant 0 : index
    %120 = vector.load %arg13[%c0_42, %c0_43] : memref<9x128xf32, #tpu.memory_space<vmem>>, vector<9x128xf32>
    %121 = vector.shape_cast %120 : vector<9x128xf32> to vector<9x1x128xf32>
    %122 = vector.broadcast %121 : vector<9x1x128xf32> to vector<9x128x128xf32>
    %123 = arith.mulf %119, %122 : vector<9x128x128xf32>
    %cst_44 = arith.constant dense<0.000000e+00> : vector<128x128xf32>
    %124 = vector.multi_reduction <add>, %123, %cst_44 [0] : vector<9x128x128xf32> to vector<128x128xf32>
    %c0_45 = arith.constant 0 : index
    %c0_46 = arith.constant 0 : index
    %125 = vector.load %arg14[%c0_45, %c0_46] : memref<1x128xf32, #tpu.memory_space<vmem>>, vector<1x128xf32>
    %126 = vector.shape_cast %125 : vector<1x128xf32> to vector<128xf32>
    %127 = vector.shape_cast %126 : vector<128xf32> to vector<1x128xf32>
    %128 = vector.broadcast %127 : vector<1x128xf32> to vector<128x128xf32>
    %129 = arith.addf %124, %128 : vector<128x128xf32>
    %130 = arith.mulf %129, %129 : vector<128x128xf32>
    %131 = arith.mulf %129, %130 : vector<128x128xf32>
    %cst_47 = arith.constant 4.471500e-02 : f32
    %132 = vector.broadcast %cst_47 : f32 to vector<128x128xf32>
    %133 = arith.mulf %132, %131 : vector<128x128xf32>
    %134 = arith.addf %129, %133 : vector<128x128xf32>
    %cst_48 = arith.constant 0.797884583 : f32
    %135 = vector.broadcast %cst_48 : f32 to vector<128x128xf32>
    %136 = arith.mulf %135, %134 : vector<128x128xf32>
    %137 = math.tanh %136 : vector<128x128xf32>
    %cst_49 = arith.constant 1.000000e+00 : f32
    %138 = vector.broadcast %cst_49 : f32 to vector<128x128xf32>
    %139 = arith.addf %138, %137 : vector<128x128xf32>
    %cst_50 = arith.constant 5.000000e-01 : f32
    %140 = vector.broadcast %cst_50 : f32 to vector<128x128xf32>
    %141 = arith.mulf %140, %139 : vector<128x128xf32>
    %142 = arith.mulf %129, %141 : vector<128x128xf32>
    %143 = arith.truncf %142 : vector<128x128xf32> to vector<128x128xbf16>
    %c0_51 = arith.constant 0 : index
    %c0_52 = arith.constant 0 : index
    %144 = vector.load %arg15[%c0_51, %c0_52] : memref<128x32xbf16, #tpu.memory_space<vmem>>, vector<128x32xbf16>
    %cst_53 = arith.constant dense<0.000000e+00> : vector<128x32xf32>
    %145 = tpu.matmul %143, %144, %cst_53 {dimension_numbers = #tpu.dot_dimension_numbers<[1], [0], [0], [1], [0, 0, 1, 1], [], []>} : vector<128x128xbf16>, vector<128x32xbf16>, vector<128x32xf32> -> vector<128x32xf32>
    %c0_54 = arith.constant 0 : index
    %c0_55 = arith.constant 0 : index
    %146 = vector.load %arg16[%c0_54, %c0_55] : memref<1x32xf32, #tpu.memory_space<vmem>>, vector<1x32xf32>
    %147 = vector.shape_cast %146 : vector<1x32xf32> to vector<32xf32>
    %148 = vector.shape_cast %147 : vector<32xf32> to vector<1x32xf32>
    %149 = vector.broadcast %148 : vector<1x32xf32> to vector<128x32xf32>
    %150 = arith.addf %145, %149 : vector<128x32xf32>
    %151 = arith.addf %79, %150 : vector<128x32xf32>
    %152 = vector.shape_cast %151 : vector<128x32xf32> to vector<2x64x32xf32>
    %c0_56 = arith.constant 0 : index
    %c0_57 = arith.constant 0 : index
    %c0_58 = arith.constant 0 : index
    %153 = vector.load %arg17[%c0_56, %c0_57, %c0_58] : memref<2x64x32xf32, #tpu.memory_space<vmem>>, vector<2x64x32xf32>
    tpu.vector_store %arg17[%c0_56, %c0_57, %c0_58], %152 {strides = array<i32>} : memref<2x64x32xf32, #tpu.memory_space<vmem>>, vector<2x64x32xf32>,
    return
  }
  func.func @transform_0(%arg0: i32) -> (i32, i32, i32) {
    %c0_i32 = arith.constant 0 : i32
    %c0_i32_0 = arith.constant 0 : i32
    %c0_i32_1 = arith.constant 0 : i32
    return %arg0, %c0_i32, %c0_i32_0 : i32, i32, i32
  }
  func.func @transform_1(%arg0: i32) -> (i32, i32) {
    %c0_i32 = arith.constant 0 : i32
    %c0_i32_0 = arith.constant 0 : i32
    %c0_i32_1 = arith.constant 0 : i32
    return %c0_i32, %c0_i32_0 : i32, i32
  }
  func.func @transform_2(%arg0: i32) -> (i32, i32) {
    %c0_i32 = arith.constant 0 : i32
    %c0_i32_0 = arith.constant 0 : i32
    %c0_i32_1 = arith.constant 0 : i32
    return %c0_i32, %c0_i32_0 : i32, i32
  }
  func.func @transform_3(%arg0: i32) -> (i32, i32) {
    %c0_i32 = arith.constant 0 : i32
    %c0_i32_0 = arith.constant 0 : i32
    %c0_i32_1 = arith.constant 0 : i32
    return %c0_i32, %c0_i32_0 : i32, i32
  }
  func.func @transform_4(%arg0: i32) -> (i32, i32) {
    %c0_i32 = arith.constant 0 : i32
    %c0_i32_0 = arith.constant 0 : i32
    %c0_i32_1 = arith.constant 0 : i32
    return %c0_i32, %c0_i32_0 : i32, i32
  }
  func.func @transform_5(%arg0: i32) -> (i32, i32) {
    %c0_i32 = arith.constant 0 : i32
    %c0_i32_0 = arith.constant 0 : i32
    %c0_i32_1 = arith.constant 0 : i32
    return %c0_i32, %c0_i32_0 : i32, i32
  }
  func.func @transform_6(%arg0: i32) -> (i32, i32) {
    %c0_i32 = arith.constant 0 : i32
    %c0_i32_0 = arith.constant 0 : i32
    %c0_i32_1 = arith.constant 0 : i32
    return %c0_i32, %c0_i32_0 : i32, i32
  }
  func.func @transform_7(%arg0: i32) -> (i32, i32) {
    %c0_i32 = arith.constant 0 : i32
    %c0_i32_0 = arith.constant 0 : i32
    %c0_i32_1 = arith.constant 0 : i32
    return %c0_i32, %c0_i32_0 : i32, i32
  }
  func.func @transform_8(%arg0: i32) -> (i32, i32) {
    %c0_i32 = arith.constant 0 : i32
    %c0_i32_0 = arith.constant 0 : i32
    %c0_i32_1 = arith.constant 0 : i32
    return %c0_i32, %c0_i32_0 : i32, i32
  }
  func.func @transform_9(%arg0: i32) -> (i32, i32) {
    %c0_i32 = arith.constant 0 : i32
    %c0_i32_0 = arith.constant 0 : i32
    %c0_i32_1 = arith.constant 0 : i32
    return %c0_i32, %c0_i32_0 : i32, i32
  }
  func.func @transform_10(%arg0: i32) -> (i32, i32) {
    %c0_i32 = arith.constant 0 : i32
    %c0_i32_0 = arith.constant 0 : i32
    %c0_i32_1 = arith.constant 0 : i32
    return %c0_i32, %c0_i32_0 : i32, i32
  }
  func.func @transform_11(%arg0: i32) -> (i32, i32) {
    %c0_i32 = arith.constant 0 : i32
    %c0_i32_0 = arith.constant 0 : i32
    %c0_i32_1 = arith.constant 0 : i32
    return %c0_i32, %c0_i32_0 : i32, i32
  }
  func.func @transform_12(%arg0: i32) -> (i32, i32) {
    %c0_i32 = arith.constant 0 : i32
    %c0_i32_0 = arith.constant 0 : i32
    %c0_i32_1 = arith.constant 0 : i32
    return %c0_i32, %c0_i32_0 : i32, i32
  }
  func.func @transform_13(%arg0: i32) -> (i32, i32) {
    %c0_i32 = arith.constant 0 : i32
    %c0_i32_0 = arith.constant 0 : i32
    %c0_i32_1 = arith.constant 0 : i32
    return %c0_i32, %c0_i32_0 : i32, i32
  }
  func.func @transform_14(%arg0: i32) -> (i32, i32) {
    %c0_i32 = arith.constant 0 : i32
    %c0_i32_0 = arith.constant 0 : i32
    %c0_i32_1 = arith.constant 0 : i32
    return %c0_i32, %c0_i32_0 : i32, i32
  }
  func.func @transform_15(%arg0: i32) -> (i32, i32) {
    %c0_i32 = arith.constant 0 : i32
    %c0_i32_0 = arith.constant 0 : i32
    %c0_i32_1 = arith.constant 0 : i32
    return %c0_i32, %c0_i32_0 : i32, i32
  }
  func.func @transform_16(%arg0: i32) -> (i32, i32, i32) {
    %c0_i32 = arith.constant 0 : i32
    %c0_i32_0 = arith.constant 0 : i32
    %c0_i32_1 = arith.constant 0 : i32
    return %arg0, %c0_i32, %c0_i32_0 : i32, i32, i32
  }
}

</mosaic_0001>

<bundles_post_ra>
// kernel: tpu_custom_call.1
= control target key start
LH: loop header
LB: loop body
LE: loop exit
PB: predicated region body
PF: predicated region fallthrough
CT: control target
= control target key end

     0   :  { %s9710_s0 = inlined_call_operand.vmem [shape: f32[2,64,32], index: 0, kind: input, shape index: {}]   ;;  %s9711_s1 = inlined_call_operand.vmem [shape: f32[1,32], index: 1, kind: input, shape index: {}]   ;;  %s9712_s2 = inlined_call_operand.vmem [shape: f32[1,32], index: 2, kind: input, shape index: {}]   ;;  %s9713_s3 = inlined_call_operand.vmem [shape: bf16[32,96], index: 3, kind: input, shape index: {}]   ;;  %s9714_s4 = inlined_call_operand.vmem [shape: bf16[4,32], index: 4, kind: input, shape index: {}]   ;;  %s9715_s5 = inlined_call_operand.vmem [shape: bf16[32,32], index: 5, kind: input, shape index: {}]   ;;  %s9716_s6 = inlined_call_operand.vmem [shape: f32[1,32], index: 6, kind: input, shape index: {}]   ;;  %s9717_s7 = inlined_call_operand.vmem [shape: f32[1,32], index: 7, kind: input, shape index: {}]   ;;  %s9718_s8 = inlined_call_operand.vmem [shape: f32[1,32], index: 8, kind: input, shape index: {}]   ;;  %s9719_s9 = inlined_call_operand.vmem [shape: bf16[32,128], index: 9, kind: input, shape index: {}]   ;;  %s9720_s10 = inlined_call_operand.vmem [shape: f32[1,128], index: 10, kind: input, shape index: {}]   ;;  %s9721_s11 = inlined_call_operand.hbm [shape: bf16[1152,128], index: 11, kind: input, shape index: {}]   ;;  %s9722_s12 = inlined_call_operand.vmem [shape: f32[9,128], index: 12, kind: input, shape index: {}]   ;;  %s9723_s13 = inlined_call_operand.vmem [shape: f32[1,128], index: 13, kind: input, shape index: {}]   ;;  %s9724_s14 = inlined_call_operand.vmem [shape: bf16[128,32], index: 14, kind: input, shape index: {}]   ;;  %s9725_s15 = inlined_call_operand.vmem [shape: f32[1,32], index: 15, kind: input, shape index: {}]   ;;  %s9726_s16 = inlined_call_operand.vmem [shape: f32[2,64,32], index: 16, kind: output, shape index: {}]  }
   0x1   :  { %9810 = sst [smem:[#allocation52_spill]] %s9710_s0 }
   0x2   :  { %21 = vsyncpa [#allocation3], 0  ;;  %s6988_s21 = smov [#allocation2]   ;;  %s6964_s25 = scalar_lea.hbm %s9721_s11, 9216 }
   0x3   :  { %s49_s22 = sshll.u32 %s6988_s21, 4  ;;  %p6965_p0 = scmp.ne.s32.totalorder %s9721_s11, %s6964_s25  ;;  %s50_s22 = int_to_ptr.vmem [resolvable:$true] %s49_s22 }
   0x4   :  { %p6968_p1 = scmp.lt.u32.totalorder %s6964_s25, %s9721_s11 }
   0x6   :  { %p6970_p2 = pnand %p6968_p1, %p6965_p0 }
   0x8   :  { %6973 = shalt.err (!%p6970_p2)
}
   0x9   :  { %s6974_s30 = scalar_lea.vmem %s50_s22, 9216  ;;  %p6979_p4 = scmp.lt.s32.totalorder %s50_s22, %s50_s22 }
   0xa   :  { %p6975_p3 = scmp.ne.s32.totalorder %s50_s22, %s6974_s30  ;;  %p6980_p5 = scmp.lt.s32.totalorder %s6974_s30, %s6974_s30 }
   0xc   :  { %p6981_p6 = por %p6980_p5, %p6979_p4 }
   0xe   :  { %p6982_p7 = pnand %p6981_p6, %p6975_p3 }
  0x10   :  { %6985 = shalt.err (!%p6982_p7)
}
  0x11   :  { %s6989_s0 = smov 64   ;;  %s6990_s17 = smov 4  }
  0x12   :  { %55 = dma.hbm_to_vmem [thread:$0]  %s9721_s11, 9216, %s50_s22, [#allocation3], %s6989_s0, %s6989_s0, %s6990_s17  }
  0x13   :  { %6986 = dma.done.wait [#allocation3], 9216  }
  0x14   :  { %6987 = vsyncadd [#allocation3], 4294958080  ;;  %vm86_vm0 = vcmask 261120   ;;  %s9811_s23 = sld [smem:[#allocation52_spill]]  ;;  %s6992_s17 = smov 96   ;;  %vm1383_vm1 = vcmask 523264  }
  0x1a   :  { %v68_v0 = vld [vmem:[%s9811_s23] sm:$0xff]  ;;  %v70_v1 = vld [vmem:[%s9811_s23 + $0x10] sm:$0xff]  ;;  %v69_v2 = vld [vmem:[%s9811_s23 + $0x8] sm:$0xff] }
  0x1b   :  { %v87_v3 = vsel %vm86_vm0, %v68_v0, 0.0  ;;  %v93_v4 = vsel %vm86_vm0, %v70_v1, 0.0  ;;  %v71_v5 = vld [vmem:[%s9811_s23 + $0x18] sm:$0xff]  ;;  %v72_v6 = vld [vmem:[%s9811_s23 + $0x20] sm:$0xff]  ;;  %v7113_v7 = vld [vmem:[%s9811_s23 + $0x28] sm:$0xff]  ;;  %v90_v8 = vsel %vm86_vm0, %v69_v2, 0.0 }
  0x1c   :  { %88 = vadd.xlane.f32.xlu0 %v87_v3  ;;  %94 = vadd.xlane.f32.xlu1 %v93_v4  ;;  %v96_v9 = vsel %vm86_vm0, %v71_v5, 0.0  ;;  %v99_v10 = vsel %vm86_vm0, %v72_v6, 0.0  ;;  %v7121_v11 = vld [vmem:[%s9811_s23 + $0x30] sm:$0xff]  ;;  %v7126_v12 = vld [vmem:[%s9811_s23 + $0x38] sm:$0xff]  ;;  %v7131_v13 = vld [vmem:[%s9811_s23 + $0x40] sm:$0xff]  ;;  %v102_v14 = vsel %vm86_vm0, %v7113_v7, 0.0 }
  0x1d   :  { %v105_v15 = vsel %vm86_vm0, %v7121_v11, 0.0  ;;  %v108_v16 = vsel %vm86_vm0, %v7126_v12, 0.0  ;;  %v7142_v17 = vld [vmem:[%s9811_s23 + $0x48] sm:$0xff]  ;;  %v7147_v18 = vld [vmem:[%s9811_s23 + $0x50] sm:$0xff]  ;;  %v7152_v19 = vld [vmem:[%s9811_s23 + $0x58] sm:$0xff]  ;;  %v111_v20 = vsel %vm86_vm0, %v7131_v13, 0.0 }
  0x1e   :  { %v114_v21 = vsel %vm86_vm0, %v7142_v17, 0.0  ;;  %v117_v22 = vsel %vm86_vm0, %v7147_v18, 0.0  ;;  %v120_v23 = vsel %vm86_vm0, %v7152_v19, 0.0  ;;  %v7165_v24 = vld [vmem:[%s9811_s23 + $0x60] sm:$0xff]  ;;  %v7170_v25 = vld [vmem:[%s9811_s23 + $0x68] sm:$0xff]  ;;  %v7195_v49 = vld [vmem:[%s9811_s23 + $0x70] sm:$0xff] }
  0x1f   :  { %v123_v26 = vsel %vm86_vm0, %v7165_v24, 0.0  ;;  %v126_v27 = vsel %vm86_vm0, %v7170_v25, 0.0  ;;  %v129_v54 = vsel %vm86_vm0, %v7195_v49, 0.0  ;;  %v7211_v60 = vld [vmem:[%s9811_s23 + $0x78] sm:$0xff] }
  0x20   :  { %91 = vadd.xlane.f32.xlu0 %v90_v8  ;;  %97 = vadd.xlane.f32.xlu1 %v96_v9 }
  0x24   :  { %100 = vadd.xlane.f32.xlu0 %v99_v10  ;;  %103 = vadd.xlane.f32.xlu1 %v102_v14 }
  0x28   :  { %106 = vadd.xlane.f32.xlu0 %v105_v15  ;;  %109 = vadd.xlane.f32.xlu1 %v108_v16 }
  0x2c   :  { %112 = vadd.xlane.f32.xlu0 %v111_v20  ;;  %115 = vadd.xlane.f32.xlu1 %v114_v21 }
  0x30   :  { %118 = vadd.xlane.f32.xlu0 %v117_v22  ;;  %121 = vadd.xlane.f32.xlu1 %v120_v23 }
  0x34   :  { %124 = vadd.xlane.f32.xlu0 %v123_v26  ;;  %127 = vadd.xlane.f32.xlu1 %v126_v27 }
  0xa9   :  { %v89_v28 = vpop.xlane.xlu0 %88  ;;  %v95_v29 = vpop.xlane.xlu1 %94 }
  0xaa   :  { %v136_v30 = vmul.f32 0.03125, %v89_v28  ;;  %v138_v31 = vmul.f32 0.03125, %v95_v29 }
  0xac   :  { %v7176_v32 = vsub.f32 %v68_v0, %v136_v30  ;;  %v7178_v33 = vsub.f32 %v70_v1, %v138_v31  ;;  %v132_v0 = vsel %vm86_vm0, %v7211_v60, 0.0 }
  0xad   :  { %v92_v34 = vpop.xlane.xlu0 %91  ;;  %v98_v35 = vpop.xlane.xlu1 %97 }
  0xae   :  { %v137_v36 = vmul.f32 0.03125, %v92_v34  ;;  %v139_v37 = vmul.f32 0.03125, %v98_v35  ;;  %v168_v38 = vmul.f32 %v7176_v32, %v7176_v32  ;;  %v170_v39 = vmul.f32 %v7178_v33, %v7178_v33 }
  0xb0   :  { %v7184_v40 = vsub.f32 %v69_v2, %v137_v36  ;;  %v7186_v41 = vsub.f32 %v71_v5, %v139_v37  ;;  %v184_v42 = vsel %vm86_vm0, %v168_v38, 0.0  ;;  %v190_v43 = vsel %vm86_vm0, %v170_v39, 0.0 }
  0xb1   :  { %185 = vadd.xlane.f32.xlu0 %v184_v42  ;;  %v101_v44 = vpop.xlane.xlu0 %100  ;;  %v104_v45 = vpop.xlane.xlu1 %103  ;;  %v6509_v42 = vld [vmem:[%s9713_s3] sm:$0xff]  }
  0xb2   :  { %v169_v46 = vmul.f32 %v7184_v40, %v7184_v40  ;;  %v140_v47 = vmul.f32 0.03125, %v101_v44  ;;  %v141_v48 = vmul.f32 0.03125, %v104_v45  ;;  %v171_v50 = vmul.f32 %v7186_v41, %v7186_v41  ;;  %5947 = vmatprep.subr.bf16.mxu0 %v6509_v42 }
  0xb3   :  { %5948 = vmatpush3.bf16.msra.mxu0 %v6509_v42  ;;  %v7306_v42 = vld [vmem:[%s9712_s2] ss:$0 sm:$0xff]  ;;  %s6991_s2 = smov 32  }
  0xb4   :  { %v187_v51 = vsel %vm86_vm0, %v169_v46, 0.0  ;;  %v7200_v52 = vsub.f32 %v72_v6, %v140_v47  ;;  %v7203_v53 = vsub.f32 %v7113_v7, %v141_v48  ;;  %v193_v57 = vsel %vm86_vm0, %v171_v50, 0.0 }
  0xb5   :  { %191 = vadd.xlane.f32.xlu0 %v190_v43  ;;  %188 = vadd.xlane.f32.xlu1 %v187_v51  ;;  %v107_v55 = vpop.xlane.xlu0 %106  ;;  %v110_v56 = vpop.xlane.xlu1 %109  ;;  %v6510_v43 = vld [vmem:[%s9713_s3 + $0x8] sm:$0xff]  }
  0xb6   :  { %v142_v58 = vmul.f32 0.03125, %v107_v55  ;;  %v143_v59 = vmul.f32 0.03125, %v110_v56  ;;  %v172_v61 = vmul.f32 %v7200_v52, %v7200_v52  ;;  %v173_v3 = vmul.f32 %v7203_v53, %v7203_v53  ;;  %5949 = vmatprep.subr.bf16.mxu0 %v6510_v43 }
  0xb7   :  { %5950 = vmatpush3.bf16.msra.mxu0 %v6510_v43 }
  0xb8   :  { %v7216_v62 = vsub.f32 %v7121_v11, %v142_v58  ;;  %v7219_v63 = vsub.f32 %v7126_v12, %v143_v59  ;;  %v196_v4 = vsel %vm86_vm0, %v172_v61, 0.0  ;;  %v199_v10 = vsel %vm86_vm0, %v173_v3, 0.0 }
  0xb9   :  { %130 = vadd.xlane.f32.xlu0 %v129_v54  ;;  %194 = vadd.xlane.f32.xlu1 %v193_v57  ;;  %v113_v1 = vpop.xlane.xlu0 %112  ;;  %v116_v2 = vpop.xlane.xlu1 %115  ;;  %v511_v3 = vlaneseq }
  0xba   :  { %v144_v5 = vmul.f32 0.03125, %v113_v1  ;;  %v145_v6 = vmul.f32 0.03125, %v116_v2  ;;  %v174_v7 = vmul.f32 %v7216_v62, %v7216_v62  ;;  %v175_v14 = vmul.f32 %v7219_v63, %v7219_v63 }
  0xbc   :  { %v7229_v8 = vsub.f32 %v7131_v13, %v144_v5  ;;  %v7232_v9 = vsub.f32 %v7142_v17, %v145_v6  ;;  %v202_v15 = vsel %vm86_vm0, %v174_v7, 0.0  ;;  %v205_v22 = vsel %vm86_vm0, %v175_v14, 0.0  ;;  %v5519_v7 = vld.sshfl [vmem:[%s9714_s4] sm:$0x11 pattern:$0x75316420] }
  0xbd   :  { %133 = vadd.xlane.f32.xlu1 %v132_v0  ;;  %197 = vadd.xlane.f32.xlu0 %v196_v4  ;;  %v119_v11 = vpop.xlane.xlu0 %118  ;;  %v122_v12 = vpop.xlane.xlu1 %121 }
  0xbe   :  { %v146_v16 = vmul.f32 0.03125, %v119_v11  ;;  %v147_v20 = vmul.f32 0.03125, %v122_v12  ;;  %v176_v13 = vmul.f32 %v7229_v8, %v7229_v8  ;;  %v177_v27 = vmul.f32 %v7232_v9, %v7232_v9 }
  0xc0   :  { %v7241_v21 = vsub.f32 %v7147_v18, %v146_v16  ;;  %v7244_v17 = vsub.f32 %v7152_v19, %v147_v20  ;;  %v208_v28 = vsel %vm86_vm0, %v176_v13, 0.0  ;;  %v211_v19 = vsel %vm86_vm0, %v177_v27, 0.0 }
  0xc1   :  { %200 = vadd.xlane.f32.xlu1 %v199_v10  ;;  %203 = vadd.xlane.f32.xlu0 %v202_v15  ;;  %v125_v23 = vpop.xlane.xlu0 %124  ;;  %v128_v26 = vpop.xlane.xlu1 %127  ;;  %v504_v20 = vunpack.i.h.s16 %v5519_v7  ;;  %v7288_v13 = vshrl.u32 %v511_v3, 7 }
  0xc2   :  { %v148_v29 = vmul.f32 0.03125, %v125_v23  ;;  %v149_v30 = vmul.f32 0.03125, %v128_v26  ;;  %v178_v18 = vmul.f32 %v7241_v21, %v7241_v21  ;;  %v179_v36 = vmul.f32 %v7244_v17, %v7244_v17 }
  0xc3   :  { %9812 = vst [vmem:[#allocation5_spill] sm:$0xff] %v7288_v13 }
  0xc4   :  { %v7253_v31 = vsub.f32 %v7165_v24, %v148_v29  ;;  %v7257_v34 = vsub.f32 %v7170_v25, %v149_v30  ;;  %v214_v35 = vsel %vm86_vm0, %v178_v18, 0.0  ;;  %v217_v24 = vsel %vm86_vm0, %v179_v36, 0.0 }
  0xc5   :  { %206 = vadd.xlane.f32.xlu1 %v205_v22  ;;  %209 = vadd.xlane.f32.xlu0 %v208_v28 }
  0xc6   :  { %v180_v37 = vmul.f32 %v7253_v31, %v7253_v31  ;;  %v181_v39 = vmul.f32 %v7257_v34, %v7257_v34 }
  0xc8   :  { %v220_v38 = vsel %vm86_vm0, %v180_v37, 0.0  ;;  %v223_v25 = vsel %vm86_vm0, %v181_v39, 0.0 }
  0xc9   :  { %212 = vadd.xlane.f32.xlu1 %v211_v19  ;;  %215 = vadd.xlane.f32.xlu0 %v214_v35 }
  0xcd   :  { %218 = vadd.xlane.f32.xlu1 %v217_v24  ;;  %221 = vadd.xlane.f32.xlu0 %v220_v38  ;;  %v508_v24 = vpack.i.b16 %v504_v20, %v504_v20  ;;  %v7301_v38 = vsub.s32 0, %v7288_v13 }
  0xcf   :  { %9813 = vst [vmem:[#allocation6_spill] sm:$0xff] %v7301_v38 }
  0xd1   :  { %224 = vadd.xlane.f32.xlu1 %v223_v25 }
 0x13e   :  { %v186_v44 = vpop.xlane.xlu0 %185 }
 0x13f   :  { %v232_v45 = vmul.f32 0.03125, %v186_v44 }
 0x141   :  { %v248_v46 = vadd.f32 1e-05, %v232_v45 }
 0x142   :  { %v189_v47 = vpop.xlane.xlu1 %188  ;;  %v192_v48 = vpop.xlane.xlu0 %191 }
 0x143   :  { %6596 = vrsqrt.f32 %v248_v46  ;;  %v233_v50 = vmul.f32 0.03125, %v189_v47  ;;  %v234_v51 = vmul.f32 0.03125, %v192_v48 }
 0x145   :  { %v249_v54 = vadd.f32 1e-05, %v233_v50  ;;  %v250_v55 = vadd.f32 1e-05, %v234_v51 }
 0x146   :  { %v195_v56 = vpop.xlane.xlu1 %194  ;;  %v131_v57 = vpop.xlane.xlu0 %130 }
 0x147   :  { %6598 = vrsqrt.f32 %v249_v54  ;;  %v235_v58 = vmul.f32 0.03125, %v195_v56  ;;  %v150_v59 = vmul.f32 0.03125, %v131_v57 }
 0x148   :  { %6600 = vrsqrt.f32 %v250_v55 }
 0x149   :  { %v251_v61 = vadd.f32 1e-05, %v235_v58  ;;  %v7276_v0 = vsub.f32 %v7195_v49, %v150_v59 }
 0x14a   :  { %v134_v1 = vpop.xlane.xlu1 %133  ;;  %v198_v2 = vpop.xlane.xlu0 %197 }
 0x14b   :  { %6602 = vrsqrt.f32 %v251_v61  ;;  %v151_v4 = vmul.f32 0.03125, %v134_v1  ;;  %v236_v5 = vmul.f32 0.03125, %v198_v2  ;;  %v182_v6 = vmul.f32 %v7276_v0, %v7276_v0 }
 0x14c   :  { %v518_v61 = vrot.slane %v508_v24, %v7301_v38 }
 0x14d   :  { %v6597_v10 = vpop.eup %6596  ;;  %v7284_v11 = vsub.f32 %v7211_v60, %v151_v4  ;;  %v252_v12 = vadd.f32 1e-05, %v236_v5  ;;  %v226_v49 = vsel %vm86_vm0, %v182_v6, 0.0  ;;  %v7295_v60 = vld [vmem:[%s9711_s1] ss:$0 sm:$0xff] }
 0x14e   :  { %v201_v14 = vpop.xlane.xlu1 %200  ;;  %227 = vadd.xlane.f32.xlu0 %v226_v49  ;;  %v204_v15 = vpop.xlane.xlu0 %203  ;;  %v280_v16 = vmul.f32 %v6597_v10, %v7176_v32  ;;  %v502_v32 = vcombine.high %v5519_v7, %v5519_v7 }
 0x14f   :  { %6604 = vrsqrt.f32 %v252_v12  ;;  %v237_v22 = vmul.f32 0.03125, %v201_v14  ;;  %v238_v23 = vmul.f32 0.03125, %v204_v15  ;;  %v183_v26 = vmul.f32 %v7284_v11, %v7284_v11 }
 0x150   :  { %v302_v37 = vmul.f32 %v7295_v60, %v280_v16  ;;  %v5521_v48 = vpack.i.b16 %v502_v32, %v502_v32  ;;  %v506_v50 = vunpack.i.h.s16 %v502_v32 }
 0x151   :  { %v6599_v27 = vpop.eup %6598  ;;  %v253_v28 = vadd.f32 1e-05, %v237_v22  ;;  %v254_v29 = vadd.f32 1e-05, %v238_v23  ;;  %v229_v30 = vsel %vm86_vm0, %v183_v26, 0.0  ;;  %v535_v22 = vpack.i.b16 %v518_v61, %v518_v61 }
 0x152   :  { %v6601_v18 = vpop.eup %6600  ;;  %230 = vadd.xlane.f32.xlu1 %v229_v30  ;;  %v207_v19 = vpop.xlane.xlu1 %206  ;;  %v281_v36 = vmul.f32 %v6599_v27, %v7184_v40  ;;  %v5520_v40 = vpack.i.b16 %v5519_v7, %v5519_v7  ;;  %v324_v55 = vadd.f32 %v7306_v42, %v302_v37  ;;  %v510_v7 = vpack.i.b16 %v506_v50, %v506_v50 }
 0x153   :  { %v210_v35 = vpop.xlane.xlu0 %209  ;;  %6606 = vrsqrt.f32 %v253_v28  ;;  %v239_v39 = vmul.f32 0.03125, %v207_v19  ;;  %v282_v43 = vmul.f32 %v6601_v18, %v7178_v33  ;;  %v522_v15 = vrot.slane %v5521_v48, %v7301_v38 }
 0x154   :  { %v240_v25 = vmul.f32 0.03125, %v210_v35  ;;  %6608 = vrsqrt.f32 %v254_v29  ;;  %v303_v44 = vmul.f32 %v7295_v60, %v281_v36  ;;  %v514_v3 = vrot.slane %v5520_v40, %v7301_v38 }
 0x155   :  { %v6603_v45 = vpop.eup %6602  ;;  %v255_v46 = vadd.f32 1e-05, %v239_v39  ;;  %v304_v58 = vmul.f32 %v7295_v60, %v282_v43  ;;  %v542_v19 = vpack.i.b16 %v522_v15, %v522_v15  ;;  %v526_v35 = vrot.slane %v510_v7, %v7301_v38 }
 0x156   :  { %v256_v47 = vadd.f32 1e-05, %v240_v25  ;;  %v213_v51 = vpop.xlane.xlu1 %212  ;;  %v325_v56 = vadd.f32 %v7306_v42, %v303_v44  ;;  %v283_v57 = vmul.f32 %v6603_v45, %v7186_v41  ;;  %v528_v26 = vpack.i.b16 %v514_v3, %v514_v3 }
 0x157   :  { %v216_v54 = vpop.xlane.xlu0 %215  ;;  %6610 = vrsqrt.f32 %v255_v46  ;;  %v241_v33 = vmul.f32 0.03125, %v213_v51  ;;  %v326_v12 = vadd.f32 %v7306_v42, %v304_v58  ;;  %v7328_v24 = vrot.slane %v535_v22, %v7301_v38 }
 0x158   :  { %v242_v59 = vmul.f32 0.03125, %v216_v54  ;;  %6612 = vrsqrt.f32 %v256_v47  ;;  %v340_v1 = vpack.c.bf16 %v325_v56, %v324_v55  ;;  %v305_v2 = vmul.f32 %v7295_v60, %v283_v57 }
 0x159   :  { %v6605_v4 = vpop.eup %6604  ;;  %v257_v5 = vadd.f32 1e-05, %v241_v33  ;;  %v7332_v25 = vrot.slane %v528_v26, %v7301_v38  ;;  %v7341_v48 = vrot.slane %v542_v19, %v7301_v38  ;;  %v549_v50 = vpack.i.b16 %v526_v35, %v526_v35 }
 0x15a   :  { %v258_v6 = vadd.f32 1e-05, %v242_v59  ;;  %v219_v10 = vpop.xlane.xlu1 %218  ;;  %5951 = vmatprep.mubr.msk.bf16.mxu0 %vm86_vm0, %v340_v1  ;;  %v327_v49 = vadd.f32 %v7306_v42, %v305_v2  ;;  %v284_v14 = vmul.f32 %v6605_v4, %v7200_v52 }
 0x15b   :  { %v222_v41 = vpop.xlane.xlu0 %221  ;;  %6614 = vrsqrt.f32 %v257_v5  ;;  %v243_v16 = vmul.f32 0.03125, %v219_v10  ;;  %v7353_v59 = vrot.slane %v549_v50, %v7301_v38 }
 0x15c   :  { %v244_v20 = vmul.f32 0.03125, %v222_v41  ;;  %6616 = vrsqrt.f32 %v258_v6  ;;  %v341_v23 = vpack.c.bf16 %v327_v49, %v326_v12  ;;  %v306_v52 = vmul.f32 %v7295_v60, %v284_v14 }
 0x15d   :  { %v6607_v27 = vpop.eup %6606  ;;  %v259_v28 = vadd.f32 1e-05, %v243_v16 }
 0x15e   :  { %v260_v29 = vadd.f32 1e-05, %v244_v20  ;;  %v6609_v30 = vpop.eup %6608  ;;  %v225_v32 = vpop.xlane.xlu1 %224  ;;  %5952 = vmatmul.mubr.msk.bf16.vlgmr.msra.gmra.mrb[0].mxu0 %vm86_vm0, %v341_v23  ;;  %v285_v18 = vmul.f32 %v6607_v27, %v7203_v53  ;;  %v328_v40 = vadd.f32 %v7306_v42, %v306_v52 }
 0x15f   :  { %6618 = vrsqrt.f32 %v259_v28  ;;  %v245_v36 = vmul.f32 0.03125, %v225_v32  ;;  %v286_v37 = vmul.f32 %v6609_v30, %v7216_v62 }
 0x160   :  { %6620 = vrsqrt.f32 %v260_v29  ;;  %v307_v39 = vmul.f32 %v7295_v60, %v285_v18 }
 0x161   :  { %v6611_v43 = vpop.eup %6610  ;;  %v261_v53 = vadd.f32 1e-05, %v245_v36  ;;  %v308_v62 = vmul.f32 %v7295_v60, %v286_v37 }
 0x162   :  { %v6613_v44 = vpop.eup %6612  ;;  %v329_v45 = vadd.f32 %v7306_v42, %v307_v39  ;;  %v287_v46 = vmul.f32 %v6611_v43, %v7219_v63 }
 0x163   :  { %6622 = vrsqrt.f32 %v261_v53  ;;  %v288_v47 = vmul.f32 %v6613_v44, %v7229_v8  ;;  %561 = vrot.lane.b32.xlu1 %v7328_v24, %s6991_s2  ;;  %v330_v63 = vadd.f32 %v7306_v42, %v308_v62 }
 0x164   :  { %v342_v51 = vpack.c.bf16 %v329_v45, %v328_v40  ;;  %v309_v54 = vmul.f32 %v7295_v60, %v287_v46  ;;  %559 = vrot.lane.b32.xlu0 %v7332_v25, %s6991_s2 }
 0x165   :  { %v6615_v55 = vpop.eup %6614  ;;  %v310_v58 = vmul.f32 %v7295_v60, %v288_v47 }
 0x166   :  { %v6617_v56 = vpop.eup %6616  ;;  %5955 = vmatprep.mubr.msk.bf16.mxu0 %vm86_vm0, %v342_v51  ;;  %v331_v8 = vadd.f32 %v7306_v42, %v309_v54  ;;  %v289_v57 = vmul.f32 %v6615_v55, %v7232_v9 }
 0x167   :  { %v290_v33 = vmul.f32 %v6617_v56, %v7241_v21  ;;  %563 = vrot.lane.b32.xlu1 %v7341_v48, %s6991_s2  ;;  %v332_v4 = vadd.f32 %v7306_v42, %v310_v58 }
 0x168   :  { %v343_v61 = vpack.c.bf16 %v331_v8, %v330_v63  ;;  %v311_v1 = vmul.f32 %v7295_v60, %v289_v57 }
 0x169   :  { %v6619_v2 = vpop.eup %6618  ;;  %v312_v21 = vmul.f32 %v7295_v60, %v290_v33 }
 0x16a   :  { %v6621_v3 = vpop.eup %6620  ;;  %5956 = vmatmul.mubr.msk.bf16.gmra.mrb[4].mxu0 %vm86_vm0, %v343_v61  ;;  %v333_v9 = vadd.f32 %v7306_v42, %v311_v1  ;;  %v291_v5 = vmul.f32 %v6619_v2, %v7244_v17 }
 0x16b   :  { %v292_v6 = vmul.f32 %v6621_v3, %v7253_v31  ;;  %565 = vrot.lane.b32.xlu1 %v7353_v59, %s6991_s2  ;;  %v334_v12 = vadd.f32 %v7306_v42, %v312_v21 }
 0x16c   :  { %v344_v7 = vpack.c.bf16 %v333_v9, %v332_v4  ;;  %v313_v10 = vmul.f32 %v7295_v60, %v291_v5 }
 0x16d   :  { %v6623_v41 = vpop.eup %6622  ;;  %v314_v17 = vmul.f32 %v7295_v60, %v292_v6 }
 0x16e   :  { %5959 = vmatprep.mubr.msk.bf16.mxu0 %vm86_vm0, %v344_v7  ;;  %v335_v49 = vadd.f32 %v7306_v42, %v313_v10  ;;  %v293_v14 = vmul.f32 %v6623_v41, %v7257_v34 }
 0x16f   :  { %v336_v31 = vadd.f32 %v7306_v42, %v314_v17 }
 0x170   :  { %v345_v15 = vpack.c.bf16 %v335_v49, %v334_v12  ;;  %v315_v16 = vmul.f32 %v7295_v60, %v293_v14 }
 0x172   :  { %5960 = vmatmul.mubr.msk.bf16.gmra.mrb[8].mxu0 %vm86_vm0, %v345_v15  ;;  %v337_v20 = vadd.f32 %v7306_v42, %v315_v16 }
 0x174   :  { %v346_v22 = vpack.c.bf16 %v337_v20, %v336_v31 }
 0x176   :  { %5963 = vmatprep.mubr.msk.bf16.mxu0 %vm86_vm0, %v346_v22 }
 0x1db   :  { %v228_v23 = vpop.xlane.xlu0 %227 }
 0x1dc   :  { %v246_v26 = vmul.f32 0.03125, %v228_v23 }
 0x1de   :  { %v262_v27 = vadd.f32 1e-05, %v246_v26 }
 0x1df   :  { %v231_v28 = vpop.xlane.xlu1 %230  ;;  %v7383_v45 = vpop.permute.xlu0 %559 }
 0x1e0   :  { %6624 = vrsqrt.f32 %v262_v27  ;;  %v247_v34 = vmul.f32 0.03125, %v231_v28 }
 0x1e2   :  { %v263_v29 = vadd.f32 1e-05, %v247_v34 }
 0x1e3   :  { %v7387_v46 = vpop.permute.xlu1 %561 }
 0x1e4   :  { %6626 = vrsqrt.f32 %v263_v29 }
 0x1e7   :  { %v7409_v8 = vpop.permute.xlu1 %563 }
 0x1ea   :  { %v6625_v30 = vpop.eup %6624 }
 0x1eb   :  { %v294_v32 = vmul.f32 %v6625_v30, %v7276_v0  ;;  %v7421_v4 = vpop.permute.xlu1 %565 }
 0x1ed   :  { %v316_v19 = vmul.f32 %v7295_v60, %v294_v32 }
 0x1ee   :  { %v6627_v18 = vpop.eup %6626 }
 0x1ef   :  { %v295_v52 = vmul.f32 %v6627_v18, %v7284_v11  ;;  %v338_v36 = vadd.f32 %v7306_v42, %v316_v19 }
 0x1f1   :  { %v317_v35 = vmul.f32 %v7295_v60, %v295_v52 }
 0x1f3   :  { %v339_v37 = vadd.f32 %v7306_v42, %v317_v35 }
 0x1f5   :  { %v347_v39 = vpack.c.bf16 %v339_v37, %v338_v36 }
 0x1f7   :  { %5964 = vmatmul.mubr.msk.bf16.gmra.mrb[12].mxu0 %vm86_vm0, %v347_v39 }
 0x231   :  { %v5953_v43 = vpop.f32.mrb[0].mxu0 }
 0x232   :  { %v422_v53 = vpop.f32.mrb[1].mxu0 }
 0x233   :  { %v5954_v44 = vpop.f32.mrb[2].mxu0 }
 0x234   :  { %v7381_v40 = vpack.c.bf16 %v5954_v44, %v5953_v43  ;;  %v425_v0 = vpop.f32.mrb[3].mxu0 }
 0x235   :  { %v7385_v11 = vpack.c.bf16 %v425_v0, %v422_v53 }
 0x236   :  { %v576_v62 = vmul.bf16 %v7387_v46, %v7381_v40  ;;  %v572_v47 = vmul.bf16 %v7383_v45, %v7381_v40  ;;  %v584_v10 = vmul.bf16 %v7421_v4, %v7381_v40  ;;  %v580_v41 = vmul.bf16 %v7409_v8, %v7381_v40 }
 0x237   :  { %5975 = vmatprep.mubr.msk.bf16.mxu1 %vm86_vm0, %v7385_v11  ;;  %5991 = vmatprep.mubr.msk.bf16.mxu0 %vm86_vm0, %v7385_v11  ;;  %v575_v60 = vmul.bf16 %v7387_v46, %v7385_v11  ;;  %v571_v42 = vmul.bf16 %v7383_v45, %v7385_v11  ;;  %v583_v6 = vmul.bf16 %v7421_v4, %v7385_v11 }
 0x238   :  { %v579_v7 = vmul.bf16 %v7409_v8, %v7385_v11 }
 0x239   :  { %752 = vrot.lane.b32.xlu1 %v575_v60, %s6992_s17  ;;  %651 = vrot.lane.b32.xlu0 %v571_v42, %s6992_s17 }
 0x23d   :  { %754 = vrot.lane.b32.xlu1 %v576_v62, %s6992_s17  ;;  %v5957_v50 = vpop.f32.mrb[4].mxu0  ;;  %653 = vrot.lane.b32.xlu0 %v572_v47, %s6992_s17 }
 0x23e   :  { %v438_v51 = vpop.f32.mrb[5].mxu0 }
 0x23f   :  { %v5958_v54 = vpop.f32.mrb[6].mxu0 }
 0x240   :  { %v7405_v55 = vpack.c.bf16 %v5958_v54, %v5957_v50  ;;  %v441_v56 = vpop.f32.mrb[7].mxu0 }
 0x241   :  { %v7407_v63 = vpack.c.bf16 %v441_v56, %v438_v51 }
 0x242   :  { %v578_v2 = vmul.bf16 %v7387_v46, %v7405_v55  ;;  %v574_v3 = vmul.bf16 %v7383_v45, %v7405_v55  ;;  %v586_v14 = vmul.bf16 %v7421_v4, %v7405_v55  ;;  %v582_v17 = vmul.bf16 %v7409_v8, %v7405_v55 }
 0x243   :  { %v577_v57 = vmul.bf16 %v7387_v46, %v7407_v63  ;;  %v573_v58 = vmul.bf16 %v7383_v45, %v7407_v63  ;;  %v585_v12 = vmul.bf16 %v7421_v4, %v7407_v63  ;;  %v581_v49 = vmul.bf16 %v7409_v8, %v7407_v63 }
 0x245   :  { %756 = vrot.lane.b32.xlu1 %v577_v57, %s6992_s17  ;;  %v5961_v33 = vpop.f32.mrb[8].mxu0  ;;  %655 = vrot.lane.b32.xlu0 %v573_v58, %s6992_s17 }
 0x246   :  { %v454_v61 = vpop.f32.mrb[9].mxu0 }
 0x247   :  { %v5962_v1 = vpop.f32.mrb[10].mxu0 }
 0x248   :  { %v7423_v9 = vpack.c.bf16 %v5962_v1, %v5961_v33  ;;  %v457_v5 = vpop.f32.mrb[11].mxu0 }
 0x249   :  { %v7425_v21 = vpack.c.bf16 %v457_v5, %v454_v61  ;;  %758 = vrot.lane.b32.xlu1 %v578_v2, %s6992_s17  ;;  %657 = vrot.lane.b32.xlu0 %v574_v3, %s6992_s17 }
 0x24a   :  { %v592_v31 = vmul.bf16 %v7387_v46, %v7423_v9  ;;  %v588_v20 = vmul.bf16 %v7383_v45, %v7423_v9 }
 0x24b   :  { %v591_v15 = vmul.bf16 %v7387_v46, %v7425_v21  ;;  %v587_v16 = vmul.bf16 %v7383_v45, %v7425_v21 }
 0x24d   :  { %930 = vrot.lane.b32.xlu1 %v583_v6, %s6992_s17  ;;  %841 = vrot.lane.b32.xlu0 %v579_v7, %s6992_s17  ;;  %v599_v6 = vmul.bf16 %v7421_v4, %v7425_v21 }
 0x251   :  { %932 = vrot.lane.b32.xlu1 %v584_v10, %s6992_s17  ;;  %843 = vrot.lane.b32.xlu0 %v580_v41, %s6992_s17  ;;  %v600_v10 = vmul.bf16 %v7421_v4, %v7423_v9 }
 0x255   :  { %934 = vrot.lane.b32.xlu1 %v585_v12, %s6992_s17  ;;  %845 = vrot.lane.b32.xlu0 %v581_v49, %s6992_s17  ;;  %v596_v12 = vmul.bf16 %v7409_v8, %v7423_v9 }
 0x259   :  { %936 = vrot.lane.b32.xlu1 %v586_v14, %s6992_s17  ;;  %847 = vrot.lane.b32.xlu0 %v582_v17, %s6992_s17 }
 0x25d   :  { %1120 = vrot.lane.b32.xlu1 %v591_v15, %s6992_s17  ;;  %1019 = vrot.lane.b32.xlu0 %v587_v16, %s6992_s17 }
 0x261   :  { %1122 = vrot.lane.b32.xlu1 %v592_v31, %s6992_s17  ;;  %1021 = vrot.lane.b32.xlu0 %v588_v20, %s6992_s17 }
 0x2ab   :  { %v753_v22 = vpop.permute.xlu1 %752  ;;  %v652_v23 = vpop.permute.xlu0 %651 }
 0x2ac   :  { %6471 = vmatprep.subr.msk.bf16.mxu1 %vm86_vm0, %v652_v23  ;;  %6475 = vmatprep.subr.msk.bf16.mxu0 %vm86_vm0, %v753_v22  ;;  %v672_v26 = vsel %vm86_vm0, %v652_v23, 0  ;;  %v761_v27 = vsel %vm86_vm0, %v753_v22, 0 }
 0x2ad   :  { %5968 = vmatpush3.bf16.xpose.msra.mxu1 %v672_v26  ;;  %5984 = vmatpush3.bf16.xpose.msra.mxu0 %v761_v27 }
 0x2af   :  { %v755_v28 = vpop.permute.xlu1 %754  ;;  %v654_v34 = vpop.permute.xlu0 %653 }
 0x2b0   :  { %6472 = vmatprep.subr.msk.bf16.mxu1 %vm86_vm0, %v654_v34  ;;  %6476 = vmatprep.subr.msk.bf16.mxu0 %vm86_vm0, %v755_v28  ;;  %v675_v29 = vsel %vm86_vm0, %v654_v34, 0  ;;  %v764_v30 = vsel %vm86_vm0, %v755_v28, 0 }
 0x2b5   :  { %5970 = vmatpush3.bf16.xpose.msra.mxu1 %v675_v29  ;;  %5986 = vmatpush3.bf16.xpose.msra.mxu0 %v764_v30 }
 0x2b7   :  { %v757_v32 = vpop.permute.xlu1 %756  ;;  %v656_v18 = vpop.permute.xlu0 %655 }
 0x2b8   :  { %6473 = vmatprep.subr.msk.bf16.mxu1 %vm86_vm0, %v656_v18  ;;  %6477 = vmatprep.subr.msk.bf16.mxu0 %vm86_vm0, %v757_v32  ;;  %v678_v52 = vsel %vm86_vm0, %v656_v18, 0  ;;  %v767_v19 = vsel %vm86_vm0, %v757_v32, 0 }
 0x2bb   :  { %v759_v35 = vpop.permute.xlu1 %758  ;;  %v658_v36 = vpop.permute.xlu0 %657 }
 0x2bc   :  { %v681_v37 = vsel %vm86_vm0, %v658_v36, 0  ;;  %v770_v39 = vsel %vm86_vm0, %v759_v35, 0 }
 0x2bd   :  { %5972 = vmatpush3.bf16.xpose.msra.mxu1 %v678_v52  ;;  %5988 = vmatpush3.bf16.xpose.msra.mxu0 %v767_v19 }
 0x2be   :  { %6474 = vmatprep.subr.msk.bf16.mxu1 %vm86_vm0, %v658_v36  ;;  %6478 = vmatprep.subr.msk.bf16.mxu0 %vm86_vm0, %v759_v35 }
 0x2bf   :  { %v931_v43 = vpop.permute.xlu1 %930  ;;  %v842_v53 = vpop.permute.xlu0 %841 }
 0x2c0   :  { %v850_v47 = vsel %vm86_vm0, %v842_v53, 0  ;;  %v939_v50 = vsel %vm86_vm0, %v931_v43, 0 }
 0x2c3   :  { %v933_v51 = vpop.permute.xlu1 %932  ;;  %v844_v54 = vpop.permute.xlu0 %843 }
 0x2c4   :  { %v853_v33 = vsel %vm86_vm0, %v844_v54, 0  ;;  %v942_v61 = vsel %vm86_vm0, %v933_v51, 0 }
 0x2c5   :  { %5974 = vmatpush3.bf16.xpose.msra.mxu1 %v681_v37  ;;  %5990 = vmatpush3.bf16.xpose.msra.mxu0 %v770_v39 }
 0x2c6   :  { %6479 = vmatprep.subr.msk.bf16.mxu1 %vm86_vm0, %v842_v53  ;;  %6483 = vmatprep.subr.msk.bf16.mxu0 %vm86_vm0, %v931_v43 }
 0x2c7   :  { %v935_v2 = vpop.permute.xlu1 %934  ;;  %v846_v5 = vpop.permute.xlu0 %845 }
 0x2c8   :  { %v945_v7 = vsel %vm86_vm0, %v935_v2, 0 }
 0x2ca   :  { %v5965_v44 = vpop.f32.mrb[12].mxu0 }
 0x2cb   :  { %v470_v0 = vpop.f32.mrb[13].mxu0  ;;  %v937_v41 = vpop.permute.xlu1 %936 }
 0x2cc   :  { %v5966_v60 = vpop.f32.mrb[14].mxu0  ;;  %5976 = vmatmul.mubr.msk.bf16.vlgmr.msra.gmra.mrb[0].mxu1 %vm86_vm0, %v7381_v40  ;;  %5992 = vmatmul.mubr.msk.bf16.vlgmr.msra.gmra.mrb[16].mxu0 %vm86_vm0, %v7381_v40  ;;  %v848_v49 = vpop.permute.xlu0 %847  ;;  %v948_v16 = vsel %vm86_vm0, %v937_v41, 0 }
 0x2cd   :  { %v7487_v42 = vpack.c.bf16 %v5966_v60, %v5965_v44  ;;  %v473_v62 = vpop.f32.mrb[15].mxu0  ;;  %5979 = vmatprep.mubr.msk.bf16.mxu1 %vm86_vm0, %v7407_v63  ;;  %5995 = vmatprep.mubr.msk.bf16.mxu0 %vm86_vm0, %v7407_v63  ;;  %v859_v15 = vsel %vm86_vm0, %v848_v49, 0 }
 0x2ce   :  { %v7495_v56 = vpack.c.bf16 %v473_v62, %v470_v0  ;;  %6000 = vmatpush3.bf16.xpose.msra.mxu1 %v850_v47  ;;  %6016 = vmatpush3.bf16.xpose.msra.mxu0 %v939_v50 }
 0x2cf   :  { %9814 = vst [vmem:[#allocation7_spill] sm:$0xff] %v7487_v42  ;;  %6480 = vmatprep.subr.msk.bf16.mxu1 %vm86_vm0, %v844_v54  ;;  %6484 = vmatprep.subr.msk.bf16.mxu0 %vm86_vm0, %v933_v51  ;;  %v594_v1 = vmul.bf16 %v7387_v46, %v7487_v42  ;;  %v590_v3 = vmul.bf16 %v7383_v45, %v7487_v42  ;;  %v1121_v20 = vpop.permute.xlu1 %1120 }
 0x2d0   :  { %v593_v57 = vmul.bf16 %v7387_v46, %v7495_v56  ;;  %v589_v58 = vmul.bf16 %v7383_v45, %v7495_v56  ;;  %v595_v46 = vmul.bf16 %v7409_v8, %v7425_v21  ;;  %v856_v45 = vsel %vm86_vm0, %v846_v5, 0  ;;  %v1020_v23 = vpop.permute.xlu0 %1019 }
 0x2d1   :  { %v601_v14 = vmul.bf16 %v7421_v4, %v7495_v56  ;;  %v597_v17 = vmul.bf16 %v7409_v8, %v7495_v56  ;;  %v602_v31 = vmul.bf16 %v7421_v4, %v7487_v42  ;;  %v598_v22 = vmul.bf16 %v7409_v8, %v7487_v42 }
 0x2d2   :  { %1124 = vrot.lane.b32.xlu1 %v593_v57, %s6992_s17  ;;  %1023 = vrot.lane.b32.xlu0 %v589_v58, %s6992_s17  ;;  %v1040_v8 = vsel %vm86_vm0, %v1020_v23, 0  ;;  %v1129_v4 = vsel %vm86_vm0, %v1121_v20, 0 }
 0x2d4   :  { %5980 = vmatmul.mubr.msk.bf16.gmra.mrb[4].mxu1 %vm86_vm0, %v7405_v55  ;;  %5996 = vmatmul.mubr.msk.bf16.gmra.mrb[20].mxu0 %vm86_vm0, %v7405_v55 }
 0x2d5   :  { %6007 = vmatprep.mubr.msk.bf16.mxu1 %vm86_vm0, %v7385_v11  ;;  %6023 = vmatprep.mubr.msk.bf16.mxu0 %vm86_vm0, %v7385_v11 }
 0x2d6   :  { %6002 = vmatpush3.bf16.xpose.msra.mxu1 %v853_v33  ;;  %6018 = vmatpush3.bf16.xpose.msra.mxu0 %v942_v61 }
 0x2d7   :  { %6485 = vmatprep.subr.msk.bf16.mxu0 %vm86_vm0, %v935_v2  ;;  %1126 = vrot.lane.b32.xlu1 %v594_v1, %s6992_s17 }
 0x2d8   :  { %1025 = vrot.lane.b32.xlu0 %v590_v3, %s6992_s17  ;;  %6481 = vmatprep.subr.msk.bf16.mxu1 %vm86_vm0, %v846_v5 }
 0x2db   :  { %1298 = vrot.lane.b32.xlu1 %v599_v6, %s6992_s17 }
 0x2dc   :  { %1209 = vrot.lane.b32.xlu0 %v595_v46, %s6992_s17 }
 0x2de   :  { %6004 = vmatpush3.bf16.xpose.msra.mxu1 %v856_v45  ;;  %6020 = vmatpush3.bf16.xpose.msra.mxu0 %v945_v7 }
 0x2df   :  { %6486 = vmatprep.subr.msk.bf16.mxu0 %vm86_vm0, %v937_v41  ;;  %1300 = vrot.lane.b32.xlu1 %v600_v10, %s6992_s17 }
 0x2e0   :  { %1211 = vrot.lane.b32.xlu0 %v596_v12, %s6992_s17  ;;  %6482 = vmatprep.subr.msk.bf16.mxu1 %vm86_vm0, %v848_v49 }
 0x2e3   :  { %1302 = vrot.lane.b32.xlu1 %v601_v14, %s6992_s17 }
 0x2e4   :  { %1213 = vrot.lane.b32.xlu0 %v597_v17, %s6992_s17 }
 0x2e6   :  { %6006 = vmatpush3.bf16.xpose.msra.mxu1 %v859_v15  ;;  %6022 = vmatpush3.bf16.xpose.msra.mxu0 %v948_v16 }
 0x2e7   :  { %6491 = vmatprep.subr.msk.bf16.mxu0 %vm86_vm0, %v1121_v20  ;;  %1304 = vrot.lane.b32.xlu1 %v602_v31, %s6992_s17 }
 0x2e8   :  { %1215 = vrot.lane.b32.xlu0 %v598_v22, %s6992_s17  ;;  %6487 = vmatprep.subr.msk.bf16.mxu1 %vm86_vm0, %v1020_v23 }
 0x2eb   :  { %605 = vrot.lane.b32.xlu1 %v7328_v24, %s6989_s0  ;;  %v1123_v24 = vpop.permute.xlu1 %1122 }
 0x2ec   :  { %603 = vrot.lane.b32.xlu0 %v7332_v25, %s6989_s0  ;;  %v1022_v25 = vpop.permute.xlu0 %1021  ;;  %v1132_v27 = vsel %vm86_vm0, %v1123_v24, 0 }
 0x2ed   :  { %6008 = vmatmul.mubr.msk.bf16.vlgmr.msra.gmra.mrb[8].mxu1 %vm86_vm0, %v7381_v40  ;;  %6024 = vmatmul.mubr.msk.bf16.vlgmr.msra.gmra.mrb[24].mxu0 %vm86_vm0, %v7381_v40  ;;  %v1043_v26 = vsel %vm86_vm0, %v1022_v25, 0 }
 0x2ee   :  { %6011 = vmatprep.mubr.msk.bf16.mxu1 %vm86_vm0, %v7407_v63  ;;  %6027 = vmatprep.mubr.msk.bf16.mxu0 %vm86_vm0, %v7407_v63 }
 0x2ef   :  { %6032 = vmatpush3.bf16.xpose.msra.mxu1 %v1040_v8  ;;  %6048 = vmatpush3.bf16.xpose.msra.mxu0 %v1129_v4 }
 0x2f0   :  { %6492 = vmatprep.subr.msk.bf16.mxu0 %vm86_vm0, %v1123_v24  ;;  %609 = vrot.lane.b32.xlu1 %v7353_v59, %s6989_s0 }
 0x2f1   :  { %607 = vrot.lane.b32.xlu0 %v7341_v48, %s6989_s0  ;;  %6488 = vmatprep.subr.msk.bf16.mxu1 %vm86_vm0, %v1022_v25 }
 0x2f5   :  { %6012 = vmatmul.mubr.msk.bf16.gmra.mrb[12].mxu1 %vm86_vm0, %v7405_v55  ;;  %6028 = vmatmul.mubr.msk.bf16.gmra.mrb[28].mxu0 %vm86_vm0, %v7405_v55 }
 0x2f6   :  { %6039 = vmatprep.mubr.msk.bf16.mxu1 %vm86_vm0, %v7425_v21  ;;  %6055 = vmatprep.mubr.msk.bf16.mxu0 %vm86_vm0, %v7425_v21 }
 0x2f7   :  { %6034 = vmatpush3.bf16.xpose.msra.mxu1 %v1043_v26  ;;  %6050 = vmatpush3.bf16.xpose.msra.mxu0 %v1132_v27 }
 0x344   :  { %v1125_v48 = vpop.permute.xlu1 %1124  ;;  %v1024_v59 = vpop.permute.xlu0 %1023 }
 0x345   :  { %6489 = vmatprep.subr.msk.bf16.mxu1 %vm86_vm0, %v1024_v59  ;;  %6493 = vmatprep.subr.msk.bf16.mxu0 %vm86_vm0, %v1125_v48  ;;  %v1046_v28 = vsel %vm86_vm0, %v1024_v59, 0  ;;  %v1135_v34 = vsel %vm86_vm0, %v1125_v48, 0 }
 0x346   :  { %6036 = vmatpush3.bf16.xpose.msra.mxu1 %v1046_v28  ;;  %6052 = vmatpush3.bf16.xpose.msra.mxu0 %v1135_v34 }
 0x349   :  { %v1127_v29 = vpop.permute.xlu1 %1126 }
 0x34a   :  { %v1026_v30 = vpop.permute.xlu0 %1025  ;;  %6494 = vmatprep.subr.msk.bf16.mxu0 %vm86_vm0, %v1127_v29  ;;  %v1138_v52 = vsel %vm86_vm0, %v1127_v29, 0 }
 0x34b   :  { %6490 = vmatprep.subr.msk.bf16.mxu1 %vm86_vm0, %v1026_v30  ;;  %v1049_v18 = vsel %vm86_vm0, %v1026_v30, 0 }
 0x34d   :  { %v1299_v32 = vpop.permute.xlu1 %1298 }
 0x34e   :  { %v1210_v19 = vpop.permute.xlu0 %1209  ;;  %6038 = vmatpush3.bf16.xpose.msra.mxu1 %v1049_v18  ;;  %6054 = vmatpush3.bf16.xpose.msra.mxu0 %v1138_v52  ;;  %v1307_v53 = vsel %vm86_vm0, %v1299_v32, 0 }
 0x34f   :  { %6495 = vmatprep.subr.msk.bf16.mxu1 %vm86_vm0, %v1210_v19  ;;  %6499 = vmatprep.subr.msk.bf16.mxu0 %vm86_vm0, %v1299_v32  ;;  %v1218_v43 = vsel %vm86_vm0, %v1210_v19, 0 }
 0x351   :  { %v1301_v35 = vpop.permute.xlu1 %1300 }
 0x352   :  { %v1212_v36 = vpop.permute.xlu0 %1211  ;;  %v1310_v50 = vsel %vm86_vm0, %v1301_v35, 0 }
 0x353   :  { %v1221_v47 = vsel %vm86_vm0, %v1212_v36, 0 }
 0x355   :  { %v1303_v37 = vpop.permute.xlu1 %1302  ;;  %6040 = vmatmul.mubr.msk.bf16.vlgmr.msra.gmra.mrb[16].mxu1 %vm86_vm0, %v7423_v9  ;;  %6056 = vmatmul.mubr.msk.bf16.vlgmr.msra.gmra.mrb[32].mxu0 %vm86_vm0, %v7423_v9 }
 0x356   :  { %v1214_v39 = vpop.permute.xlu0 %1213  ;;  %6043 = vmatprep.mubr.msk.bf16.mxu1 %vm86_vm0, %v7495_v56  ;;  %6059 = vmatprep.mubr.msk.bf16.mxu0 %vm86_vm0, %v7495_v56  ;;  %v1313_v61 = vsel %vm86_vm0, %v1303_v37, 0 }
 0x357   :  { %6064 = vmatpush3.bf16.xpose.msra.mxu1 %v1218_v43  ;;  %6080 = vmatpush3.bf16.xpose.msra.mxu0 %v1307_v53  ;;  %v1224_v33 = vsel %vm86_vm0, %v1214_v39, 0 }
 0x358   :  { %6496 = vmatprep.subr.msk.bf16.mxu1 %vm86_vm0, %v1212_v36  ;;  %6500 = vmatprep.subr.msk.bf16.mxu0 %vm86_vm0, %v1301_v35 }
 0x359   :  { %v1305_v44 = vpop.permute.xlu1 %1304 }
 0x35a   :  { %v1216_v0 = vpop.permute.xlu0 %1215  ;;  %v1316_v45 = vsel %vm86_vm0, %v1305_v44, 0 }
 0x35b   :  { %v1227_v46 = vsel %vm86_vm0, %v1216_v0, 0 }
 0x35d   :  { %v7607_v60 = vpop.permute.xlu1 %605  ;;  %6044 = vmatmul.mubr.msk.bf16.gmra.mrb[20].mxu1 %vm86_vm0, %v7487_v42  ;;  %6060 = vmatmul.mubr.msk.bf16.gmra.mrb[36].mxu0 %vm86_vm0, %v7487_v42 }
 0x35e   :  { %v7613_v62 = vpop.permute.xlu0 %603  ;;  %6071 = vmatprep.mubr.msk.bf16.mxu1 %vm86_vm0, %v7425_v21  ;;  %6087 = vmatprep.mubr.msk.bf16.mxu0 %vm86_vm0, %v7425_v21  ;;  %v619_v51 = vmul.bf16 %v7607_v60, %v7385_v11  ;;  %v620_v57 = vmul.bf16 %v7607_v60, %v7381_v40  ;;  %v621_v5 = vmul.bf16 %v7607_v60, %v7407_v63 }
 0x35f   :  { %6066 = vmatpush3.bf16.xpose.msra.mxu1 %v1221_v47  ;;  %6082 = vmatpush3.bf16.xpose.msra.mxu0 %v1310_v50  ;;  %v615_v54 = vmul.bf16 %v7613_v62, %v7385_v11  ;;  %v616_v58 = vmul.bf16 %v7613_v62, %v7381_v40  ;;  %v618_v1 = vmul.bf16 %v7613_v62, %v7405_v55 }
 0x360   :  { %6501 = vmatprep.subr.msk.bf16.mxu0 %vm86_vm0, %v1303_v37  ;;  %2217 = vrot.lane.b32.xlu1 %v619_v51, %s6989_s0  ;;  %v617_v2 = vmul.bf16 %v7613_v62, %v7407_v63  ;;  %v622_v7 = vmul.bf16 %v7607_v60, %v7405_v55  ;;  %v631_v14 = vmul.bf16 %v7613_v62, %v7425_v21 }
 0x361   :  { %6497 = vmatprep.subr.msk.bf16.mxu1 %vm86_vm0, %v1214_v39  ;;  %2124 = vrot.lane.b32.xlu0 %v615_v54, %s6989_s0  ;;  %v632_v15 = vmul.bf16 %v7613_v62, %v7423_v9  ;;  %v637_v31 = vmul.bf16 %v7607_v60, %v7495_v56  ;;  %v635_v20 = vmul.bf16 %v7607_v60, %v7425_v21 }
 0x362   :  { %v7659_v41 = vpop.permute.xlu1 %609  ;;  %v634_v23 = vmul.bf16 %v7613_v62, %v7487_v42  ;;  %v638_v8 = vmul.bf16 %v7607_v60, %v7487_v42  ;;  %v633_v30 = vmul.bf16 %v7613_v62, %v7495_v56 }
 0x363   :  { %v7641_v3 = vpop.permute.xlu0 %607  ;;  %9816 = vst [vmem:[#allocation9_spill] sm:$0xff] %v7659_v41  ;;  %v627_v12 = vmul.bf16 %v7659_v41, %v7385_v11  ;;  %v629_v49 = vmul.bf16 %v7659_v41, %v7407_v63  ;;  %v645_v22 = vmul.bf16 %v7659_v41, %v7495_v56  ;;  %v643_v4 = vmul.bf16 %v7659_v41, %v7425_v21 }
 0x364   :  { %2219 = vrot.lane.b32.xlu1 %v620_v57, %s6989_s0  ;;  %9815 = vst [vmem:[#allocation8_spill] sm:$0xff] %v7641_v3  ;;  %v623_v6 = vmul.bf16 %v7641_v3, %v7385_v11  ;;  %v624_v10 = vmul.bf16 %v7641_v3, %v7381_v40  ;;  %v628_v11 = vmul.bf16 %v7659_v41, %v7381_v40 }
 0x365   :  { %2126 = vrot.lane.b32.xlu0 %v616_v58, %s6989_s0  ;;  %v625_v17 = vmul.bf16 %v7641_v3, %v7407_v63  ;;  %v626_v40 = vmul.bf16 %v7641_v3, %v7405_v55  ;;  %v639_v16 = vmul.bf16 %v7641_v3, %v7425_v21  ;;  %v630_v63 = vmul.bf16 %v7659_v41, %v7405_v55 }
 0x366   :  { %v636_v55 = vmul.bf16 %v7607_v60, %v7423_v9  ;;  %v640_v24 = vmul.bf16 %v7641_v3, %v7423_v9  ;;  %v644_v27 = vmul.bf16 %v7659_v41, %v7423_v9  ;;  %v641_v18 = vmul.bf16 %v7641_v3, %v7495_v56 }
 0x367   :  { %6068 = vmatpush3.bf16.xpose.msra.mxu1 %v1224_v33  ;;  %6084 = vmatpush3.bf16.xpose.msra.mxu0 %v1313_v61 }
 0x368   :  { %6498 = vmatprep.subr.msk.bf16.mxu1 %vm86_vm0, %v1216_v0  ;;  %6502 = vmatprep.subr.msk.bf16.mxu0 %vm86_vm0, %v1305_v44 }
 0x369   :  { %2130 = vrot.lane.b32.xlu1 %v618_v1, %s6989_s0  ;;  %2128 = vrot.lane.b32.xlu0 %v617_v2, %s6989_s0 }
 0x36d   :  { %2221 = vrot.lane.b32.xlu0 %v621_v5, %s6989_s0  ;;  %2310 = vrot.lane.b32.xlu1 %v623_v6, %s6989_s0 }
 0x36f   :  { %6070 = vmatpush3.bf16.xpose.msra.mxu1 %v1227_v46  ;;  %6086 = vmatpush3.bf16.xpose.msra.mxu0 %v1316_v45 }
 0x371   :  { %2223 = vrot.lane.b32.xlu0 %v622_v7, %s6989_s0  ;;  %2312 = vrot.lane.b32.xlu1 %v624_v10, %s6989_s0 }
 0x375   :  { %2403 = vrot.lane.b32.xlu0 %v627_v12, %s6989_s0  ;;  %2407 = vrot.lane.b32.xlu1 %v629_v49, %s6989_s0 }
 0x376   :  { %6072 = vmatmul.mubr.msk.bf16.vlgmr.msra.gmra.mrb[24].mxu1 %vm86_vm0, %v7423_v9  ;;  %6088 = vmatmul.mubr.msk.bf16.vlgmr.msra.gmra.mrb[40].mxu0 %vm86_vm0, %v7423_v9 }
 0x377   :  { %6075 = vmatprep.mubr.msk.bf16.mxu1 %vm86_vm0, %v7495_v56  ;;  %6091 = vmatprep.mubr.msk.bf16.mxu0 %vm86_vm0, %v7495_v56 }
 0x379   :  { %2405 = vrot.lane.b32.xlu0 %v628_v11, %s6989_s0  ;;  %2496 = vrot.lane.b32.xlu1 %v631_v14, %s6989_s0 }
 0x37d   :  { %2314 = vrot.lane.b32.xlu0 %v625_v17, %s6989_s0  ;;  %2498 = vrot.lane.b32.xlu1 %v632_v15, %s6989_s0 }
 0x37e   :  { %6076 = vmatmul.mubr.msk.bf16.gmra.mrb[28].mxu1 %vm86_vm0, %v7487_v42  ;;  %6092 = vmatmul.mubr.msk.bf16.gmra.mrb[44].mxu0 %vm86_vm0, %v7487_v42 }
 0x381   :  { %2316 = vrot.lane.b32.xlu0 %v626_v40, %s6989_s0  ;;  %2682 = vrot.lane.b32.xlu1 %v639_v16, %s6989_s0 }
 0x385   :  { %2409 = vrot.lane.b32.xlu0 %v630_v63, %s6989_s0  ;;  %2593 = vrot.lane.b32.xlu1 %v637_v31, %s6989_s0 }
 0x389   :  { %2589 = vrot.lane.b32.xlu0 %v635_v20, %s6989_s0  ;;  %2779 = vrot.lane.b32.xlu1 %v645_v22, %s6989_s0 }
 0x38d   :  { %2591 = vrot.lane.b32.xlu0 %v636_v55, %s6989_s0 }
 0x391   :  { %2502 = vrot.lane.b32.xlu0 %v634_v23, %s6989_s0 }
 0x395   :  { %2595 = vrot.lane.b32.xlu0 %v638_v8, %s6989_s0 }
 0x399   :  { %2775 = vrot.lane.b32.xlu0 %v643_v4, %s6989_s0 }
 0x39d   :  { %2684 = vrot.lane.b32.xlu0 %v640_v24, %s6989_s0 }
 0x39f   :  { %v7726_v25 = vpop.f32.mrb[0].mxu1  ;;  %v7728_v26 = vpop.f32.mrb[16].mxu0 }
 0x3a0   :  { %v7732_v48 = vpop.f32.mrb[1].mxu1  ;;  %v7734_v59 = vpop.f32.mrb[17].mxu0  ;;  %v1390_v1 = vsel %vm1383_vm1, %v7726_v25, -inf  ;;  %v1414_v11 = vsel %vm1383_vm1, %v7728_v26, -inf }
 0x3a1   :  { %2777 = vrot.lane.b32.xlu0 %v644_v27, %s6989_s0  ;;  %v7737_v21 = vpop.f32.mrb[2].mxu1  ;;  %v7739_v28 = vpop.f32.mrb[18].mxu0  ;;  %v1384_v17 = vsel %vm1383_vm1, %v7732_v48, -inf  ;;  %v1408_v63 = vsel %vm1383_vm1, %v7734_v59, -inf }
 0x3a2   :  { %v7741_v34 = vpop.f32.mrb[3].mxu1  ;;  %v7743_v29 = vpop.f32.mrb[19].mxu0  ;;  %v1417_v43 = vsel %vm1383_vm1, %v7739_v28, -inf  ;;  %v1393_v55 = vsel %vm1383_vm1, %v7737_v21, -inf }
 0x3a3   :  { %v1387_v56 = vsel %vm1383_vm1, %v7741_v34, -inf  ;;  %v1411_v53 = vsel %vm1383_vm1, %v7743_v29, -inf }
 0x3a5   :  { %2500 = vrot.lane.b32.xlu0 %v633_v30, %s6989_s0 }
 0x3a7   :  { %v7748_v9 = vpop.f32.mrb[4].mxu1  ;;  %v7750_v32 = vpop.f32.mrb[20].mxu0 }
 0x3a8   :  { %v7754_v52 = vpop.f32.mrb[5].mxu1  ;;  %v7756_v19 = vpop.f32.mrb[21].mxu0  ;;  %v1402_v4 = vsel %vm1383_vm1, %v7748_v9, -inf }
 0x3a9   :  { %2686 = vrot.lane.b32.xlu0 %v641_v18, %s6989_s0  ;;  %v7759_v35 = vpop.f32.mrb[6].mxu1  ;;  %v7761_v36 = vpop.f32.mrb[22].mxu0  ;;  %v1426_v18 = vsel %vm1383_vm1, %v7750_v32, -inf }
 0x3aa   :  { %v7763_v37 = vpop.f32.mrb[7].mxu1  ;;  %v7765_v39 = vpop.f32.mrb[23].mxu0  ;;  %v1405_v44 = vsel %vm1383_vm1, %v7759_v35, -inf  ;;  %v1429_v0 = vsel %vm1383_vm1, %v7761_v36, -inf }
 0x3ab   :  { %v1399_v47 = vsel %vm1383_vm1, %v7763_v37, -inf  ;;  %v1423_v61 = vsel %vm1383_vm1, %v7765_v39, -inf }
 0x3ad   :  { %1418 = vmax.xlane.f32.xlu1 %v1417_v43 }
 0x3b1   :  { %1388 = vmax.xlane.f32.xlu1 %v1387_v56 }
 0x3b5   :  { %1412 = vmax.xlane.f32.xlu1 %v1411_v53 }
 0x3b9   :  { %1406 = vmax.xlane.f32.xlu1 %v1405_v44  ;;  %v1396_v44 = vsel %vm1383_vm1, %v7754_v52, -inf }
 0x3bd   :  { %1430 = vmax.xlane.f32.xlu1 %v1429_v0 }
 0x3c0   :  { %v7777_v60 = vpop.f32.mrb[8].mxu1  ;;  %v7779_v62 = vpop.f32.mrb[24].mxu0 }
 0x3c1   :  { %1400 = vmax.xlane.f32.xlu1 %v1399_v47  ;;  %v7783_v50 = vpop.f32.mrb[9].mxu1  ;;  %v7785_v51 = vpop.f32.mrb[25].mxu0 }
 0x3c2   :  { %v7787_v54 = vpop.f32.mrb[10].mxu1  ;;  %v7789_v57 = vpop.f32.mrb[26].mxu0 }
 0x3c3   :  { %v7791_v58 = vpop.f32.mrb[11].mxu1  ;;  %v7793_v33 = vpop.f32.mrb[27].mxu0  ;;  %v1441_v6 = vsel %vm1383_vm1, %v7787_v54, -inf  ;;  %v1465_v14 = vsel %vm1383_vm1, %v7789_v57, -inf }
 0x3c4   :  { %v1435_v15 = vsel %vm1383_vm1, %v7791_v58, -inf  ;;  %v1459_v31 = vsel %vm1383_vm1, %v7793_v33, -inf }
 0x3c5   :  { %1424 = vmax.xlane.f32.xlu1 %v1423_v61  ;;  %v1420_v61 = vsel %vm1383_vm1, %v7756_v19, -inf }
 0x3c8   :  { %1391 = vmax.xlane.f32.xlu0 %v1390_v1  ;;  %v7799_v2 = vpop.f32.mrb[12].mxu1  ;;  %v7801_v5 = vpop.f32.mrb[28].mxu0  ;;  %v1438_v1 = vsel %vm1383_vm1, %v7777_v60, -inf }
 0x3c9   :  { %1442 = vmax.xlane.f32.xlu1 %v1441_v6  ;;  %v7805_v46 = vpop.f32.mrb[13].mxu1  ;;  %v7807_v45 = vpop.f32.mrb[29].mxu0  ;;  %v1462_v6 = vsel %vm1383_vm1, %v7779_v62, -inf }
 0x3ca   :  { %v7809_v7 = vpop.f32.mrb[14].mxu1  ;;  %v7811_v10 = vpop.f32.mrb[30].mxu0 }
 0x3cb   :  { %v7813_v12 = vpop.f32.mrb[15].mxu1  ;;  %v7815_v49 = vpop.f32.mrb[31].mxu0  ;;  %v1453_v23 = vsel %vm1383_vm1, %v7809_v7, -inf  ;;  %v1477_v27 = vsel %vm1383_vm1, %v7811_v10, -inf }
 0x3cc   :  { %1415 = vmax.xlane.f32.xlu0 %v1414_v11  ;;  %v1447_v43 = vsel %vm1383_vm1, %v7813_v12, -inf  ;;  %v1471_v0 = vsel %vm1383_vm1, %v7815_v49, -inf  ;;  %v1432_v11 = vsel %vm1383_vm1, %v7783_v50, -inf }
 0x3cd   :  { %1466 = vmax.xlane.f32.xlu1 %v1465_v14  ;;  %v1456_v14 = vsel %vm1383_vm1, %v7785_v51, -inf }
 0x3d0   :  { %1385 = vmax.xlane.f32.xlu0 %v1384_v17  ;;  %v1450_v17 = vsel %vm1383_vm1, %v7799_v2, -inf }
 0x3d1   :  { %1436 = vmax.xlane.f32.xlu1 %v1435_v15  ;;  %v1474_v15 = vsel %vm1383_vm1, %v7801_v5, -inf }
 0x3d2   :  { %v2218_v40 = vpop.permute.xlu1 %2217 }
 0x3d3   :  { %v2125_v16 = vpop.permute.xlu0 %2124  ;;  %6111 = vmatprep.subr.bf16.mxu0 %v2218_v40 }
 0x3d4   :  { %1409 = vmax.xlane.f32.xlu0 %v1408_v63  ;;  %6095 = vmatprep.subr.bf16.mxu1 %v2125_v16  ;;  %v1468_v63 = vsel %vm1383_vm1, %v7807_v45, -inf }
 0x3d5   :  { %6112 = vmatpush3.bf16.msra.mxu0 %v2218_v40  ;;  %1460 = vmax.xlane.f32.xlu1 %v1459_v31 }
 0x3d6   :  { %6096 = vmatpush3.bf16.msra.mxu1 %v2125_v16  ;;  %v2220_v20 = vpop.permute.xlu1 %2219  ;;  %v1444_v16 = vsel %vm1383_vm1, %v7805_v46, -inf }
 0x3d7   :  { %v2127_v22 = vpop.permute.xlu0 %2126  ;;  %6113 = vmatprep.subr.bf16.mxu0 %v2220_v20 }
 0x3d8   :  { %1394 = vmax.xlane.f32.xlu0 %v1393_v55  ;;  %6097 = vmatprep.subr.bf16.mxu1 %v2127_v22 }
 0x3d9   :  { %6114 = vmatpush3.bf16.msra.mxu0 %v2220_v20  ;;  %1454 = vmax.xlane.f32.xlu1 %v1453_v23 }
 0x3da   :  { %6098 = vmatpush3.bf16.msra.mxu1 %v2127_v22 }
 0x3db   :  { %v2129_v8 = vpop.permute.xlu0 %2128  ;;  %v2131_v24 = vpop.permute.xlu1 %2130 }
 0x3dc   :  { %1403 = vmax.xlane.f32.xlu0 %v1402_v4  ;;  %6099 = vmatprep.subr.bf16.mxu1 %v2129_v8 }
 0x3dd   :  { %1478 = vmax.xlane.f32.xlu1 %v1477_v27 }
 0x3de   :  { %6100 = vmatpush3.bf16.msra.mxu1 %v2129_v8 }
 0x3df   :  { %6101 = vmatprep.subr.bf16.mxu1 %v2131_v24  ;;  %v2222_v30 = vpop.permute.xlu0 %2221  ;;  %v7841_v56 = vpop.permute.xlu1 %2310 }
 0x3e0   :  { %1427 = vmax.xlane.f32.xlu0 %v1426_v18  ;;  %6115 = vmatprep.subr.bf16.mxu0 %v2222_v30  ;;  %9817 = vst [vmem:[#allocation10_spill] sm:$0xff] %v7841_v56 }
 0x3e1   :  { %1448 = vmax.xlane.f32.xlu1 %v1447_v43  ;;  %6116 = vmatpush3.bf16.msra.mxu0 %v2222_v30 }
 0x3e2   :  { %6102 = vmatpush3.bf16.msra.mxu1 %v2131_v24 }
 0x3e3   :  { %6127 = vmatprep.subr.bf16.mxu1 %v7841_v56  ;;  %v2224_v53 = vpop.permute.xlu0 %2223  ;;  %v7873_v20 = vpop.permute.xlu1 %2312 }
 0x3e4   :  { %1397 = vmax.xlane.f32.xlu0 %v1396_v44  ;;  %6117 = vmatprep.subr.bf16.mxu0 %v2224_v53  ;;  %9821 = vst [vmem:[#allocation14_spill] sm:$0xff] %v7873_v20 }
 0x3e5   :  { %1472 = vmax.xlane.f32.xlu1 %v1471_v0  ;;  %6118 = vmatpush3.bf16.msra.mxu0 %v2224_v53 }
 0x3e7   :  { %v7848_v47 = vpop.permute.xlu0 %2403  ;;  %v7877_v55 = vpop.permute.xlu1 %2407 }
 0x3e8   :  { %9818 = vst [vmem:[#allocation11_spill] sm:$0xff] %v7848_v47  ;;  %1421 = vmax.xlane.f32.xlu0 %v1420_v61  ;;  %6143 = vmatprep.subr.bf16.mxu0 %v7848_v47  ;;  %9823 = vst [vmem:[#allocation16_spill] sm:$0xff] %v7877_v55 }
 0x3eb   :  { %v7865_v40 = vpop.permute.xlu0 %2405  ;;  %v7881_v8 = vpop.permute.xlu1 %2496 }
 0x3ec   :  { %1439 = vmax.xlane.f32.xlu0 %v1438_v1  ;;  %9819 = vst [vmem:[#allocation12_spill] sm:$0xff] %v7865_v40  ;;  %9825 = vst [vmem:[#allocation18_spill] sm:$0xff] %v7881_v8 }
 0x3ef   :  { %v7871_v31 = vpop.permute.xlu0 %2314  ;;  %v7885_v24 = vpop.permute.xlu1 %2498 }
 0x3f0   :  { %1463 = vmax.xlane.f32.xlu0 %v1462_v6  ;;  %9820 = vst [vmem:[#allocation13_spill] sm:$0xff] %v7871_v31  ;;  %9827 = vst [vmem:[#allocation20_spill] sm:$0xff] %v7885_v24 }
 0x3f3   :  { %v7875_v22 = vpop.permute.xlu0 %2316  ;;  %v7889_v30 = vpop.permute.xlu1 %2682 }
 0x3f4   :  { %1433 = vmax.xlane.f32.xlu0 %v1432_v11  ;;  %9822 = vst [vmem:[#allocation15_spill] sm:$0xff] %v7875_v22  ;;  %9829 = vst [vmem:[#allocation22_spill] sm:$0xff] %v7889_v30 }
 0x3f7   :  { %v7879_v23 = vpop.permute.xlu0 %2409 }
 0x3f8   :  { %1457 = vmax.xlane.f32.xlu0 %v1456_v14  ;;  %9824 = vst [vmem:[#allocation17_spill] sm:$0xff] %v7879_v23 }
 0x3fb   :  { %v7883_v4 = vpop.permute.xlu0 %2589 }
 0x3fc   :  { %1451 = vmax.xlane.f32.xlu0 %v1450_v17  ;;  %9826 = vst [vmem:[#allocation19_spill] sm:$0xff] %v7883_v4 }
 0x3ff   :  { %v7887_v27 = vpop.permute.xlu0 %2591 }
 0x400   :  { %1475 = vmax.xlane.f32.xlu0 %v1474_v15  ;;  %9828 = vst [vmem:[#allocation21_spill] sm:$0xff] %v7887_v27 }
 0x403   :  { %v7891_v18 = vpop.permute.xlu0 %2502 }
 0x404   :  { %1445 = vmax.xlane.f32.xlu0 %v1444_v16  ;;  %9830 = vst [vmem:[#allocation23_spill] sm:$0xff] %v7891_v18  ;;  %v7915_v16 = vpop.permute.xlu1 %2593 }
 0x405   :  { %9833 = vst [vmem:[#allocation26_spill] sm:$0xff] %v7915_v16 }
 0x408   :  { %1469 = vmax.xlane.f32.xlu0 %v1468_v63  ;;  %v7917_v63 = vpop.permute.xlu0 %2595  ;;  %v7943_v4 = vpop.permute.xlu1 %2779 }
 0x409   :  { %9834 = vst [vmem:[#allocation27_spill] sm:$0xff] %v7917_v63  ;;  %9843 = vst [vmem:[#allocation36_spill] sm:$0xff] %v7943_v4 }
 0x40c   :  { %v7945_v23 = vpop.permute.xlu0 %2775 }
 0x40d   :  { %9844 = vst [vmem:[#allocation37_spill] sm:$0xff] %v7945_v23 }
 0x410   :  { %v7955_v55 = vpop.permute.xlu0 %2684 }
 0x411   :  { %9845 = vst [vmem:[#allocation38_spill] sm:$0xff] %v7955_v55 }
 0x414   :  { %v7963_v23 = vpop.permute.xlu0 %2777 }
 0x415   :  { %9846 = vst [vmem:[#allocation39_spill] sm:$0xff] %v7963_v23 }
 0x418   :  { %v7971_v55 = vpop.permute.xlu0 %2500 }
 0x419   :  { %9847 = vst [vmem:[#allocation40_spill] sm:$0xff] %v7971_v55 }
 0x428   :  { %v7893_v43 = vpop.f32.mrb[16].mxu1  ;;  %v7895_v53 = vpop.f32.mrb[32].mxu0 }
 0x429   :  { %v7897_v44 = vpop.f32.mrb[17].mxu1  ;;  %v7899_v0 = vpop.f32.mrb[33].mxu0  ;;  %v1486_v61 = vsel %vm1383_vm1, %v7893_v43, -inf  ;;  %v1510_v15 = vsel %vm1383_vm1, %v7895_v53, -inf }
 0x42a   :  { %9831 = vst [vmem:[#allocation24_spill] sm:$0xff] %v7899_v0  ;;  %v7903_v1 = vpop.f32.mrb[18].mxu1  ;;  %v7905_v6 = vpop.f32.mrb[34].mxu0  ;;  %1487 = vmax.xlane.f32.xlu0 %v1486_v61 }
 0x42b   :  { %v7907_v11 = vpop.f32.mrb[19].mxu1  ;;  %v7909_v14 = vpop.f32.mrb[35].mxu0  ;;  %v1489_v17 = vsel %vm1383_vm1, %v7903_v1, -inf  ;;  %v1513_v38 = vsel %vm1383_vm1, %v7905_v6, -inf }
 0x42c   :  { %9832 = vst [vmem:[#allocation25_spill] sm:$0xff] %v7909_v14  ;;  %1490 = vmax.xlane.f32.xlu1 %v1489_v17  ;;  %v1480_v17 = vsel %vm1383_vm1, %v7897_v44, -inf  ;;  %v1483_v27 = vsel %vm1383_vm1, %v7907_v11, -inf  ;;  %v1507_v8 = vsel %vm1383_vm1, %v7909_v14, -inf }
 0x42e   :  { %1511 = vmax.xlane.f32.xlu0 %v1510_v15 }
 0x430   :  { %v7921_v61 = vpop.f32.mrb[20].mxu1  ;;  %v7923_v13 = vpop.f32.mrb[36].mxu0  ;;  %1514 = vmax.xlane.f32.xlu1 %v1513_v38  ;;  %v1504_v38 = vsel %vm1383_vm1, %v7899_v0, -inf }
 0x431   :  { %9835 = vst [vmem:[#allocation28_spill] sm:$0xff] %v7921_v61  ;;  %9836 = vst [vmem:[#allocation29_spill] sm:$0xff] %v7923_v13  ;;  %v7925_v30 = vpop.f32.mrb[21].mxu1  ;;  %v7927_v18 = vpop.f32.mrb[37].mxu0 }
 0x432   :  { %9837 = vst [vmem:[#allocation30_spill] sm:$0xff] %v7925_v30  ;;  %9838 = vst [vmem:[#allocation31_spill] sm:$0xff] %v7927_v18  ;;  %v7931_v15 = vpop.f32.mrb[22].mxu1  ;;  %v7933_v16 = vpop.f32.mrb[38].mxu0  ;;  %1481 = vmax.xlane.f32.xlu0 %v1480_v17  ;;  %v1498_v17 = vsel %vm1383_vm1, %v7921_v61, -inf  ;;  %v1492_v4 = vsel %vm1383_vm1, %v7925_v30, -inf }
 0x433   :  { %9839 = vst [vmem:[#allocation32_spill] sm:$0xff] %v7931_v15  ;;  %9840 = vst [vmem:[#allocation33_spill] sm:$0xff] %v7933_v16  ;;  %v7935_v63 = vpop.f32.mrb[23].mxu1  ;;  %v7937_v24 = vpop.f32.mrb[39].mxu0 }
 0x434   :  { %9841 = vst [vmem:[#allocation34_spill] sm:$0xff] %v7935_v63  ;;  %9842 = vst [vmem:[#allocation35_spill] sm:$0xff] %v7937_v24  ;;  %1484 = vmax.xlane.f32.xlu1 %v1483_v27  ;;  %v1522_v27 = vsel %vm1383_vm1, %v7923_v13, -inf  ;;  %v1495_v55 = vsel %vm1383_vm1, %v7935_v63, -inf  ;;  %v1519_v56 = vsel %vm1383_vm1, %v7937_v24, -inf }
 0x436   :  { %1505 = vmax.xlane.f32.xlu0 %v1504_v38 }
 0x438   :  { %1508 = vmax.xlane.f32.xlu1 %v1507_v8  ;;  %v1516_v8 = vsel %vm1383_vm1, %v7927_v18, -inf }
 0x43a   :  { %v7951_v3 = vpop.xlane.xlu1 %1418  ;;  %1499 = vmax.xlane.f32.xlu0 %v1498_v17  ;;  %v1501_v17 = vsel %vm1383_vm1, %v7931_v15, -inf }
 0x43c   :  { %1523 = vmax.xlane.f32.xlu1 %v1522_v27  ;;  %v1525_v27 = vsel %vm1383_vm1, %v7933_v16, -inf }
 0x43e   :  { %v7959_v38 = vpop.xlane.xlu1 %1388  ;;  %1493 = vmax.xlane.f32.xlu0 %v1492_v4 }
 0x440   :  { %1517 = vmax.xlane.f32.xlu1 %v1516_v8 }
 0x442   :  { %v7967_v22 = vpop.xlane.xlu1 %1412 }
 0x444   :  { %1502 = vmax.xlane.f32.xlu1 %v1501_v17 }
 0x446   :  { %v7977_v42 = vpop.xlane.xlu1 %1406 }
 0x448   :  { %1526 = vmax.xlane.f32.xlu1 %v1525_v27 }
 0x449   :  { %v7973_v41 = vpop.f32.mrb[24].mxu1  ;;  %v7975_v4 = vpop.f32.mrb[40].mxu0 }
 0x44a   :  { %9848 = vst [vmem:[#allocation41_spill] sm:$0xff] %v7973_v41  ;;  %9849 = vst [vmem:[#allocation42_spill] sm:$0xff] %v7975_v4  ;;  %v7979_v8 = vpop.f32.mrb[25].mxu1  ;;  %v1534_v23 = vsel %vm1383_vm1, %v7973_v41, -inf  ;;  %v7983_v40 = vpop.f32.mrb[41].mxu0  ;;  %v1558_v20 = vsel %vm1383_vm1, %v7975_v4, -inf }
 0x44b   :  { %9850 = vst [vmem:[#allocation43_spill] sm:$0xff] %v7979_v8  ;;  %v7985_v17 = vpop.f32.mrb[26].mxu1  ;;  %1535 = vmax.xlane.f32.xlu0 %v1534_v23  ;;  %v7989_v27 = vpop.f32.mrb[42].mxu0 }
 0x44c   :  { %9851 = vst [vmem:[#allocation44_spill] sm:$0xff] %v7989_v27  ;;  %v7991_v47 = vpop.f32.mrb[27].mxu1  ;;  %1496 = vmax.xlane.f32.xlu1 %v1495_v55  ;;  %v7993_v31 = vpop.f32.mrb[43].mxu0  ;;  %v1528_v55 = vsel %vm1383_vm1, %v7979_v8, -inf  ;;  %v1552_v8 = vsel %vm1383_vm1, %v7983_v40, -inf }
 0x44d   :  { %9852 = vst [vmem:[#allocation45_spill] sm:$0xff] %v7991_v47  ;;  %v7999_v41 = vpop.permute.xlu0 %2686  ;;  %v8005_v16 = vpop.xlane.xlu1 %1430 }
 0x44e   :  { %9853 = vst [vmem:[#allocation46_spill] sm:$0xff] %v7999_v41  ;;  %v1561_v41 = vsel %vm1383_vm1, %v7989_v27, -inf }
 0x44f   :  { %1559 = vmax.xlane.f32.xlu0 %v1558_v20 }
 0x450   :  { %1520 = vmax.xlane.f32.xlu1 %v1519_v56 }
 0x451   :  { %v8001_v23 = vpop.f32.mrb[28].mxu1  ;;  %v8003_v63 = vpop.f32.mrb[44].mxu0 }
 0x452   :  { %9854 = vst [vmem:[#allocation47_spill] sm:$0xff] %v8003_v63  ;;  %v8007_v15 = vpop.f32.mrb[29].mxu1  ;;  %v8011_v18 = vpop.f32.mrb[45].mxu0 }
 0x453   :  { %v8013_v20 = vpop.f32.mrb[30].mxu1  ;;  %1529 = vmax.xlane.f32.xlu0 %v1528_v55  ;;  %v8017_v56 = vpop.f32.mrb[46].mxu0  ;;  %v1531_v55 = vsel %vm1383_vm1, %v7991_v47, -inf  ;;  %v1555_v47 = vsel %vm1383_vm1, %v7993_v31, -inf }
 0x454   :  { %v8019_v24 = vpop.f32.mrb[31].mxu1  ;;  %1562 = vmax.xlane.f32.xlu1 %v1561_v41  ;;  %v8021_v4 = vpop.f32.mrb[47].mxu0  ;;  %v1537_v41 = vsel %vm1383_vm1, %v7985_v17, -inf }
 0x455   :  { %v1392_v13 = vpop.xlane.xlu0 %1391  ;;  %v8028_v14 = vpop.xlane.xlu1 %1400 }
 0x456   :  { %v1578_v30 = vsub.f32 %v7726_v25, %v1392_v13  ;;  %v1570_v13 = vsel %vm1383_vm1, %v8003_v63, -inf  ;;  %v1587_v25 = vsub.f32 %v7739_v28, %v7951_v3  ;;  %v1577_v28 = vsub.f32 %v7741_v34, %v7959_v38 }
 0x457   :  { %1553 = vmax.xlane.f32.xlu0 %v1552_v8  ;;  %v1540_v34 = vsel %vm1383_vm1, %v8007_v15, -inf }
 0x458   :  { %1532 = vmax.xlane.f32.xlu1 %v1531_v55  ;;  %v1644_v61 = vmul.f32 1.442695, %v1578_v30 }
 0x459   :  { %v1416_v27 = vpop.xlane.xlu0 %1415 }
 0x45a   :  { %v1586_v0 = vsub.f32 %v7728_v26, %v1416_v27  ;;  %6628 = vpow2.f32 %v1644_v61  ;;  %v1564_v26 = vsel %vm1383_vm1, %v8011_v18, -inf  ;;  %v1662_v27 = vmul.f32 1.442695, %v1587_v25 }
 0x45b   :  { %1538 = vmax.xlane.f32.xlu0 %v1537_v41  ;;  %v8042_v41 = vpop.xlane.xlu1 %1424  ;;  %v1642_v25 = vmul.f32 1.442695, %v1577_v28  ;;  %v1543_v28 = vsel %vm1383_vm1, %v8019_v24, -inf }
 0x45c   :  { %1571 = vmax.xlane.f32.xlu1 %v1570_v13  ;;  %v1660_v8 = vmul.f32 1.442695, %v1586_v0 }
 0x45d   :  { %v1386_v55 = vpop.xlane.xlu0 %1385 }
 0x45e   :  { %v1576_v30 = vsub.f32 %v7732_v48, %v1386_v55  ;;  %6630 = vpow2.f32 %v1660_v8  ;;  %v1546_v48 = vsel %vm1383_vm1, %v8001_v23, -inf  ;;  %v1583_v8 = vsub.f32 %v7759_v35, %v7977_v42 }
 0x45f   :  { %1556 = vmax.xlane.f32.xlu0 %v1555_v47  ;;  %v1549_v47 = vsel %vm1383_vm1, %v8013_v20, -inf  ;;  %6632 = vpow2.f32 %v1662_v27  ;;  %v8053_v55 = vpop.xlane.xlu1 %1442 }
 0x460   :  { %1565 = vmax.xlane.f32.xlu1 %v1564_v26  ;;  %v1640_v63 = vmul.f32 1.442695, %v1576_v30  ;;  %v1573_v30 = vsel %vm1383_vm1, %v8017_v56, -inf  ;;  %v1654_v35 = vmul.f32 1.442695, %v1583_v8 }
 0x461   :  { %v1410_v3 = vpop.xlane.xlu0 %1409 }
 0x462   :  { %v1584_v0 = vsub.f32 %v7734_v59, %v1410_v3  ;;  %6634 = vpow2.f32 %v1640_v63  ;;  %v1585_v63 = vsub.f32 %v7743_v29, %v7967_v22 }
 0x463   :  { %1547 = vmax.xlane.f32.xlu0 %v1546_v48 }
 0x464   :  { %1550 = vmax.xlane.f32.xlu1 %v1549_v47  ;;  %v1656_v61 = vmul.f32 1.442695, %v1584_v0  ;;  %v8058_v38 = vpop.eup %6628  ;;  %v8072_v0 = vpop.xlane.xlu1 %1466  ;;  %v1658_v29 = vmul.f32 1.442695, %v1585_v63 }
 0x465   :  { %v1395_v13 = vpop.xlane.xlu0 %1394  ;;  %v1774_v27 = vsel %vm1383_vm1, %v8058_v38, 0.0 }
 0x466   :  { %v1579_v59 = vsub.f32 %v7737_v21, %v1395_v13  ;;  %6636 = vpow2.f32 %v1656_v61  ;;  %v1591_v21 = vsub.f32 %v7761_v36, %v8005_v16  ;;  %v1581_v16 = vsub.f32 %v7763_v37, %v8028_v14 }
 0x467   :  { %1541 = vmax.xlane.f32.xlu0 %v1540_v34  ;;  %6638 = vpow2.f32 %v1642_v25  ;;  %v1567_v25 = vsel %vm1383_vm1, %v8021_v4, -inf  ;;  %v1589_v37 = vsub.f32 %v7765_v39, %v8042_v41 }
 0x468   :  { %1574 = vmax.xlane.f32.xlu1 %v1573_v30  ;;  %v1646_v26 = vmul.f32 1.442695, %v1579_v59  ;;  %v8068_v3 = vpop.eup %6630  ;;  %v1670_v36 = vmul.f32 1.442695, %v1591_v21  ;;  %v1650_v34 = vmul.f32 1.442695, %v1581_v16  ;;  %v8088_v14 = vpop.xlane.xlu1 %1436 }
 0x469   :  { %v1404_v42 = vpop.xlane.xlu0 %1403  ;;  %v8075_v47 = vpop.eup %6632  ;;  %v1798_v61 = vsel %vm1383_vm1, %v8068_v3, 0.0  ;;  %v1666_v39 = vmul.f32 1.442695, %v1589_v37 }
 0x46a   :  { %6640 = vpow2.f32 %v1646_v26  ;;  %v1582_v22 = vsub.f32 %v7748_v9, %v1404_v42  ;;  %v1801_v26 = vsel %vm1383_vm1, %v8075_v47, 0.0 }
 0x46b   :  { %1775 = vadd.xlane.f32.xlu0 %v1774_v27  ;;  %6642 = vpow2.f32 %v1654_v35 }
 0x46c   :  { %1544 = vmax.xlane.f32.xlu1 %v1543_v28  ;;  %v8081_v13 = vpop.eup %6634  ;;  %6644 = vpow2.f32 %v1658_v29  ;;  %v1652_v9 = vmul.f32 1.442695, %v1582_v22  ;;  %v1461_v22 = vpop.xlane.xlu1 %1460 }
 0x46d   :  { %v1428_v48 = vpop.xlane.xlu0 %1427  ;;  %6646 = vpow2.f32 %v1670_v36  ;;  %v1768_v30 = vsel %vm1383_vm1, %v8081_v13, 0.0 }
 0x46e   :  { %v1590_v8 = vsub.f32 %v7750_v32, %v1428_v48  ;;  %6648 = vpow2.f32 %v1652_v9 }
 0x46f   :  { %1799 = vadd.xlane.f32.xlu0 %v1798_v61  ;;  %6650 = vpow2.f32 %v1650_v34 }
 0x470   :  { %1568 = vmax.xlane.f32.xlu1 %v1567_v25  ;;  %v8092_v63 = vpop.eup %6636  ;;  %v1668_v32 = vmul.f32 1.442695, %v1590_v8 }
 0x471   :  { %v1398_v59 = vpop.xlane.xlu0 %1397  ;;  %v8096_v42 = vpop.eup %6638  ;;  %v1792_v41 = vsel %vm1383_vm1, %v8092_v63, 0.0 }
 0x472   :  { %v1580_v35 = vsub.f32 %v7754_v52, %v1398_v59  ;;  %v1771_v28 = vsel %vm1383_vm1, %v8096_v42, 0.0  ;;  %6652 = vpow2.f32 %v1668_v32 }
 0x473   :  { %1769 = vadd.xlane.f32.xlu0 %v1768_v30  ;;  %6654 = vpow2.f32 %v1666_v39 }
 0x474   :  { %1802 = vadd.xlane.f32.xlu1 %v1801_v26  ;;  %v8101_v27 = vpop.eup %6640  ;;  %v1648_v48 = vmul.f32 1.442695, %v1580_v35 }
 0x475   :  { %v1422_v21 = vpop.xlane.xlu0 %1421  ;;  %v8105_v29 = vpop.eup %6642  ;;  %v1777_v16 = vsel %vm1383_vm1, %v8101_v27, 0.0 }
 0x476   :  { %v1588_v52 = vsub.f32 %v7756_v19, %v1422_v21  ;;  %v8110_v61 = vpop.eup %6644  ;;  %v1789_v25 = vsel %vm1383_vm1, %v8105_v29, 0.0  ;;  %6656 = vpow2.f32 %v1648_v48  ;;  %v8117_v19 = vpop.xlane.xlu1 %1454  ;;  %v1595_v21 = vsub.f32 %v7787_v54, %v8053_v55 }
 0x477   :  { %1793 = vadd.xlane.f32.xlu0 %v1792_v41  ;;  %v8114_v9 = vpop.eup %6646  ;;  %v1795_v30 = vsel %vm1383_vm1, %v8110_v61, 0.0  ;;  %v1603_v55 = vsub.f32 %v7789_v57, %v8072_v0 }
 0x478   :  { %1772 = vadd.xlane.f32.xlu1 %v1771_v28  ;;  %v1664_v8 = vmul.f32 1.442695, %v1588_v52  ;;  %v8122_v26 = vpop.eup %6648  ;;  %v1813_v32 = vsel %vm1383_vm1, %v8114_v9, 0.0  ;;  %v1678_v54 = vmul.f32 1.442695, %v1595_v21 }
 0x479   :  { %v1440_v36 = vpop.xlane.xlu0 %1439  ;;  %v8126_v35 = vpop.eup %6650  ;;  %v1786_v28 = vsel %vm1383_vm1, %v8122_v26, 0.0  ;;  %v1694_v0 = vmul.f32 1.442695, %v1603_v55 }
 0x47a   :  { %v1594_v59 = vsub.f32 %v7777_v60, %v1440_v36  ;;  %6658 = vpow2.f32 %v1664_v8  ;;  %v1783_v52 = vsel %vm1383_vm1, %v8126_v35, 0.0 }
 0x47b   :  { %1778 = vadd.xlane.f32.xlu0 %v1777_v16  ;;  %v8141_v16 = vpop.xlane.xlu1 %1478 }
 0x47c   :  { %1790 = vadd.xlane.f32.xlu1 %v1789_v25  ;;  %v1676_v39 = vmul.f32 1.442695, %v1594_v59  ;;  %v8133_v48 = vpop.eup %6652 }
 0x47d   :  { %v1464_v34 = vpop.xlane.xlu0 %1463  ;;  %v8137_v36 = vpop.eup %6654 }
 0x47e   :  { %v1602_v37 = vsub.f32 %v7779_v62, %v1464_v34  ;;  %v1810_v34 = vsel %vm1383_vm1, %v8133_v48, 0.0  ;;  %v1807_v57 = vsel %vm1383_vm1, %v8137_v36, 0.0 }
 0x47f   :  { %1796 = vadd.xlane.f32.xlu0 %v1795_v30  ;;  %v1593_v30 = vsub.f32 %v7791_v58, %v8088_v14  ;;  %v1449_v21 = vpop.xlane.xlu1 %1448 }
 0x480   :  { %v1692_v60 = vmul.f32 1.442695, %v1602_v37  ;;  %1814 = vadd.xlane.f32.xlu1 %v1813_v32  ;;  %v8147_v37 = vpop.eup %6656  ;;  %v1597_v58 = vsub.f32 %v7813_v12, %v1449_v21 }
 0x481   :  { %v1434_v41 = vpop.xlane.xlu0 %1433 }
 0x482   :  { %6660 = vpow2.f32 %v1692_v60  ;;  %v1592_v62 = vsub.f32 %v7783_v50, %v1434_v41  ;;  %v1601_v50 = vsub.f32 %v7793_v33, %v1461_v22  ;;  %v1674_v41 = vmul.f32 1.442695, %v1593_v30 }
 0x483   :  { %1787 = vadd.xlane.f32.xlu0 %v1786_v28  ;;  %6662 = vpow2.f32 %v1676_v39 }
 0x484   :  { %v1672_v25 = vmul.f32 1.442695, %v1592_v62  ;;  %1784 = vadd.xlane.f32.xlu1 %v1783_v52  ;;  %v1690_v22 = vmul.f32 1.442695, %v1601_v50  ;;  %v8155_v60 = vpop.eup %6658 }
 0x485   :  { %v1458_v8 = vpop.xlane.xlu0 %1457 }
 0x486   :  { %6664 = vpow2.f32 %v1672_v25  ;;  %v1600_v59 = vsub.f32 %v7785_v51, %v1458_v8  ;;  %v1780_v51 = vsel %vm1383_vm1, %v8147_v37, 0.0  ;;  %v1682_v8 = vmul.f32 1.442695, %v1597_v58 }
 0x487   :  { %1811 = vadd.xlane.f32.xlu0 %v1810_v34  ;;  %6666 = vpow2.f32 %v1678_v54  ;;  %v1804_v54 = vsel %vm1383_vm1, %v8155_v60, 0.0 }
 0x488   :  { %v1688_v33 = vmul.f32 1.442695, %v1600_v59  ;;  %1808 = vadd.xlane.f32.xlu1 %v1807_v57 }
 0x489   :  { %v1452_v32 = vpop.xlane.xlu0 %1451 }
 0x48a   :  { %6668 = vpow2.f32 %v1688_v33  ;;  %v1598_v62 = vsub.f32 %v7799_v2, %v1452_v32 }
 0x48b   :  { %1781 = vadd.xlane.f32.xlu0 %v1780_v51  ;;  %6670 = vpow2.f32 %v1694_v0 }
 0x48c   :  { %v8157_v39 = vpop.eup %6660  ;;  %6672 = vpow2.f32 %v1690_v22  ;;  %v1684_v2 = vmul.f32 1.442695, %v1598_v62 }
 0x48d   :  { %v1476_v14 = vpop.xlane.xlu0 %1475  ;;  %v1846_v28 = vsel %vm1383_vm1, %v8157_v39, 0.0  ;;  %v8166_v55 = vpop.eup %6662  ;;  %6674 = vpow2.f32 %v1674_v41  ;;  %v1599_v41 = vsub.f32 %v7809_v7, %v8117_v19 }
 0x48e   :  { %v1606_v52 = vsub.f32 %v7801_v5, %v1476_v14  ;;  %1847 = vadd.xlane.f32.xlu1 %v1846_v28  ;;  %v1822_v57 = vsel %vm1383_vm1, %v8166_v55, 0.0  ;;  %v1473_v7 = vpop.xlane.xlu1 %1472 }
 0x48f   :  { %1805 = vadd.xlane.f32.xlu0 %v1804_v54  ;;  %v1607_v54 = vsub.f32 %v7811_v10, %v8141_v16 }
 0x490   :  { %v8168_v25 = vpop.eup %6664  ;;  %v1700_v50 = vmul.f32 1.442695, %v1606_v52  ;;  %v1686_v52 = vmul.f32 1.442695, %v1599_v41 }
 0x491   :  { %v1446_v12 = vpop.xlane.xlu0 %1445  ;;  %v1816_v59 = vsel %vm1383_vm1, %v8168_v25, 0.0  ;;  %v8172_v34 = vpop.eup %6666 }
 0x492   :  { %6676 = vpow2.f32 %v1700_v50  ;;  %v1596_v5 = vsub.f32 %v7805_v46, %v1446_v12  ;;  %1817 = vadd.xlane.f32.xlu1 %v1816_v59  ;;  %v1825_v22 = vsel %vm1383_vm1, %v8172_v34, 0.0  ;;  %v1702_v12 = vmul.f32 1.442695, %v1607_v54 }
 0x493   :  { %1823 = vadd.xlane.f32.xlu0 %v1822_v57  ;;  %6678 = vpow2.f32 %v1684_v2  ;;  %v1605_v59 = vsub.f32 %v7815_v49, %v1473_v7 }
 0x494   :  { %v8177_v0 = vpop.eup %6668  ;;  %v1680_v30 = vmul.f32 1.442695, %v1596_v5  ;;  %6680 = vpow2.f32 %v1682_v8 }
 0x495   :  { %v1470_v33 = vpop.xlane.xlu0 %1469  ;;  %v8181_v32 = vpop.eup %6670  ;;  %v1840_v46 = vsel %vm1383_vm1, %v8177_v0, 0.0  ;;  %v1698_v57 = vmul.f32 1.442695, %v1605_v59 }
 0x496   :  { %v1604_v21 = vsub.f32 %v7807_v45, %v1470_v33  ;;  %1826 = vadd.xlane.f32.xlu1 %v1825_v22  ;;  %v8186_v51 = vpop.eup %6672  ;;  %6682 = vpow2.f32 %v1680_v30  ;;  %v1849_v58 = vsel %vm1383_vm1, %v8181_v32, 0.0 }
 0x497   :  { %1841 = vadd.xlane.f32.xlu0 %v1840_v46  ;;  %v8192_v14 = vpop.eup %6674  ;;  %v1843_v45 = vsel %vm1383_vm1, %v8186_v51, 0.0 }
 0x498   :  { %v1696_v62 = vmul.f32 1.442695, %v1604_v21  ;;  %v1819_v19 = vsel %vm1383_vm1, %v8192_v14, 0.0 }
 0x49a   :  { %1850 = vadd.xlane.f32.xlu1 %v1849_v58  ;;  %6684 = vpow2.f32 %v1696_v62 }
 0x49b   :  { %1844 = vadd.xlane.f32.xlu0 %v1843_v45  ;;  %6686 = vpow2.f32 %v1686_v52 }
 0x49c   :  { %v8196_v28 = vpop.eup %6676  ;;  %6688 = vpow2.f32 %v1702_v12 }
 0x49d   :  { %v8202_v2 = vpop.eup %6678  ;;  %v1858_v50 = vsel %vm1383_vm1, %v8196_v28, 0.0  ;;  %6690 = vpow2.f32 %v1698_v57 }
 0x49e   :  { %1820 = vadd.xlane.f32.xlu1 %v1819_v19  ;;  %v8206_v8 = vpop.eup %6680  ;;  %v1834_v10 = vsel %vm1383_vm1, %v8202_v2, 0.0 }
 0x49f   :  { %1859 = vadd.xlane.f32.xlu0 %v1858_v50  ;;  %v1831_v5 = vsel %vm1383_vm1, %v8206_v8, 0.0 }
 0x4a0   :  { %v8211_v16 = vpop.eup %6682 }
 0x4a1   :  { %v1828_v30 = vsel %vm1383_vm1, %v8211_v16, 0.0 }
 0x4a2   :  { %1835 = vadd.xlane.f32.xlu1 %v1834_v10 }
 0x4a3   :  { %1832 = vadd.xlane.f32.xlu0 %v1831_v5 }
 0x4a4   :  { %v8217_v33 = vpop.eup %6684 }
 0x4a5   :  { %v1852_v49 = vsel %vm1383_vm1, %v8217_v33, 0.0  ;;  %v8221_v22 = vpop.eup %6686 }
 0x4a6   :  { %1829 = vadd.xlane.f32.xlu1 %v1828_v30  ;;  %v1837_v21 = vsel %vm1383_vm1, %v8221_v22, 0.0  ;;  %v8225_v46 = vpop.eup %6688 }
 0x4a7   :  { %v1861_v41 = vsel %vm1383_vm1, %v8225_v46, 0.0  ;;  %v8229_v62 = vpop.eup %6690 }
 0x4a8   :  { %v1855_v58 = vsel %vm1383_vm1, %v8229_v62, 0.0 }
 0x4aa   :  { %1853 = vadd.xlane.f32.xlu1 %v1852_v49 }
 0x4ae   :  { %1838 = vadd.xlane.f32.xlu1 %v1837_v21 }
 0x4b2   :  { %1862 = vadd.xlane.f32.xlu1 %v1861_v41 }
 0x4b6   :  { %1856 = vadd.xlane.f32.xlu1 %v1855_v58 }
 0x4b7   :  { %v1488_v45 = vpop.xlane.xlu0 %1487 }
 0x4b8   :  { %v1610_v52 = vsub.f32 %v7893_v43, %v1488_v45  ;;  %v9855_v45 = vld [vmem:[#allocation24_spill] sm:$0xff] }
 0x4b9   :  { %v1491_v54 = vpop.xlane.xlu1 %1490 }
 0x4ba   :  { %v1708_v7 = vmul.f32 1.442695, %v1610_v52  ;;  %v1611_v59 = vsub.f32 %v7903_v1, %v1491_v54 }
 0x4bb   :  { %v1512_v19 = vpop.xlane.xlu0 %1511 }
 0x4bc   :  { %6692 = vpow2.f32 %v1708_v7  ;;  %v1618_v50 = vsub.f32 %v7895_v53, %v1512_v19  ;;  %v1710_v21 = vmul.f32 1.442695, %v1611_v59 }
 0x4bd   :  { %v1515_v12 = vpop.xlane.xlu1 %1514 }
 0x4be   :  { %v1724_v10 = vmul.f32 1.442695, %v1618_v50  ;;  %v1619_v30 = vsub.f32 %v7905_v6, %v1515_v12  ;;  %v9856_v50 = vld [vmem:[#allocation25_spill] sm:$0xff] }
 0x4bf   :  { %v1482_v5 = vpop.xlane.xlu0 %1481 }
 0x4c0   :  { %6694 = vpow2.f32 %v1724_v10  ;;  %v1608_v57 = vsub.f32 %v7897_v44, %v1482_v5  ;;  %v1726_v53 = vmul.f32 1.442695, %v1619_v30 }
 0x4c1   :  { %v1485_v49 = vpop.xlane.xlu1 %1484 }
 0x4c2   :  { %v1704_v41 = vmul.f32 1.442695, %v1608_v57  ;;  %v1609_v43 = vsub.f32 %v7907_v11, %v1485_v49  ;;  %v9857_v11 = vld [vmem:[#allocation28_spill] sm:$0xff] }
 0x4c3   :  { %v1506_v58 = vpop.xlane.xlu0 %1505 }
 0x4c4   :  { %6696 = vpow2.f32 %v1704_v41  ;;  %v1616_v52 = vsub.f32 %v9855_v45, %v1506_v58  ;;  %v1706_v1 = vmul.f32 1.442695, %v1609_v43  ;;  %v9860_v58 = vld [vmem:[#allocation29_spill] sm:$0xff] }
 0x4c5   :  { %v1509_v7 = vpop.xlane.xlu1 %1508  ;;  %6698 = vpow2.f32 %v1710_v21  ;;  %v9859_v21 = vld [vmem:[#allocation30_spill] sm:$0xff] }
 0x4c6   :  { %v8240_v19 = vpop.eup %6692  ;;  %v1720_v54 = vmul.f32 1.442695, %v1616_v52  ;;  %v1617_v44 = vsub.f32 %v9856_v50, %v1509_v7 }
 0x4c7   :  { %v1500_v10 = vpop.xlane.xlu0 %1499  ;;  %v1870_v6 = vsel %vm1383_vm1, %v8240_v19, 0.0 }
 0x4c8   :  { %6700 = vpow2.f32 %v1720_v54  ;;  %1871 = vadd.xlane.f32.xlu1 %v1870_v6  ;;  %v1614_v12 = vsub.f32 %v9857_v11, %v1500_v10  ;;  %v1722_v57 = vmul.f32 1.442695, %v1617_v44  ;;  %v9861_v54 = vld [vmem:[#allocation31_spill] sm:$0xff] }
 0x4c9   :  { %6702 = vpow2.f32 %v1726_v53  ;;  %v1524_v59 = vpop.xlane.xlu1 %1523 }
 0x4ca   :  { %v8246_v5 = vpop.eup %6694  ;;  %6704 = vpow2.f32 %v1706_v1  ;;  %v1716_v43 = vmul.f32 1.442695, %v1614_v12  ;;  %v1622_v45 = vsub.f32 %v9860_v58, %v1524_v59  ;;  %v9863_v59 = vld [vmem:[#allocation32_spill] sm:$0xff] }
 0x4cb   :  { %9858 = vst [vmem:[#allocation24_spill] sm:$0xff] %v8246_v5  ;;  %v1494_v30 = vpop.xlane.xlu0 %1493  ;;  %v1894_v49 = vsel %vm1383_vm1, %v8246_v5, 0.0  ;;  %6706 = vpow2.f32 %v1722_v57 }
 0x4cc   :  { %v1612_v41 = vsub.f32 %v9859_v21, %v1494_v30  ;;  %1895 = vadd.xlane.f32.xlu1 %v1894_v49  ;;  %v1732_v6 = vmul.f32 1.442695, %v1622_v45  ;;  %v9865_v45 = vld [vmem:[#allocation33_spill] sm:$0xff] }
 0x4cd   :  { %v1518_v52 = vpop.xlane.xlu1 %1517 }
 0x4ce   :  { %v8252_v7 = vpop.eup %6696  ;;  %v1712_v53 = vmul.f32 1.442695, %v1612_v41  ;;  %v1620_v50 = vsub.f32 %v9861_v54, %v1518_v52 }
 0x4cf   :  { %v1864_v1 = vsel %vm1383_vm1, %v8252_v7, 0.0  ;;  %v8257_v44 = vpop.eup %6698 }
 0x4d0   :  { %6708 = vpow2.f32 %v1712_v53  ;;  %v1728_v10 = vmul.f32 1.442695, %v1620_v50  ;;  %1865 = vadd.xlane.f32.xlu0 %v1864_v1  ;;  %v1873_v49 = vsel %vm1383_vm1, %v8257_v44, 0.0 }
 0x4d1   :  { %6710 = vpow2.f32 %v1716_v43  ;;  %v1503_v11 = vpop.xlane.xlu1 %1502 }
 0x4d2   :  { %v8259_v12 = vpop.eup %6700  ;;  %6712 = vpow2.f32 %v1728_v10  ;;  %v1615_v30 = vsub.f32 %v9863_v59, %v1503_v11  ;;  %v9867_v11 = vld [vmem:[#allocation41_spill] sm:$0xff] }
 0x4d3   :  { %9862 = vst [vmem:[#allocation25_spill] sm:$0xff] %v8259_v12  ;;  %v8262_v57 = vpop.eup %6702  ;;  %v1888_v21 = vsel %vm1383_vm1, %v8259_v12, 0.0  ;;  %6714 = vpow2.f32 %v1732_v6 }
 0x4d4   :  { %9864 = vst [vmem:[#allocation28_spill] sm:$0xff] %v8262_v57  ;;  %v8268_v41 = vpop.eup %6704  ;;  %v1718_v58 = vmul.f32 1.442695, %v1615_v30  ;;  %1874 = vadd.xlane.f32.xlu0 %v1873_v49  ;;  %1889 = vadd.xlane.f32.xlu1 %v1888_v21  ;;  %v1897_v53 = vsel %vm1383_vm1, %v8262_v57, 0.0  ;;  %v9869_v49 = vld [vmem:[#allocation34_spill] sm:$0xff] }
 0x4d5   :  { %v1527_v43 = vpop.xlane.xlu1 %1526  ;;  %v1867_v54 = vsel %vm1383_vm1, %v8268_v41, 0.0  ;;  %v8275_v50 = vpop.eup %6706 }
 0x4d6   :  { %6716 = vpow2.f32 %v1718_v58  ;;  %v1623_v52 = vsub.f32 %v9865_v45, %v1527_v43  ;;  %9866 = vst [vmem:[#allocation30_spill] sm:$0xff] %v8275_v50  ;;  %v1891_v43 = vsel %vm1383_vm1, %v8275_v50, 0.0 }
 0x4d8   :  { %v1734_v1 = vmul.f32 1.442695, %v1623_v52  ;;  %v1536_v10 = vpop.xlane.xlu0 %1535  ;;  %1898 = vadd.xlane.f32.xlu0 %v1897_v53  ;;  %1868 = vadd.xlane.f32.xlu1 %v1867_v54 }
 0x4d9   :  { %v1626_v59 = vsub.f32 %v9867_v11, %v1536_v10  ;;  %v1497_v30 = vpop.xlane.xlu1 %1496 }
 0x4da   :  { %v8278_v6 = vpop.eup %6708  ;;  %6718 = vpow2.f32 %v1734_v1  ;;  %v1613_v21 = vsub.f32 %v9869_v49, %v1497_v30  ;;  %v9872_v1 = vld [vmem:[#allocation42_spill] sm:$0xff]  ;;  %v9873_v30 = vld [vmem:[#allocation35_spill] sm:$0xff] }
 0x4db   :  { %9868 = vst [vmem:[#allocation29_spill] sm:$0xff] %v8278_v6  ;;  %v8281_v58 = vpop.eup %6710  ;;  %v1876_v45 = vsel %vm1383_vm1, %v8278_v6, 0.0  ;;  %v1740_v10 = vmul.f32 1.442695, %v1626_v59  ;;  %v9875_v59 = vld [vmem:[#allocation43_spill] sm:$0xff] }
 0x4dc   :  { %9870 = vst [vmem:[#allocation31_spill] sm:$0xff] %v8281_v58  ;;  %v8287_v52 = vpop.eup %6712  ;;  %v1714_v53 = vmul.f32 1.442695, %v1613_v21  ;;  %v1560_v54 = vpop.xlane.xlu0 %1559  ;;  %1892 = vadd.xlane.f32.xlu1 %v1891_v43  ;;  %1877 = vadd.xlane.f32.xlu0 %v1876_v45  ;;  %v1882_v50 = vsel %vm1383_vm1, %v8281_v58, 0.0 }
 0x4dd   :  { %9871 = vst [vmem:[#allocation32_spill] sm:$0xff] %v8287_v52  ;;  %v1521_v11 = vpop.xlane.xlu1 %1520  ;;  %v1634_v5 = vsub.f32 %v9872_v1, %v1560_v54  ;;  %v8291_v12 = vpop.eup %6714  ;;  %v1900_v6 = vsel %vm1383_vm1, %v8287_v52, 0.0 }
 0x4de   :  { %6720 = vpow2.f32 %v1714_v53  ;;  %v1621_v49 = vsub.f32 %v9873_v30, %v1521_v11  ;;  %9874 = vst [vmem:[#allocation33_spill] sm:$0xff] %v8291_v12  ;;  %v1906_v1 = vsel %vm1383_vm1, %v8291_v12, 0.0 }
 0x4df   :  { %6722 = vpow2.f32 %v1740_v10  ;;  %v1756_v54 = vmul.f32 1.442695, %v1634_v5  ;;  %v9876_v10 = vld [vmem:[#allocation45_spill] sm:$0xff] }
 0x4e0   :  { %v8297_v57 = vpop.eup %6716  ;;  %v1730_v21 = vmul.f32 1.442695, %v1621_v49  ;;  %v1530_v43 = vpop.xlane.xlu0 %1529  ;;  %1883 = vadd.xlane.f32.xlu1 %v1882_v50  ;;  %1901 = vadd.xlane.f32.xlu0 %v1900_v6  ;;  %v9877_v49 = vld [vmem:[#allocation44_spill] sm:$0xff] }
 0x4e1   :  { %v1624_v45 = vsub.f32 %v9875_v59, %v1530_v43  ;;  %v1563_v53 = vpop.xlane.xlu1 %1562  ;;  %v1885_v30 = vsel %vm1383_vm1, %v8297_v57, 0.0 }
 0x4e2   :  { %6724 = vpow2.f32 %v1730_v21  ;;  %v1635_v21 = vsub.f32 %v9877_v49, %v1563_v53 }
 0x4e3   :  { %v1736_v11 = vmul.f32 1.442695, %v1624_v45 }
 0x4e4   :  { %v8304_v52 = vpop.eup %6718  ;;  %v1554_v58 = vpop.xlane.xlu0 %1553  ;;  %1907 = vadd.xlane.f32.xlu1 %v1906_v1  ;;  %1886 = vadd.xlane.f32.xlu0 %v1885_v30 }
 0x4e5   :  { %6726 = vpow2.f32 %v1736_v11  ;;  %v1632_v50 = vsub.f32 %v7983_v40, %v1554_v58  ;;  %v1533_v6 = vpop.xlane.xlu1 %1532  ;;  %v1909_v59 = vsel %vm1383_vm1, %v8304_v52, 0.0  ;;  %v1758_v58 = vmul.f32 1.442695, %v1635_v21 }
 0x4e6   :  { %6728 = vpow2.f32 %v1756_v54  ;;  %v1625_v5 = vsub.f32 %v9876_v10, %v1533_v6 }
 0x4e7   :  { %v1752_v43 = vmul.f32 1.442695, %v1632_v50 }
 0x4e8   :  { %v8311_v45 = vpop.eup %6720  ;;  %v1539_v12 = vpop.xlane.xlu0 %1538  ;;  %1910 = vadd.xlane.f32.xlu1 %v1909_v59  ;;  %v1738_v11 = vmul.f32 1.442695, %v1625_v5 }
 0x4e9   :  { %v1627_v1 = vsub.f32 %v7985_v17, %v1539_v12  ;;  %v1572_v30 = vpop.xlane.xlu1 %1571  ;;  %6730 = vpow2.f32 %v1752_v43  ;;  %v8314_v40 = vpop.eup %6722  ;;  %v1879_v53 = vsel %vm1383_vm1, %v8311_v45, 0.0 }
 0x4ea   :  { %9878 = vst [vmem:[#allocation41_spill] sm:$0xff] %v8314_v40  ;;  %v1918_v21 = vsel %vm1383_vm1, %v8314_v40, 0.0 }
 0x4eb   :  { %v1742_v54 = vmul.f32 1.442695, %v1627_v1 }
 0x4ec   :  { %v8318_v50 = vpop.eup %6724  ;;  %v1557_v6 = vpop.xlane.xlu0 %1556  ;;  %1880 = vadd.xlane.f32.xlu1 %v1879_v53  ;;  %v9881_v53 = vld [vmem:[#allocation47_spill] sm:$0xff] }
 0x4ed   :  { %6732 = vpow2.f32 %v1742_v54  ;;  %v1633_v10 = vsub.f32 %v7993_v31, %v1557_v6  ;;  %v1566_v49 = vpop.xlane.xlu1 %1565  ;;  %v1903_v17 = vsel %vm1383_vm1, %v8318_v50, 0.0 }
 0x4ee   :  { %6734 = vpow2.f32 %v1738_v11  ;;  %1904 = vadd.xlane.f32.xlu0 %v1903_v17  ;;  %v1638_v11 = vsub.f32 %v9881_v53, %v1572_v30 }
 0x4ef   :  { %v8323_v12 = vpop.eup %6726  ;;  %6736 = vpow2.f32 %v1758_v58  ;;  %v1754_v5 = vmul.f32 1.442695, %v1633_v10  ;;  %v1636_v58 = vsub.f32 %v8011_v18, %v1566_v49 }
 0x4f0   :  { %9879 = vst [vmem:[#allocation34_spill] sm:$0xff] %v8323_v12  ;;  %v8327_v43 = vpop.eup %6728  ;;  %v1548_v59 = vpop.xlane.xlu0 %1547  ;;  %1919 = vadd.xlane.f32.xlu1 %v1918_v21  ;;  %v1912_v54 = vsel %vm1383_vm1, %v8323_v12, 0.0 }
 0x4f1   :  { %9880 = vst [vmem:[#allocation42_spill] sm:$0xff] %v8327_v43  ;;  %v1630_v1 = vsub.f32 %v8001_v23, %v1548_v59  ;;  %v1551_v31 = vpop.xlane.xlu1 %1550  ;;  %6738 = vpow2.f32 %v1754_v5  ;;  %v1942_v10 = vsel %vm1383_vm1, %v8327_v43, 0.0  ;;  %v1764_v59 = vmul.f32 1.442695, %v1638_v11 }
 0x4f2   :  { %1913 = vadd.xlane.f32.xlu0 %v1912_v54  ;;  %v1760_v5 = vmul.f32 1.442695, %v1636_v58  ;;  %v1631_v18 = vsub.f32 %v8013_v20, %v1551_v31 }
 0x4f3   :  { %v1748_v6 = vmul.f32 1.442695, %v1630_v1  ;;  %v8336_v17 = vpop.eup %6730 }
 0x4f4   :  { %v1542_v40 = vpop.xlane.xlu0 %1541  ;;  %1943 = vadd.xlane.f32.xlu1 %v1942_v10  ;;  %v1936_v1 = vsel %vm1383_vm1, %v8336_v17, 0.0  ;;  %v1750_v31 = vmul.f32 1.442695, %v1631_v18 }
 0x4f5   :  { %v1628_v23 = vsub.f32 %v8007_v15, %v1542_v40  ;;  %v1575_v21 = vpop.xlane.xlu1 %1574  ;;  %6740 = vpow2.f32 %v1748_v6 }
 0x4f6   :  { %v1639_v12 = vsub.f32 %v8017_v56, %v1575_v21 }
 0x4f7   :  { %v8340_v30 = vpop.eup %6732  ;;  %v1744_v49 = vmul.f32 1.442695, %v1628_v23 }
 0x4f8   :  { %9882 = vst [vmem:[#allocation35_spill] sm:$0xff] %v8340_v30  ;;  %v8345_v54 = vpop.eup %6734  ;;  %v1776_v53 = vpop.xlane.xlu0 %1775  ;;  %1937 = vadd.xlane.f32.xlu1 %v1936_v1  ;;  %v1921_v15 = vsel %vm1383_vm1, %v8340_v30, 0.0  ;;  %v1766_v11 = vmul.f32 1.442695, %v1639_v12 }
 0x4f9   :  { %v8349_v40 = vpop.eup %6736  ;;  %6742 = vpow2.f32 %v1744_v49  ;;  %1922 = vadd.xlane.f32.xlu0 %v1921_v15  ;;  %v1545_v56 = vpop.xlane.xlu1 %1544  ;;  %v1915_v58 = vsel %vm1383_vm1, %v8345_v54, 0.0 }
 0x4fa   :  { %6744 = vpow2.f32 %v1764_v59  ;;  %v1629_v20 = vsub.f32 %v8019_v24, %v1545_v56  ;;  %v1945_v23 = vsel %vm1383_vm1, %v8349_v40, 0.0 }
 0x4fb   :  { %6746 = vpow2.f32 %v1760_v5  ;;  %v8354_v6 = vpop.eup %6738 }
 0x4fc   :  { %v1800_v10 = vpop.xlane.xlu0 %1799  ;;  %1916 = vadd.xlane.f32.xlu1 %v1915_v58  ;;  %6748 = vpow2.f32 %v1766_v11  ;;  %v1746_v49 = vmul.f32 1.442695, %v1629_v20  ;;  %v1939_v24 = vsel %vm1383_vm1, %v8354_v6, 0.0 }
 0x4fd   :  { %1946 = vadd.xlane.f32.xlu0 %v1945_v23  ;;  %v1569_v21 = vpop.xlane.xlu1 %1568  ;;  %6750 = vpow2.f32 %v1750_v31 }
 0x4fe   :  { %v1637_v12 = vsub.f32 %v8021_v4, %v1569_v21  ;;  %6752 = vpow2.f32 %v1746_v49 }
 0x4ff   :  { %v8361_v59 = vpop.eup %6740 }
 0x500   :  { %9883 = vst [vmem:[#allocation43_spill] sm:$0xff] %v8361_v59  ;;  %v1762_v5 = vmul.f32 1.442695, %v1637_v12  ;;  %v1770_v18 = vpop.xlane.xlu0 %1769  ;;  %1940 = vadd.xlane.f32.xlu1 %v1939_v24  ;;  %v1930_v56 = vsel %vm1383_vm1, %v8361_v59, 0.0 }
 0x501   :  { %v1803_v1 = vpop.xlane.xlu1 %1802 }
 0x502   :  { %6754 = vpow2.f32 %v1762_v5 }
 0x503   :  { %v8363_v15 = vpop.eup %6742  ;;  %6756 = vrcp.f32 %v1770_v18 }
 0x504   :  { %9884 = vst [vmem:[#allocation45_spill] sm:$0xff] %v8363_v15  ;;  %v8367_v11 = vpop.eup %6744  ;;  %v1794_v4 = vpop.xlane.xlu0 %1793  ;;  %1931 = vadd.xlane.f32.xlu1 %v1930_v56  ;;  %v1924_v20 = vsel %vm1383_vm1, %v8363_v15, 0.0 }
 0x505   :  { %9885 = vst [vmem:[#allocation44_spill] sm:$0xff] %v8367_v11  ;;  %v8371_v31 = vpop.eup %6746  ;;  %1925 = vadd.xlane.f32.xlu0 %v1924_v20  ;;  %v1773_v58 = vpop.xlane.xlu1 %1772  ;;  %v1954_v23 = vsel %vm1383_vm1, %v8367_v11, 0.0 }
 0x506   :  { %9886 = vst [vmem:[#allocation47_spill] sm:$0xff] %v8371_v31  ;;  %6758 = vrcp.f32 %v1773_v58  ;;  %v8375_v21 = vpop.eup %6748  ;;  %v1948_v12 = vsel %vm1383_vm1, %v8371_v31, 0.0 }
 0x507   :  { %6760 = vrcp.f32 %v1776_v53  ;;  %9887 = vst [vmem:[#allocation48_spill] sm:$0xff] %v8375_v21  ;;  %v8379_v24 = vpop.eup %6750  ;;  %v1957_v53 = vsel %vm1383_vm1, %v8375_v21, 0.0 }
 0x508   :  { %v1779_v49 = vpop.xlane.xlu0 %1778  ;;  %1955 = vadd.xlane.f32.xlu1 %v1954_v23  ;;  %9888 = vst [vmem:[#allocation49_spill] sm:$0xff] %v8379_v24  ;;  %v8383_v18 = vpop.eup %6752  ;;  %v1933_v20 = vsel %vm1383_vm1, %v8379_v24, 0.0 }
 0x509   :  { %6762 = vrcp.f32 %v1779_v49  ;;  %1949 = vadd.xlane.f32.xlu0 %v1948_v12  ;;  %v1791_v5 = vpop.xlane.xlu1 %1790  ;;  %9889 = vst [vmem:[#allocation50_spill] sm:$0xff] %v8383_v18 }
 0x50a   :  { %6764 = vrcp.f32 %v1803_v1  ;;  %v1927_v1 = vsel %vm1383_vm1, %v8383_v18, 0.0 }
 0x50b   :  { %6766 = vrcp.f32 %v1794_v4 }
 0x50c   :  { %6768 = vrcp.f32 %v1800_v10  ;;  %v1797_v56 = vpop.xlane.xlu0 %1796  ;;  %1958 = vadd.xlane.f32.xlu1 %v1957_v53  ;;  %v8387_v58 = vpop.eup %6754 }
 0x50d   :  { %9890 = vst [vmem:[#allocation51_spill] sm:$0xff] %v8387_v58  ;;  %6770 = vrcp.f32 %v1797_v56  ;;  %1934 = vadd.xlane.f32.xlu0 %v1933_v20  ;;  %v1815_v23 = vpop.xlane.xlu1 %1814  ;;  %v6757_v49 = vpop.eup %6756  ;;  %v1951_v10 = vsel %vm1383_vm1, %v8387_v58, 0.0 }
 0x50e   :  { %v2024_v59 = vmul.f32 %v6757_v49, %v8081_v13 }
 0x510   :  { %v6759_v4 = vpop.eup %6758  ;;  %v1788_v12 = vpop.xlane.xlu0 %1787  ;;  %1928 = vadd.xlane.f32.xlu1 %v1927_v1 }
 0x511   :  { %v6761_v11 = vpop.eup %6760  ;;  %1952 = vadd.xlane.f32.xlu0 %v1951_v10  ;;  %v1785_v53 = vpop.xlane.xlu1 %1784  ;;  %v2025_v31 = vmul.f32 %v6759_v4, %v8096_v42  ;;  %6772 = vrcp.f32 %v1788_v12  ;;  %v9898_v12 = vld [vmem:[#allocation15_spill] sm:$0xff] }
 0x512   :  { %v2026_v24 = vmul.f32 %v6761_v11, %v8058_v38  ;;  %6774 = vrcp.f32 %v1785_v53  ;;  %v9891_v11 = vld [vmem:[#allocation10_spill] sm:$0xff] }
 0x513   :  { %v6763_v56 = vpop.eup %6762  ;;  %v2088_v20 = vpack.c.bf16 %v2025_v31, %v2024_v59  ;;  %6776 = vrcp.f32 %v1791_v5  ;;  %v9892_v31 = vld [vmem:[#allocation14_spill] sm:$0xff] }
 0x514   :  { %v6765_v21 = vpop.eup %6764  ;;  %v2027_v18 = vmul.f32 %v6763_v56, %v8101_v27  ;;  %v1812_v15 = vpop.xlane.xlu0 %1811 }
 0x515   :  { %v6767_v43 = vpop.eup %6766  ;;  %v1809_v1 = vpop.xlane.xlu1 %1808  ;;  %6103 = vmatprep.mubr.msk.bf16.mxu1 %vm1383_vm1, %v2088_v20  ;;  %v2035_v13 = vmul.f32 %v6765_v21, %v8075_v47  ;;  %v9897_v21 = vld [vmem:[#allocation9_spill] sm:$0xff]  ;;  %v9899_v20 = vld [vmem:[#allocation16_spill] sm:$0xff] }
 0x516   :  { %v6769_v58 = vpop.eup %6768  ;;  %v2089_v30 = vpack.c.bf16 %v2027_v18, %v2026_v24  ;;  %v2032_v38 = vmul.f32 %v6767_v43, %v8092_v63  ;;  %v9894_v63 = vld [vmem:[#allocation11_spill] sm:$0xff]  ;;  %v9895_v43 = vld [vmem:[#allocation12_spill] sm:$0xff] }
 0x517   :  { %v6771_v10 = vpop.eup %6770  ;;  %v2034_v59 = vmul.f32 %v6769_v58, %v8068_v3  ;;  %v9893_v3 = vld [vmem:[#allocation13_spill] sm:$0xff] }
 0x518   :  { %6104 = vmatmul.mubr.msk.bf16.vlgmr.msra.gmra.mrb[32].mxu1 %vm1383_vm1, %v2089_v30  ;;  %v1782_v42 = vpop.xlane.xlu0 %1781  ;;  %v2033_v27 = vmul.f32 %v6771_v10, %v8110_v61 }
 0x519   :  { %6128 = vmatpush3.bf16.msra.mxu1 %v9891_v11  ;;  %6778 = vrcp.f32 %v1782_v42  ;;  %v2093_v18 = vpack.c.bf16 %v2035_v13, %v2034_v59  ;;  %v9900_v59 = vld [vmem:[#allocation8_spill] sm:$0xff] }
 0x51a   :  { %6780 = vrcp.f32 %v1812_v15  ;;  %6129 = vmatprep.subr.bf16.mxu1 %v9892_v31  ;;  %v2092_v24 = vpack.c.bf16 %v2033_v27, %v2032_v38  ;;  %v9896_v15 = vld [vmem:[#allocation7_spill] sm:$0xff] }
 0x51b   :  { %6782 = vrcp.f32 %v1809_v1  ;;  %v1848_v47 = vpop.xlane.xlu1 %1847  ;;  %v646_v5 = vmul.bf16 %v9897_v21, %v9896_v15  ;;  %v6773_v58 = vpop.eup %6772  ;;  %v642_v11 = vmul.bf16 %v9900_v59, %v9896_v15 }
 0x51c   :  { %6784 = vrcp.f32 %v1815_v23  ;;  %6119 = vmatprep.mubr.msk.bf16.mxu0 %vm1383_vm1, %v2092_v24  ;;  %v1806_v30 = vpop.xlane.xlu0 %1805  ;;  %v6775_v49 = vpop.eup %6774  ;;  %v2030_v1 = vmul.f32 %v6773_v58, %v8122_v26  ;;  %v9901_v26 = vld [vmem:[#allocation18_spill] sm:$0xff] }
 0x51d   :  { %6130 = vmatpush3.bf16.msra.mxu1 %v9892_v31  ;;  %6786 = vrcp.f32 %v1806_v30  ;;  %6120 = vmatmul.mubr.msk.bf16.vlgmr.msra.gmra.mrb[48].mxu0 %vm1383_vm1, %v2093_v18  ;;  %v6777_v4 = vpop.eup %6776  ;;  %v2029_v38 = vmul.f32 %v6775_v49, %v8126_v35  ;;  %v9902_v35 = vld [vmem:[#allocation17_spill] sm:$0xff] }
 0x51e   :  { %6131 = vmatprep.subr.bf16.mxu1 %v9893_v3  ;;  %6144 = vmatpush3.bf16.msra.mxu0 %v9894_v63  ;;  %6788 = vrcp.f32 %v1848_v47  ;;  %v2031_v31 = vmul.f32 %v6777_v4, %v8105_v29 }
 0x51f   :  { %v1818_v61 = vpop.xlane.xlu1 %1817  ;;  %6145 = vmatprep.subr.bf16.mxu0 %v9895_v43 }
 0x520   :  { %v1824_v23 = vpop.xlane.xlu0 %1823  ;;  %v2091_v47 = vpack.c.bf16 %v2031_v31, %v2030_v1 }
 0x521   :  { %6132 = vmatpush3.bf16.msra.mxu1 %v9893_v3  ;;  %2781 = vrot.lane.b32.xlu1 %v646_v5, %s6989_s0 }
 0x522   :  { %6133 = vmatprep.subr.bf16.mxu1 %v9898_v12  ;;  %6146 = vmatpush3.bf16.msra.mxu0 %v9895_v43 }
 0x523   :  { %v6779_v53 = vpop.eup %6778  ;;  %v1827_v56 = vpop.xlane.xlu1 %1826  ;;  %6147 = vmatprep.subr.bf16.mxu0 %v9899_v20 }
 0x524   :  { %v6781_v10 = vpop.eup %6780  ;;  %v1842_v13 = vpop.xlane.xlu0 %1841  ;;  %v2028_v42 = vmul.f32 %v6779_v53, %v8147_v37  ;;  %6790 = vrcp.f32 %v1827_v56 }
 0x525   :  { %v6783_v27 = vpop.eup %6782  ;;  %6134 = vmatpush3.bf16.msra.mxu1 %v9898_v12  ;;  %6792 = vrcp.f32 %v1842_v13  ;;  %v2038_v3 = vmul.f32 %v6781_v10, %v8133_v48  ;;  %v9903_v48 = vld [vmem:[#allocation19_spill] sm:$0xff] }
 0x526   :  { %v6785_v24 = vpop.eup %6784  ;;  %6148 = vmatpush3.bf16.msra.mxu0 %v9899_v20  ;;  %6159 = vmatprep.subr.bf16.mxu1 %v9901_v26  ;;  %v2090_v18 = vpack.c.bf16 %v2029_v38, %v2028_v42  ;;  %v2037_v43 = vmul.f32 %v6783_v27, %v8137_v36 }
 0x527   :  { %v6787_v30 = vpop.eup %6786  ;;  %v1851_v37 = vpop.xlane.xlu1 %1850  ;;  %6149 = vmatprep.subr.bf16.mxu0 %v9902_v35  ;;  %2688 = vrot.lane.b32.xlu0 %v642_v11, %s6989_s0  ;;  %v2039_v15 = vmul.f32 %v6785_v24, %v8114_v9 }
 0x528   :  { %6794 = vrcp.f32 %v1851_v37  ;;  %6107 = vmatprep.mubr.msk.bf16.mxu1 %vm1383_vm1, %v2090_v18  ;;  %v1845_v29 = vpop.xlane.xlu0 %1844  ;;  %v2036_v63 = vmul.f32 %v6787_v30, %v8155_v60  ;;  %v6789_v36 = vpop.eup %6788  ;;  %v9906_v37 = vld [vmem:[#allocation26_spill] sm:$0xff] }
 0x529   :  { %6796 = vrcp.f32 %v1845_v29  ;;  %6108 = vmatmul.mubr.msk.bf16.gmra.mrb[36].mxu1 %vm1383_vm1, %v2091_v47  ;;  %v2095_v58 = vpack.c.bf16 %v2039_v15, %v2038_v3  ;;  %v2050_v42 = vmul.f32 %v6789_v36, %v8157_v39  ;;  %v9907_v29 = vld [vmem:[#allocation40_spill] sm:$0xff]  ;;  %v9910_v15 = vld [vmem:[#allocation37_spill] sm:$0xff] }
 0x52a   :  { %6798 = vrcp.f32 %v1818_v61  ;;  %6150 = vmatpush3.bf16.msra.mxu0 %v9902_v35  ;;  %v2094_v21 = vpack.c.bf16 %v2037_v43, %v2036_v63  ;;  %v9908_v63 = vld [vmem:[#allocation27_spill] sm:$0xff] }
 0x52b   :  { %6800 = vrcp.f32 %v1824_v23  ;;  %v1821_v5 = vpop.xlane.xlu1 %1820  ;;  %6175 = vmatprep.subr.bf16.mxu0 %v9903_v48 }
 0x52c   :  { %6802 = vrcp.f32 %v1821_v5  ;;  %6123 = vmatprep.mubr.msk.bf16.mxu0 %vm1383_vm1, %v2094_v21  ;;  %v1860_v60 = vpop.xlane.xlu0 %1859 }
 0x52d   :  { %6124 = vmatmul.mubr.msk.bf16.gmra.mrb[52].mxu0 %vm1383_vm1, %v2095_v58  ;;  %v9911_v58 = vld [vmem:[#allocation22_spill] sm:$0xff] }
 0x52e   :  { %v6791_v4 = vpop.eup %6790 }
 0x52f   :  { %v1836_v49 = vpop.xlane.xlu1 %1835  ;;  %v6793_v9 = vpop.eup %6792  ;;  %v2043_v27 = vmul.f32 %v6791_v4, %v8172_v34  ;;  %v9904_v34 = vld [vmem:[#allocation21_spill] sm:$0xff] }
 0x530   :  { %v1833_v12 = vpop.xlane.xlu0 %1832  ;;  %v2048_v1 = vmul.f32 %v6793_v9, %v8177_v0 }
 0x531   :  { %6804 = vrcp.f32 %v1833_v12 }
 0x532   :  { %v6795_v61 = vpop.eup %6794 }
 0x533   :  { %v6797_v53 = vpop.eup %6796  ;;  %v2051_v23 = vmul.f32 %v6795_v61, %v8181_v32  ;;  %v1830_v56 = vpop.xlane.xlu1 %1829 }
 0x534   :  { %v6799_v20 = vpop.eup %6798  ;;  %6806 = vrcp.f32 %v1830_v56  ;;  %v2049_v10 = vmul.f32 %v6797_v53, %v8186_v51 }
 0x535   :  { %v6801_v13 = vpop.eup %6800  ;;  %v2101_v11 = vpack.c.bf16 %v2051_v23, %v2050_v42  ;;  %v2040_v24 = vmul.f32 %v6799_v20, %v8168_v25  ;;  %6808 = vrcp.f32 %v1836_v49  ;;  %v9905_v25 = vld [vmem:[#allocation20_spill] sm:$0xff] }
 0x536   :  { %v6803_v38 = vpop.eup %6802  ;;  %v2100_v59 = vpack.c.bf16 %v2049_v10, %v2048_v1  ;;  %v2042_v18 = vmul.f32 %v6801_v13, %v8166_v55 }
 0x537   :  { %v1854_v31 = vpop.xlane.xlu1 %1853  ;;  %v2041_v32 = vmul.f32 %v6803_v38, %v8192_v14 }
 0x538   :  { %6151 = vmatprep.mubr.msk.bf16.mxu0 %vm1383_vm1, %v2100_v59  ;;  %v2097_v51 = vpack.c.bf16 %v2043_v27, %v2042_v18 }
 0x539   :  { %6152 = vmatmul.mubr.msk.bf16.vlgmr.msra.gmra.mrb[56].mxu0 %vm1383_vm1, %v2101_v11  ;;  %v2096_v0 = vpack.c.bf16 %v2041_v32, %v2040_v24 }
 0x53a   :  { %6176 = vmatpush3.bf16.msra.mxu0 %v9903_v48 }
 0x53b   :  { %v1839_v39 = vpop.xlane.xlu1 %1838  ;;  %6135 = vmatprep.mubr.msk.bf16.mxu1 %vm1383_vm1, %v2096_v0  ;;  %6177 = vmatprep.subr.bf16.mxu0 %v9904_v34  ;;  %v6805_v30 = vpop.eup %6804 }
 0x53c   :  { %6810 = vrcp.f32 %v1839_v39  ;;  %6136 = vmatmul.mubr.msk.bf16.vlgmr.msra.gmra.mrb[40].mxu1 %vm1383_vm1, %v2097_v51  ;;  %v2045_v47 = vmul.f32 %v6805_v30, %v8206_v8 }
 0x53d   :  { %6160 = vmatpush3.bf16.msra.mxu1 %v9901_v26 }
 0x53e   :  { %v6807_v55 = vpop.eup %6806  ;;  %6161 = vmatprep.subr.bf16.mxu1 %v9905_v25  ;;  %6178 = vmatpush3.bf16.msra.mxu0 %v9904_v34 }
 0x53f   :  { %v1863_v14 = vpop.xlane.xlu1 %1862  ;;  %6179 = vmatprep.subr.bf16.mxu0 %v9906_v37  ;;  %v2044_v35 = vmul.f32 %v6807_v55, %v8211_v16  ;;  %v6809_v43 = vpop.eup %6808  ;;  %v9909_v16 = vld [vmem:[#allocation23_spill] sm:$0xff] }
 0x540   :  { %6812 = vrcp.f32 %v1863_v14  ;;  %v2046_v21 = vmul.f32 %v6809_v43, %v8202_v2  ;;  %v9912_v14 = vld [vmem:[#allocation28_spill] sm:$0xff]  ;;  %v9916_v43 = vld [vmem:[#allocation38_spill] sm:$0xff] }
 0x541   :  { %6162 = vmatpush3.bf16.msra.mxu1 %v9905_v25  ;;  %v2098_v3 = vpack.c.bf16 %v2045_v47, %v2044_v35  ;;  %6814 = vrcp.f32 %v1854_v31 }
 0x542   :  { %6163 = vmatprep.subr.bf16.mxu1 %v9907_v29  ;;  %6180 = vmatpush3.bf16.msra.mxu0 %v9906_v37  ;;  %6816 = vrcp.f32 %v1860_v60 }
 0x543   :  { %v1857_v26 = vpop.xlane.xlu1 %1856  ;;  %6139 = vmatprep.mubr.msk.bf16.mxu1 %vm1383_vm1, %v2098_v3  ;;  %6181 = vmatprep.subr.bf16.mxu0 %v9908_v63 }
 0x544   :  { %6818 = vrcp.f32 %v1857_v26  ;;  %v9915_v26 = vld [vmem:[#allocation24_spill] sm:$0xff] }
 0x545   :  { %6164 = vmatpush3.bf16.msra.mxu1 %v9907_v29  ;;  %v9914_v29 = vld [vmem:[#allocation30_spill] sm:$0xff] }
 0x546   :  { %v6811_v8 = vpop.eup %6810  ;;  %6165 = vmatprep.subr.bf16.mxu1 %v9909_v16  ;;  %6182 = vmatpush3.bf16.msra.mxu0 %v9908_v63 }
 0x547   :  { %6207 = vmatprep.subr.bf16.mxu0 %v9910_v15  ;;  %v2047_v5 = vmul.f32 %v6811_v8, %v8221_v22 }
 0x549   :  { %6166 = vmatpush3.bf16.msra.mxu1 %v9909_v16  ;;  %v2099_v48 = vpack.c.bf16 %v2047_v5, %v2046_v21  ;;  %v9917_v21 = vld [vmem:[#allocation46_spill] sm:$0xff]  ;;  %v9918_v5 = vld [vmem:[#allocation39_spill] sm:$0xff] }
 0x54a   :  { %6191 = vmatprep.subr.bf16.mxu1 %v9911_v58  ;;  %v6813_v60 = vpop.eup %6812 }
 0x54b   :  { %6140 = vmatmul.mubr.msk.bf16.gmra.mrb[44].mxu1 %vm1383_vm1, %v2099_v48  ;;  %v6815_v36 = vpop.eup %6814  ;;  %v2055_v12 = vmul.f32 %v6813_v60, %v8225_v46 }
 0x54c   :  { %v6817_v49 = vpop.eup %6816  ;;  %v2052_v9 = vmul.f32 %v6815_v36, %v8217_v33  ;;  %v9919_v36 = vld [vmem:[#allocation36_spill] sm:$0xff] }
 0x54d   :  { %v2054_v2 = vmul.f32 %v6817_v49, %v8196_v28 }
 0x54e   :  { %v6819_v4 = vpop.eup %6818 }
 0x54f   :  { %v2053_v61 = vmul.f32 %v6819_v4, %v8229_v62  ;;  %v2103_v53 = vpack.c.bf16 %v2055_v12, %v2054_v2 }
 0x551   :  { %v2102_v22 = vpack.c.bf16 %v2053_v61, %v2052_v9 }
 0x553   :  { %6155 = vmatprep.mubr.msk.bf16.mxu0 %vm1383_vm1, %v2102_v22 }
 0x554   :  { %6156 = vmatmul.mubr.msk.bf16.gmra.mrb[60].mxu0 %vm1383_vm1, %v2103_v53 }
 0x555   :  { %v1872_v23 = vpop.xlane.xlu1 %1871 }
 0x559   :  { %v1896_v56 = vpop.xlane.xlu1 %1895 }
 0x55d   :  { %v1866_v20 = vpop.xlane.xlu0 %1865 }
 0x561   :  { %v1890_v1 = vpop.xlane.xlu1 %1889  ;;  %v1875_v10 = vpop.xlane.xlu0 %1874 }
 0x562   :  { %6820 = vrcp.f32 %v1875_v10  ;;  %v9921_v10 = vld [vmem:[#allocation31_spill] sm:$0xff] }
 0x563   :  { %6822 = vrcp.f32 %v1866_v20 }
 0x564   :  { %6824 = vrcp.f32 %v1872_v23  ;;  %v9920_v23 = vld [vmem:[#allocation29_spill] sm:$0xff] }
 0x565   :  { %v1869_v46 = vpop.xlane.xlu1 %1868  ;;  %v1899_v33 = vpop.xlane.xlu0 %1898 }
 0x566   :  { %6826 = vrcp.f32 %v1869_v46 }
 0x567   :  { %6828 = vrcp.f32 %v1899_v33 }
 0x568   :  { %6830 = vrcp.f32 %v1890_v1 }
 0x569   :  { %6832 = vrcp.f32 %v1896_v56  ;;  %v1893_v28 = vpop.xlane.xlu1 %1892  ;;  %v1878_v62 = vpop.xlane.xlu0 %1877 }
 0x56a   :  { %6834 = vrcp.f32 %v1893_v28 }
 0x56b   :  { %6836 = vrcp.f32 %v1878_v62  ;;  %v9922_v62 = vld [vmem:[#allocation32_spill] sm:$0xff] }
 0x56c   :  { %v6821_v13 = vpop.eup %6820 }
 0x56d   :  { %v1884_v42 = vpop.xlane.xlu1 %1883  ;;  %v6823_v38 = vpop.eup %6822  ;;  %v2059_v31 = vmul.f32 %v6821_v13, %v8257_v44  ;;  %v9913_v44 = vld [vmem:[#allocation25_spill] sm:$0xff] }
 0x56e   :  { %v1902_v27 = vpop.xlane.xlu0 %1901  ;;  %v6825_v59 = vpop.eup %6824  ;;  %v2056_v18 = vmul.f32 %v6823_v38, %v8252_v7  ;;  %6838 = vrcp.f32 %v1884_v42 }
 0x56f   :  { %v2058_v39 = vmul.f32 %v6825_v59, %v8240_v19 }
 0x570   :  { %v6827_v11 = vpop.eup %6826 }
 0x571   :  { %v6829_v24 = vpop.eup %6828  ;;  %v1908_v32 = vpop.xlane.xlu1 %1907  ;;  %v2057_v0 = vmul.f32 %v6827_v11, %v8268_v41  ;;  %v2105_v25 = vpack.c.bf16 %v2059_v31, %v2058_v39  ;;  %v9924_v39 = vld [vmem:[#allocation34_spill] sm:$0xff] }
 0x572   :  { %v6831_v51 = vpop.eup %6830  ;;  %v2067_v37 = vmul.f32 %v6829_v24, %v9912_v14  ;;  %v1887_v35 = vpop.xlane.xlu0 %1886 }
 0x573   :  { %v6833_v34 = vpop.eup %6832  ;;  %v2104_v30 = vpack.c.bf16 %v2057_v0, %v2056_v18  ;;  %v2064_v3 = vmul.f32 %v6831_v51, %v9913_v44  ;;  %6840 = vrcp.f32 %v1887_v35 }
 0x574   :  { %v6835_v55 = vpop.eup %6834  ;;  %v2066_v41 = vmul.f32 %v6833_v34, %v9915_v26  ;;  %6842 = vrcp.f32 %v1902_v27 }
 0x575   :  { %v1911_v47 = vpop.xlane.xlu1 %1910  ;;  %6167 = vmatprep.mubr.msk.bf16.mxu1 %vm1383_vm1, %v2104_v30  ;;  %v2065_v7 = vmul.f32 %v6835_v55, %v9914_v29 }
 0x576   :  { %6168 = vmatmul.mubr.msk.bf16.vlgmr.msra.gmra.mrb[48].mxu1 %vm1383_vm1, %v2105_v25  ;;  %v2109_v63 = vpack.c.bf16 %v2067_v37, %v2066_v41  ;;  %6844 = vrcp.f32 %v1911_v47 }
 0x577   :  { %6192 = vmatpush3.bf16.msra.mxu1 %v9911_v58  ;;  %v2108_v19 = vpack.c.bf16 %v2065_v7, %v2064_v3  ;;  %v6837_v58 = vpop.eup %6836 }
 0x578   :  { %6193 = vmatprep.subr.bf16.mxu1 %v9916_v43  ;;  %v6839_v60 = vpop.eup %6838  ;;  %v2060_v56 = vmul.f32 %v6837_v58, %v9920_v23  ;;  %v9928_v23 = vld [vmem:[#allocation45_spill] sm:$0xff] }
 0x579   :  { %v1881_v8 = vpop.xlane.xlu1 %1880  ;;  %6183 = vmatprep.mubr.msk.bf16.mxu0 %vm1383_vm1, %v2108_v19  ;;  %v2062_v46 = vmul.f32 %v6839_v60, %v9921_v10  ;;  %v9930_v10 = vld [vmem:[#allocation49_spill] sm:$0xff] }
 0x57a   :  { %6846 = vrcp.f32 %v1881_v8  ;;  %6184 = vmatmul.mubr.msk.bf16.vlgmr.msra.gmra.mrb[64].mxu0 %vm1383_vm1, %v2109_v63 }
 0x57b   :  { %6848 = vrcp.f32 %v1908_v32  ;;  %6194 = vmatpush3.bf16.msra.mxu1 %v9916_v43  ;;  %6208 = vmatpush3.bf16.msra.mxu0 %v9910_v15  ;;  %v1905_v16 = vpop.xlane.xlu0 %1904  ;;  %v9925_v43 = vld [vmem:[#allocation35_spill] sm:$0xff] }
 0x57c   :  { %6195 = vmatprep.subr.bf16.mxu1 %v9917_v21  ;;  %6209 = vmatprep.subr.bf16.mxu0 %v9918_v5  ;;  %6850 = vrcp.f32 %v1905_v16  ;;  %v6511_v16 = vld [vmem:[%s9715_s5] sm:$0xff]  }
 0x57d   :  { %v1920_v48 = vpop.xlane.xlu1 %1919  ;;  %v6841_v49 = vpop.eup %6840 }
 0x57e   :  { %v6843_v12 = vpop.eup %6842  ;;  %v2063_v2 = vmul.f32 %v6841_v49, %v8297_v57  ;;  %v9923_v57 = vld [vmem:[#allocation33_spill] sm:$0xff] }
 0x57f   :  { %6196 = vmatpush3.bf16.msra.mxu1 %v9917_v21  ;;  %6210 = vmatpush3.bf16.msra.mxu0 %v9918_v5  ;;  %v1914_v61 = vpop.xlane.xlu0 %1913  ;;  %v2068_v13 = vmul.f32 %v6843_v12, %v9922_v62  ;;  %v9926_v5 = vld [vmem:[#allocation42_spill] sm:$0xff]  ;;  %v9932_v62 = vld [vmem:[#allocation47_spill] sm:$0xff] }
 0x580   :  { %6211 = vmatprep.subr.bf16.mxu0 %v9919_v36  ;;  %v6845_v9 = vpop.eup %6844  ;;  %6852 = vrcp.f32 %v1914_v61  ;;  %v2107_v27 = vpack.c.bf16 %v2063_v2, %v2062_v46 }
 0x581   :  { %v1944_v4 = vpop.xlane.xlu1 %1943  ;;  %v2071_v33 = vmul.f32 %v6845_v9, %v8304_v52 }
 0x583   :  { %6212 = vmatpush3.bf16.msra.mxu0 %v9919_v36  ;;  %v9927_v36 = vld [vmem:[#allocation41_spill] sm:$0xff] }
 0x584   :  { %v6847_v15 = vpop.eup %6846 }
 0x585   :  { %v6849_v22 = vpop.eup %6848  ;;  %v1938_v53 = vpop.xlane.xlu1 %1937  ;;  %v2061_v20 = vmul.f32 %v6847_v15, %v8311_v45  ;;  %v6512_v15 = vld [vmem:[%s9715_s5 + $0x8] sm:$0xff]  }
 0x586   :  { %v6851_v1 = vpop.eup %6850  ;;  %v1923_v38 = vpop.xlane.xlu0 %1922  ;;  %v2070_v59 = vmul.f32 %v6849_v22, %v9923_v57  ;;  %v9934_v57 = vld [vmem:[#allocation43_spill] sm:$0xff] }
 0x587   :  { %v2106_v28 = vpack.c.bf16 %v2061_v20, %v2060_v56  ;;  %v2069_v42 = vmul.f32 %v6851_v1, %v8318_v50  ;;  %v9929_v20 = vld [vmem:[#allocation50_spill] sm:$0xff] }
 0x588   :  { %v2111_v45 = vpack.c.bf16 %v2071_v33, %v2070_v59  ;;  %v9931_v33 = vld [vmem:[#allocation48_spill] sm:$0xff] }
 0x589   :  { %v1917_v11 = vpop.xlane.xlu1 %1916  ;;  %6171 = vmatprep.mubr.msk.bf16.mxu1 %vm1383_vm1, %v2106_v28  ;;  %v2110_v31 = vpack.c.bf16 %v2069_v42, %v2068_v13  ;;  %v9933_v42 = vld [vmem:[#allocation51_spill] sm:$0xff] }
 0x58a   :  { %6854 = vrcp.f32 %v1917_v11  ;;  %6172 = vmatmul.mubr.msk.bf16.gmra.mrb[52].mxu1 %vm1383_vm1, %v2107_v27  ;;  %v1947_v50 = vpop.xlane.xlu0 %1946  ;;  %v6853_v32 = vpop.eup %6852  ;;  %v9935_v11 = vld [vmem:[#allocation44_spill] sm:$0xff] }
 0x58b   :  { %6187 = vmatprep.mubr.msk.bf16.mxu0 %vm1383_vm1, %v2110_v31  ;;  %6856 = vrcp.f32 %v1938_v53  ;;  %v2072_v34 = vmul.f32 %v6853_v32, %v9924_v39 }
 0x58c   :  { %6188 = vmatmul.mubr.msk.bf16.gmra.mrb[68].mxu0 %vm1383_vm1, %v2111_v45 }
 0x58d   :  { %v1941_v52 = vpop.xlane.xlu1 %1940 }
 0x58e   :  { %6858 = vrcp.f32 %v1941_v52 }
 0x58f   :  { %6860 = vrcp.f32 %v1947_v50 }
 0x590   :  { %6862 = vrcp.f32 %v1923_v38 }
 0x591   :  { %v1932_v24 = vpop.xlane.xlu1 %1931  ;;  %6864 = vrcp.f32 %v1944_v4 }
 0x592   :  { %v1926_v18 = vpop.xlane.xlu0 %1925  ;;  %6866 = vrcp.f32 %v1920_v48 }
 0x593   :  { %6868 = vrcp.f32 %v1932_v24 }
 0x594   :  { %v6855_v0 = vpop.eup %6854  ;;  %6870 = vrcp.f32 %v1926_v18 }
 0x595   :  { %v1956_v51 = vpop.xlane.xlu1 %1955  ;;  %v2073_v30 = vmul.f32 %v6855_v0, %v8345_v54  ;;  %v6857_v55 = vpop.eup %6856 }
 0x596   :  { %v1950_v25 = vpop.xlane.xlu0 %1949  ;;  %v2080_v47 = vmul.f32 %v6857_v55, %v8336_v17  ;;  %6872 = vrcp.f32 %v1956_v51 }
 0x597   :  { %v2112_v14 = vpack.c.bf16 %v2073_v30, %v2072_v34 }
 0x598   :  { %v6859_v37 = vpop.eup %6858 }
 0x599   :  { %v1959_v35 = vpop.xlane.xlu1 %1958  ;;  %6199 = vmatprep.mubr.msk.bf16.mxu1 %vm1383_vm1, %v2112_v14  ;;  %v2081_v44 = vmul.f32 %v6859_v37, %v8354_v6  ;;  %v6861_v54 = vpop.eup %6860 }
 0x59a   :  { %v1935_v3 = vpop.xlane.xlu0 %1934  ;;  %6874 = vrcp.f32 %v1959_v35  ;;  %v6863_v26 = vpop.eup %6862  ;;  %v2083_v17 = vmul.f32 %v6861_v54, %v8349_v40 }
 0x59b   :  { %v2116_v29 = vpack.c.bf16 %v2081_v44, %v2080_v47  ;;  %6876 = vrcp.f32 %v1935_v3  ;;  %v6865_v19 = vpop.eup %6864  ;;  %v2075_v6 = vmul.f32 %v6863_v26, %v9925_v43 }
 0x59c   :  { %6878 = vrcp.f32 %v1950_v25  ;;  %v6867_v63 = vpop.eup %6866  ;;  %v2082_v48 = vmul.f32 %v6865_v19, %v9926_v5 }
 0x59d   :  { %v1929_v7 = vpop.xlane.xlu1 %1928  ;;  %6215 = vmatprep.mubr.msk.bf16.mxu0 %vm1383_vm1, %v2116_v29  ;;  %v6869_v21 = vpop.eup %6868  ;;  %v2074_v49 = vmul.f32 %v6867_v63, %v9927_v36 }
 0x59e   :  { %6880 = vrcp.f32 %v1929_v7  ;;  %v1953_v41 = vpop.xlane.xlu0 %1952  ;;  %v6871_v60 = vpop.eup %6870  ;;  %v2117_v12 = vpack.c.bf16 %v2083_v17, %v2082_v48  ;;  %v2078_v59 = vmul.f32 %v6869_v21, %v9934_v57 }
 0x59f   :  { %6882 = vrcp.f32 %v1953_v41  ;;  %v2113_v9 = vpack.c.bf16 %v2075_v6, %v2074_v49  ;;  %v2076_v56 = vmul.f32 %v6871_v60, %v9928_v23 }
 0x5a0   :  { %v6873_v4 = vpop.eup %6872 }
 0x5a1   :  { %v2782_v8 = vpop.permute.xlu1 %2781  ;;  %v2086_v31 = vmul.f32 %v6873_v4, %v9935_v11 }
 0x5a2   :  { %v2689_v58 = vpop.permute.xlu0 %2688  ;;  %6213 = vmatprep.subr.bf16.mxu0 %v2782_v8 }
 0x5a3   :  { %6197 = vmatprep.subr.bf16.mxu1 %v2689_v58  ;;  %6214 = vmatpush3.bf16.msra.mxu0 %v2782_v8 }
 0x5a4   :  { %6198 = vmatpush3.bf16.msra.mxu1 %v2689_v58  ;;  %v6875_v40 = vpop.eup %6874 }
 0x5a5   :  { %6223 = vmatprep.subr.bf16.mxu1 %v6511_v16  ;;  %v6877_v61 = vpop.eup %6876  ;;  %v2087_v28 = vmul.f32 %v6875_v40, %v9931_v33 }
 0x5a6   :  { %6216 = vmatmul.mubr.msk.bf16.vlgmr.msra.gmra.mrb[72].mxu0 %vm1383_vm1, %v2117_v12  ;;  %v6879_v2 = vpop.eup %6878  ;;  %v2079_v46 = vmul.f32 %v6877_v61, %v9930_v10 }
 0x5a7   :  { %6200 = vmatmul.mubr.msk.bf16.vlgmr.msra.gmra.mrb[56].mxu1 %vm1383_vm1, %v2113_v9  ;;  %v2084_v13 = vmul.f32 %v6879_v2, %v9932_v62  ;;  %v2119_v50 = vpack.c.bf16 %v2087_v28, %v2086_v31 }
 0x5a8   :  { %v6881_v22 = vpop.eup %6880  ;;  %6224 = vmatpush3.bf16.msra.mxu1 %v6511_v16  ;;  %v2115_v52 = vpack.c.bf16 %v2079_v46, %v2078_v59 }
 0x5a9   :  { %v6883_v53 = vpop.eup %6882  ;;  %v2077_v1 = vmul.f32 %v6881_v22, %v9929_v20  ;;  %6225 = vmatprep.subr.bf16.mxu1 %v6512_v15 }
 0x5aa   :  { %v2085_v38 = vmul.f32 %v6883_v53, %v9933_v42 }
 0x5ab   :  { %v2114_v27 = vpack.c.bf16 %v2077_v1, %v2076_v56 }
 0x5ac   :  { %v2118_v45 = vpack.c.bf16 %v2085_v38, %v2084_v13  ;;  %6226 = vmatpush3.bf16.msra.mxu1 %v6512_v15 }
 0x5ad   :  { %6203 = vmatprep.mubr.msk.bf16.mxu1 %vm1383_vm1, %v2114_v27 }
 0x5ae   :  { %6219 = vmatprep.mubr.msk.bf16.mxu0 %vm1383_vm1, %v2118_v45 }
 0x5af   :  { %6204 = vmatmul.mubr.msk.bf16.gmra.mrb[60].mxu1 %vm1383_vm1, %v2115_v52  ;;  %6220 = vmatmul.mubr.msk.bf16.gmra.mrb[76].mxu0 %vm1383_vm1, %v2119_v50 }
 0x5eb   :  { %v6105_v24 = vpop.f32.mrb[32].mxu1 }
 0x5ec   :  { %v2182_v32 = vpop.f32.mrb[33].mxu1  ;;  %v2878_v39 = vsel %vm86_vm0, %v6105_v24, 0.0 }
 0x5ed   :  { %v6106_v18 = vpop.f32.mrb[34].mxu1  ;;  %v2864_v55 = vsel %vm86_vm0, %v2182_v32, 0.0 }
 0x5ee   :  { %v2185_v0 = vpop.f32.mrb[35].mxu1  ;;  %v2885_v35 = vsel %vm86_vm0, %v6106_v18, 0.0 }
 0x5ef   :  { %v2871_v29 = vsel %vm86_vm0, %v2185_v0, 0.0 }
 0x5f0   :  { %v6121_v51 = vpop.f32.mrb[48].mxu0 }
 0x5f1   :  { %v2879_v34 = vsel %vm86_vm0, %v6121_v51, 0.0  ;;  %v2275_v30 = vpop.f32.mrb[49].mxu0 }
 0x5f2   :  { %v2880_v25 = vadd.f32 %v2879_v34, %v2878_v39  ;;  %v2865_v14 = vsel %vm86_vm0, %v2275_v30, 0.0  ;;  %v6122_v37 = vpop.f32.mrb[50].mxu0 }
 0x5f3   :  { %v2866_v47 = vadd.f32 %v2865_v14, %v2864_v55  ;;  %v2886_v44 = vsel %vm86_vm0, %v6122_v37, 0.0  ;;  %v2278_v3 = vpop.f32.mrb[51].mxu0 }
 0x5f4   :  { %v2887_v54 = vadd.f32 %v2886_v44, %v2885_v35  ;;  %v2872_v7 = vsel %vm86_vm0, %v2278_v3, 0.0 }
 0x5f5   :  { %v2873_v26 = vadd.f32 %v2872_v7, %v2871_v29 }
 0x5fc   :  { %v6109_v41 = vpop.f32.mrb[36].mxu1 }
 0x5fd   :  { %v2198_v19 = vpop.f32.mrb[37].mxu1  ;;  %v2906_v6 = vsel %vm86_vm0, %v6109_v41, 0.0 }
 0x5fe   :  { %v6110_v63 = vpop.f32.mrb[38].mxu1  ;;  %v2892_v21 = vsel %vm86_vm0, %v2198_v19, 0.0 }
 0x5ff   :  { %v2201_v17 = vpop.f32.mrb[39].mxu1  ;;  %v2913_v60 = vsel %vm86_vm0, %v6110_v63, 0.0 }
 0x600   :  { %v6125_v43 = vpop.f32.mrb[52].mxu0  ;;  %v2899_v12 = vsel %vm86_vm0, %v2201_v17, 0.0 }
 0x601   :  { %v2907_v8 = vsel %vm86_vm0, %v6125_v43, 0.0  ;;  %v2291_v16 = vpop.f32.mrb[53].mxu0 }
 0x602   :  { %v2908_v5 = vadd.f32 %v2907_v8, %v2906_v6  ;;  %v2893_v48 = vsel %vm86_vm0, %v2291_v16, 0.0  ;;  %v6126_v58 = vpop.f32.mrb[54].mxu0 }
 0x603   :  { %v2894_v36 = vadd.f32 %v2893_v48, %v2892_v21  ;;  %v2914_v49 = vsel %vm86_vm0, %v6126_v58, 0.0  ;;  %v2294_v4 = vpop.f32.mrb[55].mxu0 }
 0x604   :  { %v2915_v40 = vadd.f32 %v2914_v49, %v2913_v60  ;;  %v2900_v9 = vsel %vm86_vm0, %v2294_v4, 0.0 }
 0x605   :  { %v2901_v15 = vadd.f32 %v2900_v9, %v2899_v12 }
 0x60c   :  { %v6153_v61 = vpop.f32.mrb[56].mxu0 }
 0x60d   :  { %v2461_v2 = vpop.f32.mrb[57].mxu0  ;;  %v2883_v33 = vsel %vm86_vm0, %v6153_v61, 0.0 }
 0x60e   :  { %v6154_v22 = vpop.f32.mrb[58].mxu0  ;;  %v2869_v42 = vsel %vm86_vm0, %v2461_v2, 0.0 }
 0x60f   :  { %v6137_v53 = vpop.f32.mrb[40].mxu1  ;;  %v2464_v23 = vpop.f32.mrb[59].mxu0  ;;  %v2890_v59 = vsel %vm86_vm0, %v6154_v22, 0.0 }
 0x610   :  { %v2881_v56 = vsel %vm86_vm0, %v6137_v53, 0.0  ;;  %v2368_v20 = vpop.f32.mrb[41].mxu1  ;;  %v2876_v45 = vsel %vm86_vm0, %v2464_v23, 0.0 }
 0x611   :  { %v2882_v1 = vadd.f32 %v2881_v56, %v2880_v25  ;;  %v2867_v10 = vsel %vm86_vm0, %v2368_v20, 0.0  ;;  %v6138_v46 = vpop.f32.mrb[42].mxu1 }
 0x612   :  { %v2868_v28 = vadd.f32 %v2867_v10, %v2866_v47  ;;  %v2888_v62 = vsel %vm86_vm0, %v6138_v46, 0.0  ;;  %v2371_v13 = vpop.f32.mrb[43].mxu1 }
 0x613   :  { %v2884_v38 = vadd.f32 %v2883_v33, %v2882_v1  ;;  %v2889_v27 = vadd.f32 %v2888_v62, %v2887_v54  ;;  %v2874_v57 = vsel %vm86_vm0, %v2371_v13, 0.0 }
 0x614   :  { %v2870_v11 = vadd.f32 %v2869_v42, %v2868_v28  ;;  %v2875_v31 = vadd.f32 %v2874_v57, %v2873_v26 }
 0x615   :  { %v2891_v52 = vadd.f32 %v2890_v59, %v2889_v27 }
 0x616   :  { %v2877_v50 = vadd.f32 %v2876_v45, %v2875_v31 }
 0x617   :  { %v2977_v24 = vpack.c.bf16 %v2891_v52, %v2884_v38 }
 0x618   :  { %v2976_v32 = vpack.c.bf16 %v2877_v50, %v2870_v11 }
 0x61a   :  { %6227 = vmatprep.mubr.msk.bf16.mxu1 %vm86_vm0, %v2976_v32 }
 0x61b   :  { %6228 = vmatmul.mubr.msk.bf16.vlgmr.msra.gmra.mrb[64].mxu1 %vm86_vm0, %v2977_v24 }
 0x61e   :  { %v6141_v18 = vpop.f32.mrb[44].mxu1 }
 0x61f   :  { %v2909_v0 = vsel %vm86_vm0, %v6141_v18, 0.0  ;;  %v2384_v51 = vpop.f32.mrb[45].mxu1 }
 0x620   :  { %v2910_v39 = vadd.f32 %v2909_v0, %v2908_v5  ;;  %v2895_v34 = vsel %vm86_vm0, %v2384_v51, 0.0  ;;  %v6142_v30 = vpop.f32.mrb[46].mxu1 }
 0x621   :  { %v2896_v55 = vadd.f32 %v2895_v34, %v2894_v36  ;;  %v2916_v25 = vsel %vm86_vm0, %v6142_v30, 0.0  ;;  %v2387_v14 = vpop.f32.mrb[47].mxu1 }
 0x622   :  { %v2917_v37 = vadd.f32 %v2916_v25, %v2915_v40  ;;  %v2902_v35 = vsel %vm86_vm0, %v2387_v14, 0.0 }
 0x623   :  { %v2903_v47 = vadd.f32 %v2902_v35, %v2901_v15 }
 0x627   :  { %v6157_v44 = vpop.f32.mrb[60].mxu0 }
 0x628   :  { %v2911_v3 = vsel %vm86_vm0, %v6157_v44, 0.0  ;;  %v2477_v29 = vpop.f32.mrb[61].mxu0 }
 0x629   :  { %v2912_v54 = vadd.f32 %v2911_v3, %v2910_v39  ;;  %v2897_v7 = vsel %vm86_vm0, %v2477_v29, 0.0  ;;  %v6158_v26 = vpop.f32.mrb[62].mxu0 }
 0x62a   :  { %v2898_v41 = vadd.f32 %v2897_v7, %v2896_v55  ;;  %v2918_v19 = vsel %vm86_vm0, %v6158_v26, 0.0  ;;  %v2480_v63 = vpop.f32.mrb[63].mxu0 }
 0x62b   :  { %v2919_v17 = vadd.f32 %v2918_v19, %v2917_v37  ;;  %v2904_v43 = vsel %vm86_vm0, %v2480_v63, 0.0 }
 0x62c   :  { %v2905_v6 = vadd.f32 %v2904_v43, %v2903_v47 }
 0x62d   :  { %v2979_v8 = vpack.c.bf16 %v2919_v17, %v2912_v54 }
 0x62e   :  { %v2978_v16 = vpack.c.bf16 %v2905_v6, %v2898_v41 }
 0x630   :  { %6231 = vmatprep.mubr.msk.bf16.mxu1 %vm86_vm0, %v2978_v16 }
 0x631   :  { %6232 = vmatmul.mubr.msk.bf16.gmra.mrb[68].mxu1 %vm86_vm0, %v2979_v8 }
 0x649   :  { %v6169_v21 = vpop.f32.mrb[48].mxu1 }
 0x64a   :  { %v2554_v5 = vpop.f32.mrb[49].mxu1  ;;  %v2934_v36 = vsel %vm86_vm0, %v6169_v21, 0.0 }
 0x64b   :  { %v6170_v48 = vpop.f32.mrb[50].mxu1  ;;  %v2920_v12 = vsel %vm86_vm0, %v2554_v5, 0.0 }
 0x64c   :  { %v2557_v58 = vpop.f32.mrb[51].mxu1  ;;  %v2941_v61 = vsel %vm86_vm0, %v6170_v48, 0.0 }
 0x64d   :  { %v6185_v60 = vpop.f32.mrb[64].mxu0  ;;  %v2927_v23 = vsel %vm86_vm0, %v2557_v58, 0.0 }
 0x64e   :  { %v2935_v49 = vsel %vm86_vm0, %v6185_v60, 0.0  ;;  %v2647_v4 = vpop.f32.mrb[65].mxu0 }
 0x64f   :  { %v2936_v40 = vadd.f32 %v2935_v49, %v2934_v36  ;;  %v2921_v9 = vsel %vm86_vm0, %v2647_v4, 0.0  ;;  %v6186_v15 = vpop.f32.mrb[66].mxu0 }
 0x650   :  { %v2922_v2 = vadd.f32 %v2921_v9, %v2920_v12  ;;  %v2942_v22 = vsel %vm86_vm0, %v6186_v15, 0.0  ;;  %v2650_v53 = vpop.f32.mrb[67].mxu0 }
 0x651   :  { %v2943_v56 = vadd.f32 %v2942_v22, %v2941_v61  ;;  %v2928_v20 = vsel %vm86_vm0, %v2650_v53, 0.0 }
 0x652   :  { %v2929_v1 = vadd.f32 %v2928_v20, %v2927_v23 }
 0x65d   :  { %v6173_v10 = vpop.f32.mrb[52].mxu1 }
 0x65e   :  { %v2570_v46 = vpop.f32.mrb[53].mxu1  ;;  %v2962_v62 = vsel %vm86_vm0, %v6173_v10, 0.0 }
 0x65f   :  { %v6174_v33 = vpop.f32.mrb[54].mxu1  ;;  %v6189_v28 = vpop.f32.mrb[68].mxu0  ;;  %v2948_v27 = vsel %vm86_vm0, %v2570_v46, 0.0 }
 0x660   :  { %v2963_v13 = vsel %vm86_vm0, %v6189_v28, 0.0  ;;  %v2573_v42 = vpop.f32.mrb[55].mxu1  ;;  %v2663_v38 = vpop.f32.mrb[69].mxu0  ;;  %v2969_v31 = vsel %vm86_vm0, %v6174_v33, 0.0 }
 0x661   :  { %v2964_v57 = vadd.f32 %v2963_v13, %v2962_v62  ;;  %v2949_v59 = vsel %vm86_vm0, %v2663_v38, 0.0  ;;  %v6190_v11 = vpop.f32.mrb[70].mxu0  ;;  %v2955_v24 = vsel %vm86_vm0, %v2573_v42, 0.0 }
 0x662   :  { %v2950_v45 = vadd.f32 %v2949_v59, %v2948_v27  ;;  %v2970_v52 = vsel %vm86_vm0, %v6190_v11, 0.0  ;;  %v2666_v50 = vpop.f32.mrb[71].mxu0  ;;  %v8618_v27 = vld [vmem:[%s9716_s6] ss:$0 sm:$0xff] }
 0x663   :  { %v2971_v32 = vadd.f32 %v2970_v52, %v2969_v31  ;;  %v2956_v18 = vsel %vm86_vm0, %v2666_v50, 0.0  ;;  %v6948_v50 = vld [vmem:[%s9811_s23] sm:$0xff] }
 0x664   :  { %v2957_v0 = vadd.f32 %v2956_v18, %v2955_v24  ;;  %v6949_v18 = vld [vmem:[%s9811_s23 + $0x10] sm:$0xff] }
 0x679   :  { %v6217_v51 = vpop.f32.mrb[72].mxu0 }
 0x67a   :  { %v6201_v39 = vpop.f32.mrb[56].mxu1  ;;  %v2833_v34 = vpop.f32.mrb[73].mxu0  ;;  %v2939_v44 = vsel %vm86_vm0, %v6217_v51, 0.0 }
 0x67b   :  { %v2937_v30 = vsel %vm86_vm0, %v6201_v39, 0.0  ;;  %v2740_v55 = vpop.f32.mrb[57].mxu1  ;;  %v6218_v25 = vpop.f32.mrb[74].mxu0  ;;  %v2925_v26 = vsel %vm86_vm0, %v2833_v34, 0.0  ;;  %v6950_v39 = vld [vmem:[%s9811_s23 + $0x8] sm:$0xff] }
 0x67c   :  { %v2938_v14 = vadd.f32 %v2937_v30, %v2936_v40  ;;  %v2923_v37 = vsel %vm86_vm0, %v2740_v55, 0.0  ;;  %v6202_v35 = vpop.f32.mrb[58].mxu1  ;;  %v2836_v47 = vpop.f32.mrb[75].mxu0  ;;  %v2946_v17 = vsel %vm86_vm0, %v6218_v25, 0.0  ;;  %v6951_v25 = vld [vmem:[%s9811_s23 + $0x18] sm:$0xff] }
 0x67d   :  { %v2924_v3 = vadd.f32 %v2923_v37, %v2922_v2  ;;  %v2944_v29 = vsel %vm86_vm0, %v6202_v35, 0.0  ;;  %v2743_v54 = vpop.f32.mrb[59].mxu1  ;;  %v2932_v8 = vsel %vm86_vm0, %v2836_v47, 0.0 }
 0x67e   :  { %v2940_v7 = vadd.f32 %v2939_v44, %v2938_v14  ;;  %v2945_v41 = vadd.f32 %v2944_v29, %v2943_v56  ;;  %v2930_v19 = vsel %vm86_vm0, %v2743_v54, 0.0 }
 0x67f   :  { %v2926_v63 = vadd.f32 %v2925_v26, %v2924_v3  ;;  %v2931_v43 = vadd.f32 %v2930_v19, %v2929_v1  ;;  %v6952_v26 = vld [vmem:[%s9811_s23 + $0x20] sm:$0xff] }
 0x680   :  { %v2947_v6 = vadd.f32 %v2946_v17, %v2945_v41  ;;  %v6953_v17 = vld [vmem:[%s9811_s23 + $0x30] sm:$0xff] }
 0x681   :  { %v2933_v16 = vadd.f32 %v2932_v8, %v2931_v43 }
 0x682   :  { %v2981_v21 = vpack.c.bf16 %v2947_v6, %v2940_v7  ;;  %v6205_v5 = vpop.f32.mrb[60].mxu1  ;;  %v6221_v48 = vpop.f32.mrb[76].mxu0  ;;  %v6954_v6 = vld [vmem:[%s9811_s23 + $0x28] sm:$0xff] }
 0x683   :  { %v2980_v58 = vpack.c.bf16 %v2933_v16, %v2926_v63  ;;  %v2965_v60 = vsel %vm86_vm0, %v6205_v5, 0.0  ;;  %v2756_v36 = vpop.f32.mrb[61].mxu1  ;;  %v2849_v49 = vpop.f32.mrb[77].mxu0  ;;  %v2967_v15 = vsel %vm86_vm0, %v6221_v48, 0.0 }
 0x684   :  { %v2966_v4 = vadd.f32 %v2965_v60, %v2964_v57  ;;  %v2951_v12 = vsel %vm86_vm0, %v2756_v36, 0.0  ;;  %v6206_v40 = vpop.f32.mrb[62].mxu1  ;;  %v6222_v9 = vpop.f32.mrb[78].mxu0  ;;  %v2953_v56 = vsel %vm86_vm0, %v2849_v49, 0.0 }
 0x685   :  { %v2952_v61 = vadd.f32 %v2951_v12, %v2950_v45  ;;  %v2972_v2 = vsel %vm86_vm0, %v6206_v40, 0.0  ;;  %v2759_v22 = vpop.f32.mrb[63].mxu1  ;;  %v2852_v53 = vpop.f32.mrb[79].mxu0  ;;  %6235 = vmatprep.mubr.msk.bf16.mxu1 %vm86_vm0, %v2980_v58  ;;  %v2974_v46 = vsel %vm86_vm0, %v6222_v9, 0.0 }
 0x686   :  { %v2968_v23 = vadd.f32 %v2967_v15, %v2966_v4  ;;  %v2973_v20 = vadd.f32 %v2972_v2, %v2971_v32  ;;  %v2958_v1 = vsel %vm86_vm0, %v2759_v22, 0.0  ;;  %6236 = vmatmul.mubr.msk.bf16.gmra.mrb[72].mxu1 %vm86_vm0, %v2981_v21  ;;  %v2960_v62 = vsel %vm86_vm0, %v2852_v53, 0.0  ;;  %v6955_v21 = vld [vmem:[%s9811_s23 + $0x38] sm:$0xff]  ;;  %v6956_v15 = vld [vmem:[%s9811_s23 + $0x40] sm:$0xff]  ;;  %v6957_v53 = vld [vmem:[%s9811_s23 + $0x50] sm:$0xff] }
 0x687   :  { %v2954_v10 = vadd.f32 %v2953_v56, %v2952_v61  ;;  %v2959_v33 = vadd.f32 %v2958_v1, %v2957_v0  ;;  %v6958_v56 = vld [vmem:[%s9811_s23 + $0x48] sm:$0xff] }
 0x688   :  { %v2975_v28 = vadd.f32 %v2974_v46, %v2973_v20 }
 0x689   :  { %v2961_v13 = vadd.f32 %v2960_v62, %v2959_v33 }
 0x68a   :  { %v2983_v42 = vpack.c.bf16 %v2975_v28, %v2968_v23 }
 0x68b   :  { %v2982_v38 = vpack.c.bf16 %v2961_v13, %v2954_v10  ;;  %v6959_v10 = vld [vmem:[%s9811_s23 + $0x58] sm:$0xff] }
 0x68d   :  { %6239 = vmatprep.mubr.msk.bf16.mxu1 %vm86_vm0, %v2982_v38 }
 0x68e   :  { %6240 = vmatmul.mubr.msk.bf16.gmra.mrb[76].mxu1 %vm86_vm0, %v2983_v42 }
 0x6ee   :  { %v6229_v57 = vpop.f32.mrb[64].mxu1 }
 0x6ef   :  { %v3065_v59 = vpop.f32.mrb[65].mxu1  ;;  %v3074_v11 = vadd.f32 %v6229_v57, %v8618_v27 }
 0x6f0   :  { %v3066_v31 = vadd.f32 %v8618_v27, %v3065_v59  ;;  %v6230_v45 = vpop.f32.mrb[66].mxu1 }
 0x6f1   :  { %v3068_v52 = vpop.f32.mrb[67].mxu1  ;;  %v8631_v0 = vadd.f32 %v6949_v18, %v3074_v11  ;;  %v3077_v51 = vadd.f32 %v6230_v45, %v8618_v27  ;;  %v6960_v11 = vld [vmem:[%s9811_s23 + $0x60] sm:$0xff] }
 0x6f2   :  { %v8625_v24 = vadd.f32 %v6948_v50, %v3066_v31  ;;  %v3069_v32 = vadd.f32 %v8618_v27, %v3068_v52 }
 0x6f3   :  { %9937 = vst [vmem:[#allocation14_spill] sm:$0xff] %v8631_v0  ;;  %v8646_v14 = vadd.f32 %v6951_v25, %v3077_v51  ;;  %v3152_v37 = vsel %vm86_vm0, %v8631_v0, 0.0  ;;  %v6962_v51 = vld [vmem:[%s9811_s23 + $0x68] sm:$0xff] }
 0x6f4   :  { %9936 = vst [vmem:[#allocation10_spill] sm:$0xff] %v8625_v24  ;;  %v8637_v34 = vadd.f32 %v6950_v39, %v3069_v32  ;;  %v3146_v30 = vsel %vm86_vm0, %v8625_v24, 0.0  ;;  %v6961_v32 = vld [vmem:[%s9811_s23 + $0x70] sm:$0xff] }
 0x6f5   :  { %3147 = vadd.xlane.f32.xlu0 %v3146_v30  ;;  %9939 = vst [vmem:[#allocation11_spill] sm:$0xff] %v8646_v14  ;;  %v3155_v35 = vsel %vm86_vm0, %v8646_v14, 0.0 }
 0x6f6   :  { %9938 = vst [vmem:[#allocation13_spill] sm:$0xff] %v8637_v34  ;;  %v3149_v55 = vsel %vm86_vm0, %v8637_v34, 0.0 }
 0x6f7   :  { %3150 = vadd.xlane.f32.xlu1 %v3149_v55 }
 0x6f9   :  { %3153 = vadd.xlane.f32.xlu0 %v3152_v37 }
 0x6fd   :  { %3156 = vadd.xlane.f32.xlu0 %v3155_v35 }
 0x704   :  { %v6233_v47 = vpop.f32.mrb[68].mxu1 }
 0x705   :  { %v3081_v44 = vpop.f32.mrb[69].mxu1  ;;  %v3090_v3 = vadd.f32 %v6233_v47, %v8618_v27 }
 0x706   :  { %v3082_v29 = vadd.f32 %v8618_v27, %v3081_v44  ;;  %v6234_v54 = vpop.f32.mrb[70].mxu1 }
 0x707   :  { %v3084_v7 = vpop.f32.mrb[71].mxu1  ;;  %v3093_v19 = vadd.f32 %v6234_v54, %v8618_v27  ;;  %v8664_v43 = vadd.f32 %v6953_v17, %v3090_v3 }
 0x708   :  { %v8657_v41 = vadd.f32 %v6952_v26, %v3082_v29  ;;  %v3085_v63 = vadd.f32 %v8618_v27, %v3084_v7 }
 0x709   :  { %9941 = vst [vmem:[#allocation7_spill] sm:$0xff] %v8664_v43  ;;  %v8676_v5 = vadd.f32 %v6955_v21, %v3093_v19  ;;  %v3164_v58 = vsel %vm86_vm0, %v8664_v43, 0.0 }
 0x70a   :  { %9940 = vst [vmem:[#allocation12_spill] sm:$0xff] %v8657_v41  ;;  %v8669_v8 = vadd.f32 %v6954_v6, %v3085_v63  ;;  %v3158_v16 = vsel %vm86_vm0, %v8657_v41, 0.0 }
 0x70b   :  { %3159 = vadd.xlane.f32.xlu0 %v3158_v16  ;;  %9943 = vst [vmem:[#allocation15_spill] sm:$0xff] %v8676_v5  ;;  %v3167_v60 = vsel %vm86_vm0, %v8676_v5, 0.0 }
 0x70c   :  { %9942 = vst [vmem:[#allocation9_spill] sm:$0xff] %v8669_v8  ;;  %v3161_v48 = vsel %vm86_vm0, %v8669_v8, 0.0 }
 0x70d   :  { %3162 = vadd.xlane.f32.xlu1 %v3161_v48 }
 0x70f   :  { %3165 = vadd.xlane.f32.xlu0 %v3164_v58 }
 0x711   :  { %3168 = vadd.xlane.f32.xlu1 %v3167_v60 }
 0x759   :  { %v6237_v36 = vpop.f32.mrb[72].mxu1 }
 0x75a   :  { %v3097_v49 = vpop.f32.mrb[73].mxu1  ;;  %v3106_v4 = vadd.f32 %v6237_v36, %v8618_v27 }
 0x75b   :  { %v3098_v12 = vadd.f32 %v8618_v27, %v3097_v49  ;;  %v6238_v40 = vpop.f32.mrb[74].mxu1 }
 0x75c   :  { %v3100_v9 = vpop.f32.mrb[75].mxu1  ;;  %v3109_v2 = vadd.f32 %v6238_v40, %v8618_v27  ;;  %v8696_v23 = vadd.f32 %v6957_v53, %v3106_v4 }
 0x75d   :  { %v8689_v61 = vadd.f32 %v6956_v15, %v3098_v12  ;;  %v3101_v22 = vadd.f32 %v8618_v27, %v3100_v9 }
 0x75e   :  { %9945 = vst [vmem:[#allocation8_spill] sm:$0xff] %v8696_v23  ;;  %v8708_v46 = vadd.f32 %v6959_v10, %v3109_v2  ;;  %v3176_v57 = vsel %vm86_vm0, %v8696_v23, 0.0 }
 0x75f   :  { %9944 = vst [vmem:[#allocation16_spill] sm:$0xff] %v8689_v61  ;;  %v8701_v20 = vadd.f32 %v6958_v56, %v3101_v22  ;;  %v3170_v1 = vsel %vm86_vm0, %v8689_v61, 0.0 }
 0x760   :  { %3171 = vadd.xlane.f32.xlu0 %v3170_v1  ;;  %9947 = vst [vmem:[#allocation17_spill] sm:$0xff] %v8708_v46  ;;  %v3179_v50 = vsel %vm86_vm0, %v8708_v46, 0.0 }
 0x761   :  { %9946 = vst [vmem:[#allocation18_spill] sm:$0xff] %v8701_v20  ;;  %v6241_v33 = vpop.f32.mrb[76].mxu1  ;;  %v3173_v28 = vsel %vm86_vm0, %v8701_v20, 0.0 }
 0x762   :  { %3174 = vadd.xlane.f32.xlu1 %v3173_v28  ;;  %v3113_v62 = vpop.f32.mrb[77].mxu1  ;;  %v3122_v13 = vadd.f32 %v6241_v33, %v8618_v27 }
 0x763   :  { %v3114_v42 = vadd.f32 %v8618_v27, %v3113_v62  ;;  %v6242_v38 = vpop.f32.mrb[78].mxu1 }
 0x764   :  { %3177 = vadd.xlane.f32.xlu0 %v3176_v57  ;;  %v3116_v59 = vpop.f32.mrb[79].mxu1  ;;  %v3125_v45 = vadd.f32 %v6242_v38, %v8618_v27  ;;  %v8728_v18 = vadd.f32 %v6961_v32, %v3122_v13  ;;  %v6514_v32 = vld [vmem:[%s9719_s9 + $0x8] sm:$0xff]  }
 0x765   :  { %v8719_v31 = vadd.f32 %v6960_v11, %v3114_v42  ;;  %v3117_v52 = vadd.f32 %v8618_v27, %v3116_v59  ;;  %v6963_v27 = vld [vmem:[%s9811_s23 + $0x78] sm:$0xff] }
 0x766   :  { %3180 = vadd.xlane.f32.xlu1 %v3179_v50  ;;  %9949 = vst [vmem:[#allocation21_spill] sm:$0xff] %v8728_v18  ;;  %v8740_v55 = vadd.f32 %v6963_v27, %v3125_v45  ;;  %v3188_v37 = vsel %vm86_vm0, %v8728_v18, 0.0  ;;  %v6513_v50 = vld [vmem:[%s9719_s9] sm:$0xff]  }
 0x767   :  { %9948 = vst [vmem:[#allocation19_spill] sm:$0xff] %v8719_v31  ;;  %v8733_v39 = vadd.f32 %v6962_v51, %v3117_v52  ;;  %v3182_v30 = vsel %vm86_vm0, %v8719_v31, 0.0  ;;  %6243 = vmatprep.subr.bf16.mxu0 %v6513_v50 }
 0x768   :  { %3183 = vadd.xlane.f32.xlu0 %v3182_v30  ;;  %9951 = vst [vmem:[#allocation26_spill] sm:$0xff] %v8740_v55  ;;  %v3191_v35 = vsel %vm86_vm0, %v8740_v55, 0.0  ;;  %6244 = vmatpush3.bf16.msra.mxu0 %v6513_v50 }
 0x769   :  { %9950 = vst [vmem:[#allocation20_spill] sm:$0xff] %v8733_v39  ;;  %v3185_v25 = vsel %vm86_vm0, %v8733_v39, 0.0  ;;  %6245 = vmatprep.subr.bf16.mxu0 %v6514_v32 }
 0x76a   :  { %3186 = vadd.xlane.f32.xlu1 %v3185_v25 }
 0x76c   :  { %3189 = vadd.xlane.f32.xlu0 %v3188_v37  ;;  %6246 = vmatpush3.bf16.msra.mxu0 %v6514_v32 }
 0x76e   :  { %3192 = vadd.xlane.f32.xlu1 %v3191_v35 }
 0x782   :  { %v3148_v47 = vpop.xlane.xlu0 %3147 }
 0x783   :  { %v3194_v44 = vmul.f32 0.03125, %v3148_v47 }
 0x784   :  { %v3151_v3 = vpop.xlane.xlu1 %3150 }
 0x785   :  { %v8749_v29 = vsub.f32 %v8625_v24, %v3194_v44  ;;  %v3195_v54 = vmul.f32 0.03125, %v3151_v3 }
 0x786   :  { %v3154_v7 = vpop.xlane.xlu0 %3153 }
 0x787   :  { %v8752_v26 = vsub.f32 %v8637_v34, %v3195_v54  ;;  %v3196_v19 = vmul.f32 0.03125, %v3154_v7  ;;  %v3226_v63 = vmul.f32 %v8749_v29, %v8749_v29 }
 0x789   :  { %v8757_v17 = vsub.f32 %v8631_v0, %v3196_v19  ;;  %v3242_v6 = vsel %vm86_vm0, %v3226_v63, 0.0  ;;  %v3227_v16 = vmul.f32 %v8752_v26, %v8752_v26 }
 0x78a   :  { %v3157_v21 = vpop.xlane.xlu0 %3156  ;;  %3243 = vadd.xlane.f32.xlu0 %v3242_v6 }
 0x78b   :  { %v3197_v48 = vmul.f32 0.03125, %v3157_v21  ;;  %v3245_v58 = vsel %vm86_vm0, %v3227_v16, 0.0  ;;  %v3228_v60 = vmul.f32 %v8757_v17, %v8757_v17 }
 0x78c   :  { %3246 = vadd.xlane.f32.xlu1 %v3245_v58 }
 0x78d   :  { %v8766_v36 = vsub.f32 %v8646_v14, %v3197_v48  ;;  %v3248_v49 = vsel %vm86_vm0, %v3228_v60, 0.0 }
 0x78e   :  { %3249 = vadd.xlane.f32.xlu0 %v3248_v49 }
 0x78f   :  { %v3229_v4 = vmul.f32 %v8766_v36, %v8766_v36 }
 0x791   :  { %v3251_v12 = vsel %vm86_vm0, %v3229_v4, 0.0 }
 0x792   :  { %3252 = vadd.xlane.f32.xlu1 %v3251_v12 }
 0x798   :  { %v3160_v40 = vpop.xlane.xlu0 %3159 }
 0x799   :  { %v3198_v9 = vmul.f32 0.03125, %v3160_v40 }
 0x79a   :  { %v3163_v15 = vpop.xlane.xlu1 %3162 }
 0x79b   :  { %v8773_v2 = vsub.f32 %v8657_v41, %v3198_v9  ;;  %v3199_v22 = vmul.f32 0.03125, %v3163_v15 }
 0x79c   :  { %v3166_v53 = vpop.xlane.xlu0 %3165 }
 0x79d   :  { %v8776_v56 = vsub.f32 %v8669_v8, %v3199_v22  ;;  %v3200_v1 = vmul.f32 0.03125, %v3166_v53  ;;  %v3230_v10 = vmul.f32 %v8773_v2, %v8773_v2 }
 0x79e   :  { %v3169_v33 = vpop.xlane.xlu1 %3168 }
 0x79f   :  { %v8781_v28 = vsub.f32 %v8664_v43, %v3200_v1  ;;  %v3201_v62 = vmul.f32 0.03125, %v3169_v33  ;;  %v3254_v13 = vsel %vm86_vm0, %v3230_v10, 0.0  ;;  %v3231_v42 = vmul.f32 %v8776_v56, %v8776_v56 }
 0x7a0   :  { %3255 = vadd.xlane.f32.xlu0 %v3254_v13 }
 0x7a1   :  { %v8787_v38 = vsub.f32 %v8676_v5, %v3201_v62  ;;  %v3257_v57 = vsel %vm86_vm0, %v3231_v42, 0.0  ;;  %v3232_v59 = vmul.f32 %v8781_v28, %v8781_v28 }
 0x7a2   :  { %3258 = vadd.xlane.f32.xlu1 %v3257_v57 }
 0x7a3   :  { %v3260_v11 = vsel %vm86_vm0, %v3232_v59, 0.0  ;;  %v3233_v45 = vmul.f32 %v8787_v38, %v8787_v38 }
 0x7a4   :  { %3261 = vadd.xlane.f32.xlu0 %v3260_v11 }
 0x7a5   :  { %v3263_v52 = vsel %vm86_vm0, %v3233_v45, 0.0 }
 0x7a6   :  { %3264 = vadd.xlane.f32.xlu1 %v3263_v52 }
 0x7ed   :  { %v3172_v51 = vpop.xlane.xlu0 %3171 }
 0x7ee   :  { %v3202_v30 = vmul.f32 0.03125, %v3172_v51 }
 0x7ef   :  { %v3175_v27 = vpop.xlane.xlu1 %3174 }
 0x7f0   :  { %v8803_v25 = vsub.f32 %v8689_v61, %v3202_v30  ;;  %v3203_v37 = vmul.f32 0.03125, %v3175_v27 }
 0x7f1   :  { %v3178_v35 = vpop.xlane.xlu0 %3177 }
 0x7f2   :  { %v8806_v47 = vsub.f32 %v8701_v20, %v3203_v37  ;;  %v3204_v44 = vmul.f32 0.03125, %v3178_v35  ;;  %v3234_v3 = vmul.f32 %v8803_v25, %v8803_v25 }
 0x7f3   :  { %v3181_v54 = vpop.xlane.xlu1 %3180 }
 0x7f4   :  { %v8811_v7 = vsub.f32 %v8696_v23, %v3204_v44  ;;  %v3205_v19 = vmul.f32 0.03125, %v3181_v54  ;;  %v3266_v63 = vsel %vm86_vm0, %v3234_v3, 0.0  ;;  %v3235_v6 = vmul.f32 %v8806_v47, %v8806_v47 }
 0x7f5   :  { %3267 = vadd.xlane.f32.xlu0 %v3266_v63  ;;  %v3184_v16 = vpop.xlane.xlu0 %3183 }
 0x7f6   :  { %v8817_v21 = vsub.f32 %v8708_v46, %v3205_v19  ;;  %v3206_v48 = vmul.f32 0.03125, %v3184_v16  ;;  %v3269_v58 = vsel %vm86_vm0, %v3235_v6, 0.0  ;;  %v3236_v60 = vmul.f32 %v8811_v7, %v8811_v7 }
 0x7f7   :  { %3270 = vadd.xlane.f32.xlu1 %v3269_v58  ;;  %v3187_v49 = vpop.xlane.xlu1 %3186  ;;  %v8853_v58 = vld [vmem:[%s9717_s7] ss:$0 sm:$0xff] }
 0x7f8   :  { %v8823_v4 = vsub.f32 %v8719_v31, %v3206_v48  ;;  %v3207_v12 = vmul.f32 0.03125, %v3187_v49  ;;  %v3272_v40 = vsel %vm86_vm0, %v3236_v60, 0.0  ;;  %v3237_v9 = vmul.f32 %v8817_v21, %v8817_v21 }
 0x7f9   :  { %3273 = vadd.xlane.f32.xlu0 %v3272_v40  ;;  %v3190_v15 = vpop.xlane.xlu0 %3189 }
 0x7fa   :  { %v8829_v22 = vsub.f32 %v8733_v39, %v3207_v12  ;;  %v3208_v53 = vmul.f32 0.03125, %v3190_v15  ;;  %v3275_v1 = vsel %vm86_vm0, %v3237_v9, 0.0  ;;  %v3238_v10 = vmul.f32 %v8823_v4, %v8823_v4  ;;  %v8861_v15 = vld [vmem:[%s9718_s8] ss:$0 sm:$0xff] }
 0x7fb   :  { %3276 = vadd.xlane.f32.xlu1 %v3275_v1  ;;  %v3193_v33 = vpop.xlane.xlu1 %3192 }
 0x7fc   :  { %v8835_v62 = vsub.f32 %v8728_v18, %v3208_v53  ;;  %v3209_v13 = vmul.f32 0.03125, %v3193_v33  ;;  %v3278_v42 = vsel %vm86_vm0, %v3238_v10, 0.0  ;;  %v3239_v57 = vmul.f32 %v8829_v22, %v8829_v22 }
 0x7fd   :  { %3279 = vadd.xlane.f32.xlu0 %v3278_v42 }
 0x7fe   :  { %v8841_v59 = vsub.f32 %v8740_v55, %v3209_v13  ;;  %v3281_v11 = vsel %vm86_vm0, %v3239_v57, 0.0  ;;  %v3240_v45 = vmul.f32 %v8835_v62, %v8835_v62 }
 0x7ff   :  { %3282 = vadd.xlane.f32.xlu1 %v3281_v11 }
 0x800   :  { %v3284_v52 = vsel %vm86_vm0, %v3240_v45, 0.0  ;;  %v3241_v50 = vmul.f32 %v8841_v59, %v8841_v59 }
 0x801   :  { %3285 = vadd.xlane.f32.xlu0 %v3284_v52 }
 0x802   :  { %v3287_v32 = vsel %vm86_vm0, %v3241_v50, 0.0 }
 0x803   :  { %3288 = vadd.xlane.f32.xlu1 %v3287_v32 }
 0x817   :  { %v3244_v51 = vpop.xlane.xlu0 %3243 }
 0x818   :  { %v3290_v30 = vmul.f32 0.03125, %v3244_v51 }
 0x819   :  { %v3247_v27 = vpop.xlane.xlu1 %3246 }
 0x81a   :  { %v3306_v37 = vadd.f32 1e-05, %v3290_v30  ;;  %v3291_v35 = vmul.f32 0.03125, %v3247_v27 }
 0x81b   :  { %v3250_v44 = vpop.xlane.xlu0 %3249 }
 0x81c   :  { %6884 = vrsqrt.f32 %v3306_v37  ;;  %v3307_v3 = vadd.f32 1e-05, %v3291_v35  ;;  %v3292_v54 = vmul.f32 0.03125, %v3250_v44 }
 0x81e   :  { %6886 = vrsqrt.f32 %v3307_v3  ;;  %v3308_v19 = vadd.f32 1e-05, %v3292_v54 }
 0x81f   :  { %v3253_v63 = vpop.xlane.xlu1 %3252 }
 0x820   :  { %6888 = vrsqrt.f32 %v3308_v19  ;;  %v3293_v6 = vmul.f32 0.03125, %v3253_v63 }
 0x822   :  { %v3309_v16 = vadd.f32 1e-05, %v3293_v6 }
 0x824   :  { %6890 = vrsqrt.f32 %v3309_v16 }
 0x826   :  { %v6885_v48 = vpop.eup %6884 }
 0x827   :  { %v3338_v60 = vmul.f32 %v6885_v48, %v8749_v29 }
 0x828   :  { %v6887_v49 = vpop.eup %6886 }
 0x829   :  { %v3339_v12 = vmul.f32 %v6887_v49, %v8752_v26  ;;  %v3360_v40 = vmul.f32 %v8853_v58, %v3338_v60 }
 0x82a   :  { %v6889_v9 = vpop.eup %6888 }
 0x82b   :  { %v3340_v53 = vmul.f32 %v6889_v9, %v8757_v17  ;;  %v3361_v1 = vmul.f32 %v8853_v58, %v3339_v12  ;;  %v3382_v33 = vadd.f32 %v8861_v15, %v3360_v40 }
 0x82d   :  { %v3256_v10 = vpop.xlane.xlu0 %3255  ;;  %v3383_v29 = vadd.f32 %v8861_v15, %v3361_v1  ;;  %v3362_v26 = vmul.f32 %v8853_v58, %v3340_v53 }
 0x82e   :  { %v6891_v13 = vpop.eup %6890  ;;  %v3294_v42 = vmul.f32 0.03125, %v3256_v10 }
 0x82f   :  { %v3341_v57 = vmul.f32 %v6891_v13, %v8766_v36  ;;  %v3259_v11 = vpop.xlane.xlu1 %3258  ;;  %v3398_v45 = vpack.c.bf16 %v3383_v29, %v3382_v33  ;;  %v3384_v27 = vadd.f32 %v8861_v15, %v3362_v26 }
 0x830   :  { %v3310_v52 = vadd.f32 1e-05, %v3294_v42  ;;  %v3295_v50 = vmul.f32 0.03125, %v3259_v11 }
 0x831   :  { %v3363_v32 = vmul.f32 %v8853_v58, %v3341_v57  ;;  %6247 = vmatprep.mubr.msk.bf16.mxu0 %vm86_vm0, %v3398_v45  ;;  %v3262_v17 = vpop.xlane.xlu0 %3261 }
 0x832   :  { %6892 = vrsqrt.f32 %v3310_v52  ;;  %v3311_v51 = vadd.f32 1e-05, %v3295_v50  ;;  %v3296_v30 = vmul.f32 0.03125, %v3262_v17 }
 0x833   :  { %v3385_v37 = vadd.f32 %v8861_v15, %v3363_v32  ;;  %v3265_v35 = vpop.xlane.xlu1 %3264 }
 0x834   :  { %6894 = vrsqrt.f32 %v3311_v51  ;;  %v3312_v44 = vadd.f32 1e-05, %v3296_v30  ;;  %v3297_v36 = vmul.f32 0.03125, %v3265_v35 }
 0x835   :  { %v3399_v3 = vpack.c.bf16 %v3385_v37, %v3384_v27 }
 0x836   :  { %6896 = vrsqrt.f32 %v3312_v44  ;;  %v3313_v54 = vadd.f32 1e-05, %v3297_v36 }
 0x837   :  { %6248 = vmatmul.mubr.msk.bf16.vlgmr.msra.gmra.mrb[80].mxu0 %vm86_vm0, %v3399_v3 }
 0x838   :  { %6898 = vrsqrt.f32 %v3313_v54 }
 0x83c   :  { %v6893_v19 = vpop.eup %6892 }
 0x83d   :  { %v3342_v63 = vmul.f32 %v6893_v19, %v8773_v2 }
 0x83e   :  { %v6895_v6 = vpop.eup %6894 }
 0x83f   :  { %v3343_v16 = vmul.f32 %v6895_v6, %v8776_v56  ;;  %v3364_v48 = vmul.f32 %v8853_v58, %v3342_v63 }
 0x840   :  { %v6897_v60 = vpop.eup %6896 }
 0x841   :  { %v3344_v49 = vmul.f32 %v6897_v60, %v8781_v28  ;;  %v3365_v12 = vmul.f32 %v8853_v58, %v3343_v16  ;;  %v3386_v53 = vadd.f32 %v8861_v15, %v3364_v48 }
 0x842   :  { %v6899_v40 = vpop.eup %6898 }
 0x843   :  { %v3345_v9 = vmul.f32 %v6899_v40, %v8787_v38  ;;  %v3387_v1 = vadd.f32 %v8861_v15, %v3365_v12  ;;  %v3366_v10 = vmul.f32 %v8853_v58, %v3344_v49 }
 0x845   :  { %v3400_v2 = vpack.c.bf16 %v3387_v1, %v3386_v53  ;;  %v3367_v33 = vmul.f32 %v8853_v58, %v3345_v9  ;;  %v3388_v56 = vadd.f32 %v8861_v15, %v3366_v10 }
 0x847   :  { %6251 = vmatprep.mubr.msk.bf16.mxu0 %vm86_vm0, %v3400_v2  ;;  %v3389_v28 = vadd.f32 %v8861_v15, %v3367_v33 }
 0x849   :  { %v3401_v29 = vpack.c.bf16 %v3389_v28, %v3388_v56 }
 0x84b   :  { %6252 = vmatmul.mubr.msk.bf16.gmra.mrb[84].mxu0 %vm86_vm0, %v3401_v29 }
 0x882   :  { %v3268_v13 = vpop.xlane.xlu0 %3267 }
 0x883   :  { %v3298_v38 = vmul.f32 0.03125, %v3268_v13 }
 0x884   :  { %v3271_v42 = vpop.xlane.xlu1 %3270 }
 0x885   :  { %v3314_v26 = vadd.f32 1e-05, %v3298_v38  ;;  %v3299_v57 = vmul.f32 0.03125, %v3271_v42 }
 0x886   :  { %v3274_v11 = vpop.xlane.xlu0 %3273 }
 0x887   :  { %6900 = vrsqrt.f32 %v3314_v26  ;;  %v3315_v45 = vadd.f32 1e-05, %v3299_v57  ;;  %v3300_v52 = vmul.f32 0.03125, %v3274_v11 }
 0x888   :  { %v3277_v50 = vpop.xlane.xlu1 %3276 }
 0x889   :  { %6902 = vrsqrt.f32 %v3315_v45  ;;  %v3316_v32 = vadd.f32 1e-05, %v3300_v52  ;;  %v3301_v17 = vmul.f32 0.03125, %v3277_v50 }
 0x88a   :  { %v3280_v51 = vpop.xlane.xlu0 %3279 }
 0x88b   :  { %6904 = vrsqrt.f32 %v3316_v32  ;;  %v3317_v30 = vadd.f32 1e-05, %v3301_v17  ;;  %v3302_v27 = vmul.f32 0.03125, %v3280_v51 }
 0x88c   :  { %v3283_v37 = vpop.xlane.xlu1 %3282 }
 0x88d   :  { %6906 = vrsqrt.f32 %v3317_v30  ;;  %v3318_v35 = vadd.f32 1e-05, %v3302_v27  ;;  %v3303_v44 = vmul.f32 0.03125, %v3283_v37 }
 0x88e   :  { %v3286_v36 = vpop.xlane.xlu0 %3285 }
 0x88f   :  { %6908 = vrsqrt.f32 %v3318_v35  ;;  %v3319_v3 = vadd.f32 1e-05, %v3303_v44  ;;  %v3304_v54 = vmul.f32 0.03125, %v3286_v36  ;;  %v6516_v35 = vld [vmem:[#allocation2 + $0xf0] sm:$0xff]   ;;  %v5599_v36 = vld [vmem:[%s9720_s10] ss:$0 sm:$0xff] }
 0x890   :  { %v3289_v19 = vpop.xlane.xlu1 %3288  ;;  %6339 = vmatprep.mubr.bf16.mxu1 %v6516_v35  ;;  %v6523_v35 = vld [vmem:[#allocation2 + $0x20] sm:$0xff]  }
 0x891   :  { %v6901_v63 = vpop.eup %6900  ;;  %6910 = vrsqrt.f32 %v3319_v3  ;;  %v3320_v6 = vadd.f32 1e-05, %v3304_v54  ;;  %v3305_v16 = vmul.f32 0.03125, %v3289_v19 }
 0x892   :  { %v3346_v48 = vmul.f32 %v6901_v63, %v8803_v25 }
 0x893   :  { %v6903_v60 = vpop.eup %6902  ;;  %6912 = vrsqrt.f32 %v3320_v6  ;;  %v3321_v49 = vadd.f32 1e-05, %v3305_v16 }
 0x894   :  { %v3347_v12 = vmul.f32 %v6903_v60, %v8806_v47  ;;  %v3368_v40 = vmul.f32 %v8853_v58, %v3346_v48 }
 0x895   :  { %v6905_v9 = vpop.eup %6904  ;;  %6914 = vrsqrt.f32 %v3321_v49 }
 0x896   :  { %v3348_v53 = vmul.f32 %v6905_v9, %v8811_v7  ;;  %v3369_v1 = vmul.f32 %v8853_v58, %v3347_v12  ;;  %v3390_v33 = vadd.f32 %v8861_v15, %v3368_v40 }
 0x897   :  { %v6907_v10 = vpop.eup %6906 }
 0x898   :  { %v3349_v2 = vmul.f32 %v6907_v10, %v8817_v21  ;;  %v3391_v25 = vadd.f32 %v8861_v15, %v3369_v1  ;;  %v3370_v56 = vmul.f32 %v8853_v58, %v3348_v53 }
 0x899   :  { %v6909_v28 = vpop.eup %6908 }
 0x89a   :  { %v3350_v47 = vmul.f32 %v6909_v28, %v8823_v4  ;;  %v3402_v29 = vpack.c.bf16 %v3391_v25, %v3390_v33  ;;  %v3371_v13 = vmul.f32 %v8853_v58, %v3349_v2  ;;  %v3392_v42 = vadd.f32 %v8861_v15, %v3370_v56 }
 0x89b   :  { %v6911_v38 = vpop.eup %6910 }
 0x89c   :  { %v3351_v7 = vmul.f32 %v6911_v38, %v8829_v22  ;;  %6255 = vmatprep.mubr.msk.bf16.mxu0 %vm86_vm0, %v3402_v29  ;;  %v3393_v21 = vadd.f32 %v8861_v15, %v3371_v13  ;;  %v3372_v26 = vmul.f32 %v8853_v58, %v3350_v47 }
 0x89d   :  { %v6913_v57 = vpop.eup %6912 }
 0x89e   :  { %v3352_v11 = vmul.f32 %v6913_v57, %v8835_v62  ;;  %v3403_v45 = vpack.c.bf16 %v3393_v21, %v3392_v42  ;;  %v3373_v4 = vmul.f32 %v8853_v58, %v3351_v7  ;;  %v3394_v22 = vadd.f32 %v8861_v15, %v3372_v26 }
 0x89f   :  { %v6915_v52 = vpop.eup %6914 }
 0x8a0   :  { %v3353_v50 = vmul.f32 %v6915_v52, %v8841_v59  ;;  %6256 = vmatmul.mubr.msk.bf16.gmra.mrb[88].mxu0 %vm86_vm0, %v3403_v45  ;;  %v3395_v32 = vadd.f32 %v8861_v15, %v3373_v4  ;;  %v3374_v17 = vmul.f32 %v8853_v58, %v3352_v11  ;;  %v6515_v59 = vld [vmem:[#allocation2] sm:$0xff]  }
 0x8a2   :  { %v3404_v51 = vpack.c.bf16 %v3395_v32, %v3394_v22  ;;  %v3375_v30 = vmul.f32 %v8853_v58, %v3353_v50  ;;  %v3396_v62 = vadd.f32 %v8861_v15, %v3374_v17 }
 0x8a4   :  { %6259 = vmatprep.mubr.msk.bf16.mxu0 %vm86_vm0, %v3404_v51  ;;  %v3397_v27 = vadd.f32 %v8861_v15, %v3375_v30  ;;  %v6517_v51 = vld [vmem:[#allocation2 + $0x8] sm:$0xff]   ;;  %v6518_v30 = vld [vmem:[#allocation2 + $0xf8] sm:$0xff]  }
 0x8a6   :  { %v3405_v37 = vpack.c.bf16 %v3397_v27, %v3396_v62  ;;  %v6519_v62 = vld [vmem:[#allocation2 + $0x10] sm:$0xff]   ;;  %v6520_v27 = vld [vmem:[#allocation2 + $0x100] sm:$0xff]  }
 0x8a8   :  { %6260 = vmatmul.mubr.msk.bf16.gmra.mrb[92].mxu0 %vm86_vm0, %v3405_v37  ;;  %v6521_v37 = vld [vmem:[#allocation2 + $0x18] sm:$0xff]  }
 0x8a9   :  { %6279 = vmatprep.mubr.bf16.mxu0 %v6515_v59  ;;  %v6522_v59 = vld [vmem:[#allocation2 + $0x108] sm:$0xff]  }
 0x90a   :  { %v6249_v44 = vpop.f32.mrb[80].mxu0 }
 0x90b   :  { %v3487_v3 = vpop.f32.mrb[81].mxu0  ;;  %v3496_v54 = vadd.f32 %v6249_v44, %v5599_v36  ;;  %v6524_v44 = vld [vmem:[#allocation2 + $0x110] sm:$0xff]  }
 0x90c   :  { %v6250_v58 = vpop.f32.mrb[82].mxu0  ;;  %v3488_v6 = vadd.f32 %v5599_v36, %v3487_v3  ;;  %v6526_v3 = vld [vmem:[#allocation2 + $0x118] sm:$0xff]  }
 0x90d   :  { %v3499_v19 = vadd.f32 %v6250_v58, %v5599_v36  ;;  %v3490_v63 = vpop.f32.mrb[83].mxu0  ;;  %v6527_v58 = vld [vmem:[#allocation2 + $0x30] sm:$0xff]  }
 0x90e   :  { %v3491_v16 = vadd.f32 %v5599_v36, %v3490_v63  ;;  %v6530_v63 = vld [vmem:[#allocation2 + $0x128] sm:$0xff]  }
 0x90f   :  { %v3695_v15 = vpack.c.bf16 %v3499_v19, %v3496_v54  ;;  %v6528_v54 = vld [vmem:[#allocation2 + $0x120] sm:$0xff]   ;;  %v6529_v19 = vld [vmem:[#allocation2 + $0x38] sm:$0xff]  }
 0x910   :  { %v3694_v48 = vpack.c.bf16 %v3491_v16, %v3488_v6  ;;  %v6531_v6 = vld [vmem:[#allocation2 + $0x40] sm:$0xff]   ;;  %v6532_v16 = vld [vmem:[#allocation2 + $0x130] sm:$0xff]  }
 0x912   :  { %6263 = vmatprep.subr.bf16.mxu0 %v3694_v48  ;;  %6455 = vmatprep.subr.bf16.mxu1 %v3694_v48 }
 0x913   :  { %6264 = vmatpush3.bf16.msra.mxu0 %v3694_v48  ;;  %6463 = vmatpush3.bf16.msra.mxu1 %v3694_v48  ;;  %v6534_v48 = vld [vmem:[#allocation2 + $0x138] sm:$0xff]  }
 0x914   :  { %6265 = vmatprep.subr.bf16.mxu0 %v3695_v15  ;;  %6456 = vmatprep.subr.bf16.mxu1 %v3695_v15 }
 0x917   :  { %6266 = vmatpush3.bf16.msra.mxu0 %v3695_v15  ;;  %6464 = vmatpush3.bf16.msra.mxu1 %v3695_v15  ;;  %v6533_v15 = vld [vmem:[#allocation2 + $0x48] sm:$0xff]  }
 0x91e   :  { %v6253_v60 = vpop.f32.mrb[84].mxu0 }
 0x91f   :  { %v3503_v49 = vpop.f32.mrb[85].mxu0  ;;  %v3512_v40 = vadd.f32 %v6253_v60, %v5599_v36  ;;  %v6535_v60 = vld [vmem:[#allocation2 + $0x50] sm:$0xff]  }
 0x920   :  { %v6254_v12 = vpop.f32.mrb[86].mxu0  ;;  %v3504_v1 = vadd.f32 %v5599_v36, %v3503_v49  ;;  %v6536_v49 = vld [vmem:[#allocation2 + $0x140] sm:$0xff]  }
 0x921   :  { %v3515_v9 = vadd.f32 %v6254_v12, %v5599_v36  ;;  %v3506_v53 = vpop.f32.mrb[87].mxu0  ;;  %v6537_v12 = vld [vmem:[#allocation2 + $0x58] sm:$0xff]  }
 0x922   :  { %v3507_v10 = vadd.f32 %v5599_v36, %v3506_v53  ;;  %v6540_v53 = vld [vmem:[#allocation2 + $0x150] sm:$0xff]  }
 0x923   :  { %v3697_v2 = vpack.c.bf16 %v3515_v9, %v3512_v40  ;;  %v6538_v40 = vld [vmem:[#allocation2 + $0x148] sm:$0xff]   ;;  %v6539_v9 = vld [vmem:[#allocation2 + $0x60] sm:$0xff]  }
 0x924   :  { %v3696_v33 = vpack.c.bf16 %v3507_v10, %v3504_v1  ;;  %v6541_v1 = vld [vmem:[#allocation2 + $0x68] sm:$0xff]   ;;  %v6542_v10 = vld [vmem:[#allocation2 + $0x158] sm:$0xff]  }
 0x926   :  { %6267 = vmatprep.subr.bf16.mxu0 %v3696_v33  ;;  %6457 = vmatprep.subr.bf16.mxu1 %v3696_v33 }
 0x927   :  { %6268 = vmatpush3.bf16.msra.mxu0 %v3696_v33  ;;  %6465 = vmatpush3.bf16.msra.mxu1 %v3696_v33  ;;  %v6544_v33 = vld [vmem:[#allocation2 + $0x160] sm:$0xff]  }
 0x928   :  { %6269 = vmatprep.subr.bf16.mxu0 %v3697_v2  ;;  %6458 = vmatprep.subr.bf16.mxu1 %v3697_v2 }
 0x92b   :  { %6270 = vmatpush3.bf16.msra.mxu0 %v3697_v2  ;;  %6466 = vmatpush3.bf16.msra.mxu1 %v3697_v2  ;;  %v6543_v2 = vld [vmem:[#allocation2 + $0x70] sm:$0xff]  }
 0x973   :  { %v6257_v25 = vpop.f32.mrb[88].mxu0 }
 0x974   :  { %v3519_v56 = vpop.f32.mrb[89].mxu0  ;;  %v3528_v47 = vadd.f32 %v6257_v25, %v5599_v36  ;;  %v6545_v25 = vld [vmem:[#allocation2 + $0x78] sm:$0xff]  }
 0x975   :  { %v6258_v28 = vpop.f32.mrb[90].mxu0  ;;  %v3520_v38 = vadd.f32 %v5599_v36, %v3519_v56  ;;  %v6546_v56 = vld [vmem:[#allocation2 + $0x168] sm:$0xff]  }
 0x976   :  { %v3531_v29 = vadd.f32 %v6258_v28, %v5599_v36  ;;  %v3522_v13 = vpop.f32.mrb[91].mxu0  ;;  %v6547_v28 = vld [vmem:[#allocation2 + $0x80] sm:$0xff]  }
 0x977   :  { %v3523_v7 = vadd.f32 %v5599_v36, %v3522_v13  ;;  %v6550_v13 = vld [vmem:[#allocation2 + $0x178] sm:$0xff]  }
 0x978   :  { %v3699_v42 = vpack.c.bf16 %v3531_v29, %v3528_v47  ;;  %v6548_v47 = vld [vmem:[#allocation2 + $0x170] sm:$0xff]   ;;  %v6549_v29 = vld [vmem:[#allocation2 + $0x88] sm:$0xff]  }
 0x979   :  { %v3698_v21 = vpack.c.bf16 %v3523_v7, %v3520_v38  ;;  %v6551_v38 = vld [vmem:[#allocation2 + $0x90] sm:$0xff]   ;;  %v6552_v7 = vld [vmem:[#allocation2 + $0x180] sm:$0xff]  }
 0x97b   :  { %v6261_v26 = vpop.f32.mrb[92].mxu0  ;;  %6271 = vmatprep.subr.bf16.mxu0 %v3698_v21  ;;  %6459 = vmatprep.subr.bf16.mxu1 %v3698_v21 }
 0x97c   :  { %v3535_v57 = vpop.f32.mrb[93].mxu0  ;;  %6272 = vmatpush3.bf16.msra.mxu0 %v3698_v21  ;;  %6467 = vmatpush3.bf16.msra.mxu1 %v3698_v21  ;;  %v3544_v45 = vadd.f32 %v6261_v26, %v5599_v36  ;;  %v6554_v21 = vld [vmem:[#allocation2 + $0x188] sm:$0xff]   ;;  %v6555_v26 = vld [vmem:[#allocation2 + $0xa0] sm:$0xff]  }
 0x97d   :  { %v6262_v11 = vpop.f32.mrb[94].mxu0  ;;  %6273 = vmatprep.subr.bf16.mxu0 %v3699_v42  ;;  %6460 = vmatprep.subr.bf16.mxu1 %v3699_v42  ;;  %v3536_v50 = vadd.f32 %v5599_v36, %v3535_v57  ;;  %v6556_v57 = vld [vmem:[#allocation2 + $0x190] sm:$0xff]  }
 0x97e   :  { %v3547_v4 = vadd.f32 %v6262_v11, %v5599_v36  ;;  %v3538_v52 = vpop.f32.mrb[95].mxu0  ;;  %v6557_v11 = vld [vmem:[#allocation2 + $0xa8] sm:$0xff]  }
 0x97f   :  { %v3539_v22 = vadd.f32 %v5599_v36, %v3538_v52  ;;  %v6525_v36 = vld [vmem:[#allocation2 + $0x28] sm:$0xff]   ;;  %v6560_v52 = vld [vmem:[#allocation2 + $0x1a0] sm:$0xff]  }
 0x980   :  { %v3701_v32 = vpack.c.bf16 %v3547_v4, %v3544_v45  ;;  %6274 = vmatpush3.bf16.msra.mxu0 %v3699_v42  ;;  %6468 = vmatpush3.bf16.msra.mxu1 %v3699_v42  ;;  %v6553_v42 = vld [vmem:[#allocation2 + $0x98] sm:$0xff]   ;;  %v6559_v4 = vld [vmem:[#allocation2 + $0xb0] sm:$0xff]  }
 0x981   :  { %v3700_v17 = vpack.c.bf16 %v3539_v22, %v3536_v50  ;;  %v6558_v45 = vld [vmem:[#allocation2 + $0x198] sm:$0xff]   ;;  %v6562_v22 = vld [vmem:[#allocation2 + $0x1a8] sm:$0xff]  }
 0x982   :  { %v6561_v50 = vld [vmem:[#allocation2 + $0xb8] sm:$0xff]  }
 0x983   :  { %6275 = vmatprep.subr.bf16.mxu0 %v3700_v17  ;;  %6461 = vmatprep.subr.bf16.mxu1 %v3700_v17 }
 0x984   :  { %6276 = vmatpush3.bf16.msra.mxu0 %v3700_v17  ;;  %6469 = vmatpush3.bf16.msra.mxu1 %v3700_v17  ;;  %v6564_v17 = vld [vmem:[#allocation2 + $0x1b0] sm:$0xff]  }
 0x985   :  { %6277 = vmatprep.subr.bf16.mxu0 %v3701_v32  ;;  %6462 = vmatprep.subr.bf16.mxu1 %v3701_v32 }
 0x988   :  { %6278 = vmatpush3.bf16.msra.mxu0 %v3701_v32  ;;  %6470 = vmatpush3.bf16.msra.mxu1 %v3701_v32  ;;  %v6563_v32 = vld [vmem:[#allocation2 + $0xc0] sm:$0xff]  }
 0x98b   :  { %6280 = vmatmul.mubr.bf16.vlgmr.msra.gmra.mrb[96].mxu0 %v6517_v51  ;;  %6340 = vmatmul.mubr.bf16.vlgmr.msra.gmra.mrb[80].mxu1 %v6518_v30  ;;  %v6565_v51 = vld [vmem:[#allocation2 + $0xc8] sm:$0xff]   ;;  %v6566_v30 = vld [vmem:[#allocation2 + $0x1b8] sm:$0xff]  }
 0x98c   :  { %6283 = vmatprep.mubr.bf16.mxu0 %v6519_v62  ;;  %6343 = vmatprep.mubr.bf16.mxu1 %v6520_v27  ;;  %v6567_v62 = vld [vmem:[#allocation2 + $0xd0] sm:$0xff]   ;;  %v6568_v27 = vld [vmem:[#allocation2 + $0x1c0] sm:$0xff]  }
 0x993   :  { %6284 = vmatmul.mubr.bf16.gmra.mrb[100].mxu0 %v6521_v37  ;;  %6344 = vmatmul.mubr.bf16.gmra.mrb[84].mxu1 %v6522_v59  ;;  %v6569_v37 = vld [vmem:[#allocation2 + $0xd8] sm:$0xff]   ;;  %v6570_v59 = vld [vmem:[#allocation2 + $0x1c8] sm:$0xff]  }
 0x994   :  { %6287 = vmatprep.mubr.bf16.mxu0 %v6523_v35  ;;  %6347 = vmatprep.mubr.bf16.mxu1 %v6524_v44  ;;  %v6571_v35 = vld [vmem:[#allocation2 + $0xe0] sm:$0xff]   ;;  %v6572_v44 = vld [vmem:[#allocation2 + $0x1d0] sm:$0xff]  }
 0x99b   :  { %6288 = vmatmul.mubr.bf16.gmra.mrb[104].mxu0 %v6525_v36  ;;  %6348 = vmatmul.mubr.bf16.gmra.mrb[88].mxu1 %v6526_v3  ;;  %v6573_v36 = vld [vmem:[#allocation2 + $0xe8] sm:$0xff]   ;;  %v6574_v3 = vld [vmem:[#allocation2 + $0x1d8] sm:$0xff]  }
 0x99c   :  { %6291 = vmatprep.mubr.bf16.mxu0 %v6527_v58  ;;  %6351 = vmatprep.mubr.bf16.mxu1 %v6528_v54  ;;  %v6575_v58 = vld [vmem:[#allocation2 + $0x1e0] sm:$0xff]   ;;  %v6576_v54 = vld [vmem:[#allocation2 + $0x1e8] sm:$0xff]  }
 0x9a3   :  { %6292 = vmatmul.mubr.bf16.gmra.mrb[108].mxu0 %v6529_v19  ;;  %6352 = vmatmul.mubr.bf16.gmra.mrb[92].mxu1 %v6530_v63  ;;  %v6577_v19 = vld [vmem:[#allocation2 + $0x1f0] sm:$0xff]   ;;  %v6578_v63 = vld [vmem:[#allocation2 + $0x1f8] sm:$0xff]  }
 0x9a4   :  { %6295 = vmatprep.mubr.bf16.mxu0 %v6531_v6  ;;  %6355 = vmatprep.mubr.bf16.mxu1 %v6532_v16  ;;  %v6579_v6 = vld [vmem:[#allocation2 + $0x200] sm:$0xff]   ;;  %v6580_v16 = vld [vmem:[#allocation2 + $0x208] sm:$0xff]  }
 0x9ab   :  { %6296 = vmatmul.mubr.bf16.gmra.mrb[112].mxu0 %v6533_v15  ;;  %6356 = vmatmul.mubr.bf16.gmra.mrb[96].mxu1 %v6534_v48  ;;  %v6581_v15 = vld [vmem:[#allocation2 + $0x210] sm:$0xff]   ;;  %v6582_v48 = vld [vmem:[#allocation2 + $0x218] sm:$0xff]  }
 0x9ac   :  { %6299 = vmatprep.mubr.bf16.mxu0 %v6535_v60  ;;  %6359 = vmatprep.mubr.bf16.mxu1 %v6536_v49  ;;  %v6583_v60 = vld [vmem:[#allocation2 + $0x220] sm:$0xff]  }
 0x9ad   :  { %v6588_v49 = vld [vmem:[%s9724_s14] sm:$0xff]  }
 0x9ae   :  { %6423 = vmatprep.subr.bf16.mxu0 %v6588_v49 }
 0x9af   :  { %6424 = vmatpush3.bf16.msra.mxu0 %v6588_v49 }
 0x9b3   :  { %6300 = vmatmul.mubr.bf16.gmra.mrb[116].mxu0 %v6537_v12  ;;  %6360 = vmatmul.mubr.bf16.gmra.mrb[100].mxu1 %v6538_v40  ;;  %v6584_v12 = vld [vmem:[#allocation2 + $0x228] sm:$0xff]   ;;  %v6585_v40 = vld [vmem:[#allocation2 + $0x230] sm:$0xff]  }
 0x9b4   :  { %6303 = vmatprep.mubr.bf16.mxu0 %v6539_v9  ;;  %6363 = vmatprep.mubr.bf16.mxu1 %v6540_v53  ;;  %v6589_v9 = vld [vmem:[%s9724_s14 + $0x8] sm:$0xff]   ;;  %v6586_v53 = vld [vmem:[#allocation2 + $0x238] sm:$0xff]  }
 0x9b5   :  { %6425 = vmatprep.subr.bf16.mxu0 %v6589_v9 }
 0x9b6   :  { %6426 = vmatpush3.bf16.msra.mxu0 %v6589_v9 }
 0x9bb   :  { %6304 = vmatmul.mubr.bf16.gmra.mrb[120].mxu0 %v6541_v1  ;;  %6364 = vmatmul.mubr.bf16.gmra.mrb[104].mxu1 %v6542_v10  ;;  %v6590_v1 = vld [vmem:[%s9724_s14 + $0x10] sm:$0xff]   ;;  %v6993_v10 = vmov 1966171168  }
 0x9bc   :  { %6307 = vmatprep.mubr.bf16.mxu0 %v6543_v2  ;;  %6367 = vmatprep.mubr.bf16.mxu1 %v6544_v33  ;;  %v4749_v2 = vunpack.c.l.s4 %v6993_v10 }
 0x9bd   :  { %6427 = vmatprep.subr.bf16.mxu0 %v6590_v1 }
 0x9be   :  { %6428 = vmatpush3.bf16.msra.mxu0 %v6590_v1  ;;  %v4750_v33 = vunpack.c.0.s8 %v4749_v2 }
 0x9c3   :  { %6308 = vmatmul.mubr.bf16.gmra.mrb[124].mxu0 %v6545_v25  ;;  %6368 = vmatmul.mubr.bf16.gmra.mrb[108].mxu1 %v6546_v56  ;;  %v6591_v25 = vld [vmem:[%s9724_s14 + $0x18] sm:$0xff]   ;;  %v9952_v56 = vld [vmem:[#allocation5_spill] sm:$0xff] }
 0x9c4   :  { %6311 = vmatprep.mubr.bf16.mxu0 %v6547_v28  ;;  %6371 = vmatprep.mubr.bf16.mxu1 %v6548_v47  ;;  %v8932_v28 = vsub.s32 %v4750_v33, %v9952_v56  ;;  %v4743_v47 = vld [vmem:[%s9722_s12] sm:$0xff] }
 0x9c5   :  { %6429 = vmatprep.subr.bf16.mxu0 %v6591_v25 }
 0x9c6   :  { %9953 = vst [vmem:[#allocation40_spill] sm:$0xff] %v8932_v28  ;;  %6430 = vmatpush3.bf16.msra.mxu0 %v6591_v25 }
 0x9cb   :  { %6312 = vmatmul.mubr.bf16.gmra.mrb[128].mxu0 %v6549_v29  ;;  %6372 = vmatmul.mubr.bf16.gmra.mrb[112].mxu1 %v6550_v13  ;;  %v4754_v29 = vrot.slane %v4743_v47, %v8932_v28 }
 0x9cc   :  { %6315 = vmatprep.mubr.bf16.mxu0 %v6551_v38  ;;  %6375 = vmatprep.mubr.bf16.mxu1 %v6552_v7  ;;  %v6592_v7 = vld [vmem:[%s9724_s14 + $0x20] sm:$0xff]  }
 0x9cd   :  { %v4762_v13 = vcombine.high %v4754_v29, %v4754_v29  ;;  %6431 = vmatprep.subr.bf16.mxu0 %v6592_v7 }
 0x9ce   :  { %6432 = vmatpush3.bf16.msra.mxu0 %v6592_v7 }
 0x9cf   :  { %v8939_v38 = vrot.slane %v4762_v13, %v8932_v28 }
 0x9d3   :  { %6316 = vmatmul.mubr.bf16.gmra.mrb[132].mxu0 %v6553_v42  ;;  %6376 = vmatmul.mubr.bf16.gmra.mrb[116].mxu1 %v6554_v21  ;;  %v4794_v42 = vcombine.high %v8939_v38, %v8939_v38  ;;  %v4747_v21 = vcombine.high %v4743_v47, %v4743_v47 }
 0x9d4   :  { %6319 = vmatprep.mubr.bf16.mxu0 %v6555_v26  ;;  %6379 = vmatprep.mubr.bf16.mxu1 %v6556_v57  ;;  %v8947_v26 = vrot.slane %v4754_v29, %v8932_v28  ;;  %v9954_v57 = vld [vmem:[#allocation6_spill] sm:$0xff] }
 0x9db   :  { %6320 = vmatmul.mubr.bf16.gmra.mrb[136].mxu0 %v6557_v11  ;;  %6380 = vmatmul.mubr.bf16.gmra.mrb[120].mxu1 %v6558_v45  ;;  %v8950_v11 = vrot.slane %v4794_v42, %v9954_v57  ;;  %v8953_v45 = vrot.slane %v4747_v21, %v8932_v28 }
 0x9dc   :  { %6323 = vmatprep.mubr.bf16.mxu0 %v6559_v4  ;;  %6383 = vmatprep.mubr.bf16.mxu1 %v6560_v52  ;;  %v8957_v4 = vrot.slane %v8947_v26, %v9954_v57 }
 0x9e3   :  { %6324 = vmatmul.mubr.bf16.gmra.mrb[140].mxu0 %v6561_v50  ;;  %6384 = vmatmul.mubr.bf16.gmra.mrb[124].mxu1 %v6562_v22 }
 0x9e4   :  { %6327 = vmatprep.mubr.bf16.mxu0 %v6563_v32  ;;  %6387 = vmatprep.mubr.bf16.mxu1 %v6564_v17  ;;  %v8964_v17 = vrot.slane %v8953_v45, %v8932_v28 }
 0x9eb   :  { %6328 = vmatmul.mubr.bf16.gmra.mrb[144].mxu0 %v6565_v51  ;;  %6388 = vmatmul.mubr.bf16.gmra.mrb[128].mxu1 %v6566_v30 }
 0x9ec   :  { %6331 = vmatprep.mubr.bf16.mxu0 %v6567_v62  ;;  %6391 = vmatprep.mubr.bf16.mxu1 %v6568_v27 }
 0x9f3   :  { %6332 = vmatmul.mubr.bf16.gmra.mrb[148].mxu0 %v6569_v37  ;;  %6392 = vmatmul.mubr.bf16.gmra.mrb[132].mxu1 %v6570_v59 }
 0x9f4   :  { %6335 = vmatprep.mubr.bf16.mxu0 %v6571_v35  ;;  %6395 = vmatprep.mubr.bf16.mxu1 %v6572_v44 }
 0x9fb   :  { %6336 = vmatmul.mubr.bf16.gmra.mrb[152].mxu0 %v6573_v36  ;;  %6396 = vmatmul.mubr.bf16.gmra.mrb[136].mxu1 %v6574_v3 }
 0x9fc   :  { %6399 = vmatprep.mubr.bf16.mxu1 %v6575_v58 }
 0xa03   :  { %6400 = vmatmul.mubr.bf16.gmra.mrb[140].mxu1 %v6576_v54 }
 0xa04   :  { %6403 = vmatprep.mubr.bf16.mxu1 %v6577_v19  ;;  %v8989_v19 = vrot.slane %v8964_v17, %v9954_v57 }
 0xa0b   :  { %6404 = vmatmul.mubr.bf16.gmra.mrb[144].mxu1 %v6578_v63  ;;  %v6593_v63 = vld [vmem:[%s9724_s14 + $0x28] sm:$0xff]  }
 0xa0c   :  { %6407 = vmatprep.mubr.bf16.mxu1 %v6579_v6  ;;  %6433 = vmatprep.subr.bf16.mxu0 %v6593_v63 }
 0xa0d   :  { %6434 = vmatpush3.bf16.msra.mxu0 %v6593_v63 }
 0xa13   :  { %6408 = vmatmul.mubr.bf16.gmra.mrb[148].mxu1 %v6580_v16 }
 0xa14   :  { %6411 = vmatprep.mubr.bf16.mxu1 %v6581_v15 }
 0xa1b   :  { %6412 = vmatmul.mubr.bf16.gmra.mrb[152].mxu1 %v6582_v48 }
 0xa1c   :  { %6415 = vmatprep.mubr.bf16.mxu1 %v6583_v60 }
 0xa23   :  { %6416 = vmatmul.mubr.bf16.gmra.mrb[156].mxu1 %v6584_v12 }
 0xa24   :  { %6419 = vmatprep.mubr.bf16.mxu1 %v6585_v40 }
 0xa2b   :  { %6420 = vmatmul.mubr.bf16.gmra.mrb[160].mxu1 %v6586_v53 }
 0xa5e   :  { %v6341_v52 = vpop.f32.mrb[80].mxu1  ;;  %v6281_v50 = vpop.f32.mrb[96].mxu0 }
 0xa5f   :  { %v8960_v22 = vmul.f32 %v6341_v52, %v8950_v11  ;;  %v4408_v32 = vpop.f32.mrb[81].mxu1  ;;  %v8967_v51 = vmul.f32 %v6281_v50, %v8957_v4  ;;  %v4168_v30 = vpop.f32.mrb[97].mxu0 }
 0xa60   :  { %v8970_v62 = vmul.f32 %v8950_v11, %v4408_v32  ;;  %v6342_v27 = vpop.f32.mrb[82].mxu1  ;;  %v8973_v37 = vmul.f32 %v8957_v4, %v4168_v30  ;;  %v6282_v59 = vpop.f32.mrb[98].mxu0 }
 0xa61   :  { %v8976_v35 = vmul.f32 %v6342_v27, %v8950_v11  ;;  %v4411_v44 = vpop.f32.mrb[83].mxu1  ;;  %v8979_v36 = vmul.f32 %v6282_v59, %v8957_v4  ;;  %v4171_v3 = vpop.f32.mrb[99].mxu0 }
 0xa62   :  { %v8982_v58 = vmul.f32 %v8950_v11, %v4411_v44  ;;  %v8985_v54 = vmul.f32 %v8957_v4, %v4171_v3 }
 0xa66   :  { %v6345_v6 = vpop.f32.mrb[84].mxu1  ;;  %v6285_v16 = vpop.f32.mrb[100].mxu0 }
 0xa67   :  { %v8995_v15 = vmul.f32 %v6345_v6, %v8989_v19  ;;  %v4424_v48 = vpop.f32.mrb[85].mxu1  ;;  %v8998_v60 = vmul.f32 %v6285_v16, %v8957_v4  ;;  %v4184_v49 = vpop.f32.mrb[101].mxu0 }
 0xa68   :  { %v9001_v12 = vmul.f32 %v8989_v19, %v4424_v48  ;;  %v6346_v40 = vpop.f32.mrb[86].mxu1  ;;  %v9004_v9 = vmul.f32 %v8957_v4, %v4184_v49  ;;  %v6286_v53 = vpop.f32.mrb[102].mxu0 }
 0xa69   :  { %v9007_v1 = vmul.f32 %v6346_v40, %v8989_v19  ;;  %v4427_v10 = vpop.f32.mrb[87].mxu1  ;;  %v9010_v2 = vmul.f32 %v6286_v53, %v8957_v4  ;;  %v4187_v33 = vpop.f32.mrb[103].mxu0 }
 0xa6a   :  { %v9013_v25 = vmul.f32 %v8989_v19, %v4427_v10  ;;  %v9016_v56 = vmul.f32 %v8957_v4, %v4187_v33 }
 0xa6e   :  { %v6349_v47 = vpop.f32.mrb[88].mxu1  ;;  %v6289_v29 = vpop.f32.mrb[104].mxu0 }
 0xa6f   :  { %v9019_v13 = vmul.f32 %v6349_v47, %v8989_v19  ;;  %v4440_v7 = vpop.f32.mrb[89].mxu1  ;;  %v9022_v42 = vmul.f32 %v6289_v29, %v8957_v4  ;;  %v4200_v21 = vpop.f32.mrb[105].mxu0 }
 0xa70   :  { %v9025_v52 = vmul.f32 %v8989_v19, %v4440_v7  ;;  %v6350_v50 = vpop.f32.mrb[90].mxu1  ;;  %v9028_v32 = vmul.f32 %v8957_v4, %v4200_v21  ;;  %v6290_v30 = vpop.f32.mrb[106].mxu0 }
 0xa71   :  { %v9031_v27 = vmul.f32 %v6350_v50, %v8989_v19  ;;  %v4443_v59 = vpop.f32.mrb[91].mxu1  ;;  %v9034_v44 = vmul.f32 %v6290_v30, %v8957_v4  ;;  %v4203_v3 = vpop.f32.mrb[107].mxu0 }
 0xa72   :  { %v9037_v63 = vmul.f32 %v8989_v19, %v4443_v59  ;;  %v9040_v6 = vmul.f32 %v8957_v4, %v4203_v3 }
 0xa76   :  { %v6353_v16 = vpop.f32.mrb[92].mxu1  ;;  %v6293_v48 = vpop.f32.mrb[108].mxu0 }
 0xa77   :  { %v9043_v49 = vmul.f32 %v6353_v16, %v8989_v19  ;;  %v4456_v40 = vpop.f32.mrb[93].mxu1  ;;  %v9046_v53 = vmul.f32 %v6293_v48, %v8957_v4  ;;  %v4216_v10 = vpop.f32.mrb[109].mxu0  ;;  %v9068_v48 = vrot.slane %v8939_v38, %v9954_v57 }
 0xa78   :  { %v9049_v33 = vmul.f32 %v8989_v19, %v4456_v40  ;;  %v6354_v47 = vpop.f32.mrb[94].mxu1  ;;  %v9052_v29 = vmul.f32 %v8957_v4, %v4216_v10  ;;  %v6294_v7 = vpop.f32.mrb[110].mxu0  ;;  %v4763_v40 = vcombine.high %v8953_v45, %v8953_v45 }
 0xa79   :  { %9955 = vst [vmem:[#allocation27_spill] sm:$0xff] %v9043_v49  ;;  %v9055_v21 = vmul.f32 %v6354_v47, %v8989_v19  ;;  %v4459_v50 = vpop.f32.mrb[95].mxu1  ;;  %v9058_v30 = vmul.f32 %v6294_v7, %v8957_v4  ;;  %v4219_v59 = vpop.f32.mrb[111].mxu0 }
 0xa7a   :  { %9956 = vst [vmem:[#allocation23_spill] sm:$0xff] %v9049_v33  ;;  %v9061_v3 = vmul.f32 %v8989_v19, %v4459_v50  ;;  %v9064_v16 = vmul.f32 %v8957_v4, %v4219_v59  ;;  %v9077_v31 = vrot.slane %v4763_v40, %v8932_v28 }
 0xa7b   :  { %9957 = vst [vmem:[#allocation37_spill] sm:$0xff] %v9055_v21 }
 0xa7c   :  { %9958 = vst [vmem:[#allocation22_spill] sm:$0xff] %v9061_v3 }
 0xa7e   :  { %v6297_v10 = vpop.f32.mrb[112].mxu0  ;;  %v6357_v47 = vpop.f32.mrb[96].mxu1 }
 0xa7f   :  { %v4873_v39 = vmul.f32 %v6297_v10, %v9068_v48  ;;  %v9074_v7 = vmul.f32 %v6357_v47, %v8989_v19  ;;  %v4232_v55 = vpop.f32.mrb[113].mxu0  ;;  %v4472_v50 = vpop.f32.mrb[97].mxu1 }
 0xa80   :  { %v4871_v4 = vmul.f32 %v9068_v48, %v4232_v55  ;;  %v9081_v38 = vmul.f32 %v8989_v19, %v4472_v50  ;;  %v6298_v59 = vpop.f32.mrb[114].mxu0  ;;  %v6358_v18 = vpop.f32.mrb[98].mxu1 }
 0xa81   :  { %v9084_v45 = vadd.f32 %v4873_v39, %v8967_v51  ;;  %v4874_v10 = vmul.f32 %v6298_v59, %v9068_v48  ;;  %v9088_v47 = vmul.f32 %v6358_v18, %v8989_v19  ;;  %v4235_v20 = vpop.f32.mrb[115].mxu0  ;;  %v4475_v46 = vpop.f32.mrb[99].mxu1  ;;  %v9102_v39 = vrot.slane %v9077_v31, %v9954_v57 }
 0xa82   :  { %v9091_v40 = vadd.f32 %v4871_v4, %v8973_v37  ;;  %v4872_v55 = vmul.f32 %v9068_v48, %v4235_v20  ;;  %v9095_v50 = vmul.f32 %v8989_v19, %v4475_v46 }
 0xa83   :  { %v9098_v61 = vadd.f32 %v4874_v10, %v8979_v36 }
 0xa84   :  { %v9105_v18 = vadd.f32 %v4872_v55, %v8985_v54  ;;  %v6594_v54 = vld [vmem:[%s9724_s14 + $0x30] sm:$0xff]  }
 0xa85   :  { %6435 = vmatprep.subr.bf16.mxu0 %v6594_v54 }
 0xa86   :  { %v6301_v51 = vpop.f32.mrb[116].mxu0  ;;  %v6361_v59 = vpop.f32.mrb[100].mxu1  ;;  %6436 = vmatpush3.bf16.msra.mxu0 %v6594_v54 }
 0xa87   :  { %v4877_v37 = vmul.f32 %v6301_v51, %v9068_v48  ;;  %v9109_v4 = vmul.f32 %v6361_v59, %v9102_v39  ;;  %v4248_v20 = vpop.f32.mrb[117].mxu0  ;;  %v4488_v46 = vpop.f32.mrb[101].mxu1 }
 0xa88   :  { %v4875_v19 = vmul.f32 %v9068_v48, %v4248_v20  ;;  %v9113_v36 = vmul.f32 %v9102_v39, %v4488_v46  ;;  %v6302_v10 = vpop.f32.mrb[118].mxu0  ;;  %v6362_v23 = vpop.f32.mrb[102].mxu1 }
 0xa89   :  { %v9119_v55 = vadd.f32 %v4877_v37, %v8998_v60  ;;  %v4878_v51 = vmul.f32 %v6302_v10, %v9068_v48  ;;  %v9123_v59 = vmul.f32 %v6362_v23, %v9102_v39  ;;  %v4251_v8 = vpop.f32.mrb[119].mxu0  ;;  %v4491_v5 = vpop.f32.mrb[103].mxu1  ;;  %v6595_v60 = vld [vmem:[%s9724_s14 + $0x38] sm:$0xff]  }
 0xa8a   :  { %v9126_v20 = vadd.f32 %v4875_v19, %v9004_v9  ;;  %v4876_v46 = vmul.f32 %v9068_v48, %v4251_v8  ;;  %v9130_v41 = vmul.f32 %v9102_v39, %v4491_v5  ;;  %6437 = vmatprep.subr.bf16.mxu0 %v6595_v60 }
 0xa8b   :  { %v9136_v37 = vadd.f32 %v4878_v51, %v9010_v2  ;;  %6438 = vmatpush3.bf16.msra.mxu0 %v6595_v60 }
 0xa8c   :  { %v9139_v23 = vadd.f32 %v4876_v46, %v9016_v56 }
 0xa8e   :  { %v6305_v9 = vpop.f32.mrb[120].mxu0  ;;  %v6365_v19 = vpop.f32.mrb[104].mxu1 }
 0xa8f   :  { %v4881_v8 = vmul.f32 %v6305_v9, %v9068_v48  ;;  %v9143_v5 = vmul.f32 %v6365_v19, %v9102_v39  ;;  %v4264_v10 = vpop.f32.mrb[121].mxu0  ;;  %v4504_v43 = vpop.f32.mrb[105].mxu1 }
 0xa90   :  { %v4879_v34 = vmul.f32 %v9068_v48, %v4264_v10  ;;  %v9147_v2 = vmul.f32 %v9102_v39, %v4504_v43  ;;  %v6306_v54 = vpop.f32.mrb[122].mxu0  ;;  %v6366_v51 = vpop.f32.mrb[106].mxu1 }
 0xa91   :  { %v9150_v56 = vadd.f32 %v4881_v8, %v9022_v42  ;;  %v4882_v46 = vmul.f32 %v6306_v54, %v9068_v48  ;;  %v9154_v9 = vmul.f32 %v6366_v51, %v9102_v39  ;;  %v4267_v19 = vpop.f32.mrb[123].mxu0  ;;  %v4507_v14 = vpop.f32.mrb[107].mxu1 }
 0xa92   :  { %v9157_v24 = vadd.f32 %v4879_v34, %v9028_v32  ;;  %v4880_v60 = vmul.f32 %v9068_v48, %v4267_v19  ;;  %v9161_v43 = vmul.f32 %v9102_v39, %v4507_v14  ;;  %v4792_v19 = vcombine.high %v8947_v26, %v8947_v26 }
 0xa93   :  { %9959 = vst [vmem:[#allocation28_spill] sm:$0xff] %v9154_v9  ;;  %v9164_v10 = vadd.f32 %v4882_v46, %v9034_v44 }
 0xa94   :  { %9960 = vst [vmem:[#allocation25_spill] sm:$0xff] %v9161_v43  ;;  %v9167_v42 = vadd.f32 %v4880_v60, %v9040_v6 }
 0xa96   :  { %v6309_v8 = vpop.f32.mrb[124].mxu0  ;;  %v6369_v54 = vpop.f32.mrb[108].mxu1 }
 0xa97   :  { %v4885_v51 = vmul.f32 %v6309_v8, %v9068_v48  ;;  %v9171_v0 = vmul.f32 %v6369_v54, %v9102_v39  ;;  %v4280_v34 = vpop.f32.mrb[125].mxu0  ;;  %v4520_v32 = vpop.f32.mrb[109].mxu1 }
 0xa98   :  { %v4883_v14 = vmul.f32 %v9068_v48, %v4280_v34  ;;  %v9177_v44 = vmul.f32 %v9102_v39, %v4520_v32  ;;  %v6310_v46 = vpop.f32.mrb[126].mxu0  ;;  %v6370_v6 = vpop.f32.mrb[110].mxu1 }
 0xa99   :  { %9961 = vst [vmem:[#allocation30_spill] sm:$0xff] %v9171_v0  ;;  %v9180_v60 = vadd.f32 %v4885_v51, %v9046_v53  ;;  %v4886_v8 = vmul.f32 %v6310_v46, %v9068_v48  ;;  %v9184_v54 = vmul.f32 %v6370_v6, %v9102_v39  ;;  %v4283_v28 = vpop.f32.mrb[127].mxu0  ;;  %v4523_v3 = vpop.f32.mrb[111].mxu1  ;;  %v9197_v53 = vrot.slane %v4792_v19, %v9954_v57 }
 0xa9a   :  { %9962 = vst [vmem:[#allocation24_spill] sm:$0xff] %v9177_v44  ;;  %v9187_v0 = vadd.f32 %v4883_v14, %v9052_v29  ;;  %v4884_v26 = vmul.f32 %v9068_v48, %v4283_v28  ;;  %v9191_v34 = vmul.f32 %v9102_v39, %v4523_v3  ;;  %v4793_v3 = vcombine.high %v8964_v17, %v8964_v17 }
 0xa9b   :  { %9963 = vst [vmem:[#allocation38_spill] sm:$0xff] %v9184_v54  ;;  %v9194_v32 = vadd.f32 %v4886_v8, %v9058_v30 }
 0xa9c   :  { %9964 = vst [vmem:[#allocation46_spill] sm:$0xff] %v9191_v34  ;;  %v9200_v51 = vadd.f32 %v4884_v26, %v9064_v16 }
 0xa9e   :  { %v6313_v46 = vpop.f32.mrb[128].mxu0  ;;  %v6373_v6 = vpop.f32.mrb[112].mxu1 }
 0xa9f   :  { %v4889_v54 = vmul.f32 %v6313_v46, %v9197_v53  ;;  %v9204_v29 = vmul.f32 %v6373_v6, %v9102_v39  ;;  %v4296_v28 = vpop.f32.mrb[129].mxu0  ;;  %v4536_v48 = vpop.f32.mrb[113].mxu1 }
 0xaa0   :  { %v4887_v30 = vmul.f32 %v9197_v53, %v4296_v28  ;;  %v9210_v19 = vmul.f32 %v9102_v39, %v4536_v48  ;;  %v6314_v14 = vpop.f32.mrb[130].mxu0  ;;  %v6374_v16 = vpop.f32.mrb[114].mxu1 }
 0xaa1   :  { %v9213_v8 = vadd.f32 %v9084_v45, %v4889_v54  ;;  %v4890_v26 = vmul.f32 %v6314_v14, %v9197_v53  ;;  %v9217_v46 = vmul.f32 %v6374_v16, %v9102_v39  ;;  %v4299_v6 = vpop.f32.mrb[131].mxu0  ;;  %v4539_v34 = vpop.f32.mrb[115].mxu1  ;;  %v9230_v45 = vrot.slane %v4793_v3, %v9954_v57 }
 0xaa2   :  { %v9220_v44 = vadd.f32 %v9091_v40, %v4887_v30  ;;  %v4888_v17 = vmul.f32 %v9197_v53, %v4299_v6  ;;  %v9224_v28 = vmul.f32 %v9102_v39, %v4539_v34 }
 0xaa3   :  { %v9227_v48 = vadd.f32 %v9098_v61, %v4890_v26 }
 0xaa4   :  { %v9233_v54 = vadd.f32 %v9105_v18, %v4888_v17 }
 0xaa6   :  { %v6317_v14 = vpop.f32.mrb[132].mxu0  ;;  %v6377_v16 = vpop.f32.mrb[116].mxu1 }
 0xaa7   :  { %v4893_v21 = vmul.f32 %v6317_v14, %v9197_v53  ;;  %v9237_v40 = vmul.f32 %v6377_v16, %v9230_v45  ;;  %v4312_v30 = vpop.f32.mrb[133].mxu0  ;;  %v4552_v6 = vpop.f32.mrb[117].mxu1 }
 0xaa8   :  { %v4891_v39 = vmul.f32 %v9197_v53, %v4312_v30  ;;  %v9241_v61 = vmul.f32 %v9230_v45, %v4552_v6  ;;  %v6318_v34 = vpop.f32.mrb[134].mxu0  ;;  %v6378_v3 = vpop.f32.mrb[118].mxu1 }
 0xaa9   :  { %v9244_v26 = vadd.f32 %v9119_v55, %v4893_v21  ;;  %v4894_v18 = vmul.f32 %v6318_v34, %v9197_v53  ;;  %v9248_v17 = vmul.f32 %v6378_v3, %v9230_v45  ;;  %v4315_v14 = vpop.f32.mrb[135].mxu0  ;;  %v4555_v16 = vpop.f32.mrb[119].mxu1 }
 0xaaa   :  { %v9251_v33 = vadd.f32 %v9126_v20, %v4891_v39  ;;  %v4892_v30 = vmul.f32 %v9197_v53, %v4315_v14  ;;  %v9255_v6 = vmul.f32 %v9230_v45, %v4555_v16 }
 0xaab   :  { %v9258_v49 = vadd.f32 %v9136_v37, %v4894_v18 }
 0xaac   :  { %v9261_v21 = vadd.f32 %v9139_v23, %v4892_v30 }
 0xaae   :  { %v6321_v55 = vpop.f32.mrb[136].mxu0  ;;  %v6381_v34 = vpop.f32.mrb[120].mxu1 }
 0xaaf   :  { %v4897_v3 = vmul.f32 %v6321_v55, %v9197_v53  ;;  %v9265_v43 = vmul.f32 %v6381_v34, %v9230_v45  ;;  %v4328_v20 = vpop.f32.mrb[137].mxu0  ;;  %v4568_v39 = vpop.f32.mrb[121].mxu1 }
 0xab0   :  { %v4895_v14 = vmul.f32 %v9197_v53, %v4328_v20  ;;  %v9269_v16 = vmul.f32 %v9230_v45, %v4568_v39  ;;  %v6322_v9 = vpop.f32.mrb[138].mxu0  ;;  %v6382_v37 = vpop.f32.mrb[122].mxu1 }
 0xab1   :  { %9965 = vst [vmem:[#allocation39_spill] sm:$0xff] %v9265_v43  ;;  %v9272_v18 = vadd.f32 %v9150_v56, %v4897_v3  ;;  %v4898_v23 = vmul.f32 %v6322_v9, %v9197_v53  ;;  %v9276_v30 = vmul.f32 %v6382_v37, %v9230_v45  ;;  %v4331_v55 = vpop.f32.mrb[139].mxu0  ;;  %v4571_v34 = vpop.f32.mrb[123].mxu1 }
 0xab2   :  { %9966 = vst [vmem:[#allocation36_spill] sm:$0xff] %v9269_v16  ;;  %v9279_v43 = vadd.f32 %v9157_v24, %v4895_v14  ;;  %v4896_v20 = vmul.f32 %v9197_v53, %v4331_v55  ;;  %v9283_v39 = vmul.f32 %v9230_v45, %v4571_v34 }
 0xab3   :  { %9967 = vst [vmem:[#allocation29_spill] sm:$0xff] %v9276_v30  ;;  %v9286_v16 = vadd.f32 %v9164_v10, %v4898_v23 }
 0xab4   :  { %9968 = vst [vmem:[#allocation31_spill] sm:$0xff] %v9283_v39  ;;  %v9289_v56 = vadd.f32 %v9167_v42, %v4896_v20 }
 0xab6   :  { %9969 = vst [vmem:[#allocation32_spill] sm:$0xff] %v9289_v56  ;;  %v6325_v9 = vpop.f32.mrb[140].mxu0  ;;  %v6385_v3 = vpop.f32.mrb[124].mxu1 }
 0xab7   :  { %v4901_v37 = vmul.f32 %v6325_v9, %v9197_v53  ;;  %v9293_v30 = vmul.f32 %v6385_v3, %v9230_v45  ;;  %v4344_v24 = vpop.f32.mrb[141].mxu0  ;;  %v4584_v14 = vpop.f32.mrb[125].mxu1 }
 0xab8   :  { %v4899_v55 = vmul.f32 %v9197_v53, %v4344_v24  ;;  %v9297_v34 = vmul.f32 %v9230_v45, %v4584_v14  ;;  %v6326_v39 = vpop.f32.mrb[142].mxu0  ;;  %v6386_v10 = vpop.f32.mrb[126].mxu1  ;;  %v4795_v14 = vcombine.high %v9077_v31, %v9077_v31 }
 0xab9   :  { %9970 = vst [vmem:[#allocation33_spill] sm:$0xff] %v9293_v30  ;;  %v5112_v23 = vadd.f32 %v9180_v60, %v4901_v37  ;;  %v4902_v42 = vmul.f32 %v6326_v39, %v9197_v53  ;;  %v9302_v20 = vmul.f32 %v6386_v10, %v9230_v45  ;;  %v4347_v9 = vpop.f32.mrb[143].mxu0  ;;  %v4587_v56 = vpop.f32.mrb[127].mxu1 }
 0xaba   :  { %9971 = vst [vmem:[#allocation34_spill] sm:$0xff] %v9297_v34  ;;  %v5096_v3 = vadd.f32 %v9187_v0, %v4899_v55  ;;  %v4900_v30 = vmul.f32 %v9197_v53, %v4347_v9  ;;  %v9307_v24 = vmul.f32 %v9230_v45, %v4587_v56  ;;  %v9320_v31 = vrot.slane %v4795_v14, %v9954_v57 }
 0xabb   :  { %v5113_v34 = vadd.f32 %v5112_v23, %v8960_v22  ;;  %v5120_v60 = vadd.f32 %v9194_v32, %v4902_v42 }
 0xabc   :  { %v5097_v39 = vadd.f32 %v5096_v3, %v8970_v62  ;;  %v5104_v37 = vadd.f32 %v9200_v51, %v4900_v30 }
 0xabd   :  { %v5121_v10 = vadd.f32 %v5120_v60, %v8976_v35  ;;  %v5114_v0 = vadd.f32 %v5113_v34, %v9074_v7 }
 0xabe   :  { %v5105_v53 = vadd.f32 %v5104_v37, %v8982_v58  ;;  %v6329_v55 = vpop.f32.mrb[144].mxu0  ;;  %v6389_v56 = vpop.f32.mrb[128].mxu1  ;;  %v5098_v9 = vadd.f32 %v5097_v39, %v9081_v38 }
 0xabf   :  { %v4905_v22 = vmul.f32 %v6329_v55, %v8950_v11  ;;  %v4965_v32 = vmul.f32 %v6389_v56, %v9230_v45  ;;  %v5115_v62 = vadd.f32 %v5114_v0, %v9204_v29  ;;  %v4360_v51 = vpop.f32.mrb[145].mxu0  ;;  %v4600_v30 = vpop.f32.mrb[129].mxu1  ;;  %v5122_v35 = vadd.f32 %v5121_v10, %v9088_v47 }
 0xac0   :  { %v4903_v7 = vmul.f32 %v8950_v11, %v4360_v51  ;;  %v4963_v58 = vmul.f32 %v9230_v45, %v4600_v30  ;;  %v5099_v34 = vadd.f32 %v5098_v9, %v9210_v19  ;;  %v6330_v38 = vpop.f32.mrb[146].mxu0  ;;  %v6390_v23 = vpop.f32.mrb[130].mxu1  ;;  %v5106_v42 = vadd.f32 %v5105_v53, %v9095_v50 }
 0xac1   :  { %v5017_v3 = vadd.f32 %v9213_v8, %v4905_v22  ;;  %v9331_v14 = vadd.f32 %v5115_v62, %v4965_v32  ;;  %v4906_v29 = vmul.f32 %v6330_v38, %v8950_v11  ;;  %v4966_v60 = vmul.f32 %v6390_v23, %v9230_v45  ;;  %v4363_v39 = vpop.f32.mrb[147].mxu0  ;;  %v4603_v47 = vpop.f32.mrb[131].mxu1 }
 0xac2   :  { %v5001_v37 = vadd.f32 %v9220_v44, %v4903_v7  ;;  %v9336_v10 = vadd.f32 %v5099_v34, %v4963_v58  ;;  %v5123_v19 = vadd.f32 %v5122_v35, %v9217_v46  ;;  %v4904_v0 = vmul.f32 %v8950_v11, %v4363_v39 }
 0xac3   :  { %v5018_v50 = vadd.f32 %v5017_v3, %v8995_v15  ;;  %v5025_v8 = vadd.f32 %v9227_v48, %v4906_v29  ;;  %v4964_v53 = vmul.f32 %v9230_v45, %v4603_v47  ;;  %v5107_v55 = vadd.f32 %v5106_v42, %v9224_v28 }
 0xac4   :  { %v5002_v56 = vadd.f32 %v5001_v37, %v9001_v12  ;;  %v9345_v9 = vadd.f32 %v5123_v19, %v4966_v60  ;;  %v5009_v44 = vadd.f32 %v9233_v54, %v4904_v0 }
 0xac5   :  { %v5026_v22 = vadd.f32 %v5025_v8, %v9007_v1  ;;  %v9349_v32 = vadd.f32 %v5107_v55, %v4964_v53  ;;  %v5019_v46 = vadd.f32 %v5018_v50, %v9109_v4  ;;  %v9972_v55 = vld [vmem:[#allocation39_spill] sm:$0xff] }
 0xac6   :  { %v5010_v15 = vadd.f32 %v5009_v44, %v9013_v25  ;;  %v6333_v62 = vpop.f32.mrb[148].mxu0  ;;  %v6393_v48 = vpop.f32.mrb[132].mxu1  ;;  %v5003_v45 = vadd.f32 %v5002_v56, %v9113_v36 }
 0xac7   :  { %v4909_v28 = vmul.f32 %v6333_v62, %v8950_v11  ;;  %v4969_v12 = vmul.f32 %v6393_v48, %v9320_v31  ;;  %v5020_v51 = vadd.f32 %v5019_v46, %v9237_v40  ;;  %v4376_v30 = vpop.f32.mrb[149].mxu0  ;;  %v4616_v54 = vpop.f32.mrb[133].mxu1  ;;  %v5027_v1 = vadd.f32 %v5026_v22, %v9123_v59  ;;  %v9973_v22 = vld [vmem:[#allocation28_spill] sm:$0xff] }
 0xac8   :  { %v4907_v35 = vmul.f32 %v8950_v11, %v4376_v30  ;;  %v4967_v4 = vmul.f32 %v9320_v31, %v4616_v54  ;;  %v5004_v25 = vadd.f32 %v5003_v45, %v9241_v61  ;;  %v6334_v7 = vpop.f32.mrb[150].mxu0  ;;  %v6394_v58 = vpop.f32.mrb[134].mxu1  ;;  %v5011_v36 = vadd.f32 %v5010_v15, %v9130_v41  ;;  %v9974_v15 = vld [vmem:[#allocation36_spill] sm:$0xff]  ;;  %v9975_v45 = vld [vmem:[#allocation25_spill] sm:$0xff] }
 0xac9   :  { %v5049_v34 = vadd.f32 %v9244_v26, %v4909_v28  ;;  %v9363_v38 = vadd.f32 %v5020_v51, %v4969_v12  ;;  %v4910_v40 = vmul.f32 %v6334_v7, %v8950_v11  ;;  %v4970_v23 = vmul.f32 %v6394_v58, %v9320_v31  ;;  %v4379_v42 = vpop.f32.mrb[151].mxu0  ;;  %v4619_v59 = vpop.f32.mrb[135].mxu1 }
 0xaca   :  { %v5033_v3 = vadd.f32 %v9251_v33, %v4907_v35  ;;  %v9368_v29 = vadd.f32 %v5004_v25, %v4967_v4  ;;  %v5028_v61 = vadd.f32 %v5027_v1, %v9248_v17  ;;  %v4908_v60 = vmul.f32 %v8950_v11, %v4379_v42  ;;  %v9976_v25 = vld [vmem:[#allocation29_spill] sm:$0xff] }
 0xacb   :  { %v5050_v41 = vadd.f32 %v5049_v34, %v9019_v13  ;;  %v5057_v26 = vadd.f32 %v9258_v49, %v4910_v40  ;;  %v4968_v39 = vmul.f32 %v9320_v31, %v4619_v59  ;;  %v5012_v47 = vadd.f32 %v5011_v36, %v9255_v6  ;;  %v9977_v36 = vld [vmem:[#allocation27_spill] sm:$0xff] }
 0xacc   :  { %v5034_v37 = vadd.f32 %v5033_v3, %v9025_v52  ;;  %v9377_v19 = vadd.f32 %v5028_v61, %v4970_v23  ;;  %v5041_v33 = vadd.f32 %v9261_v21, %v4908_v60  ;;  %v9978_v23 = vld [vmem:[#allocation31_spill] sm:$0xff]  ;;  %v9980_v60 = vld [vmem:[#allocation32_spill] sm:$0xff] }
 0xacd   :  { %v5058_v0 = vadd.f32 %v5057_v26, %v9031_v27  ;;  %v9381_v50 = vadd.f32 %v5012_v47, %v4968_v39  ;;  %v5051_v17 = vadd.f32 %v5050_v41, %v9143_v5  ;;  %v9979_v59 = vld [vmem:[#allocation23_spill] sm:$0xff]  ;;  %v9981_v41 = vld [vmem:[#allocation37_spill] sm:$0xff]  ;;  %v9982_v47 = vld [vmem:[#allocation30_spill] sm:$0xff] }
 0xace   :  { %v5042_v13 = vadd.f32 %v5041_v33, %v9037_v63  ;;  %v6337_v8 = vpop.f32.mrb[152].mxu0  ;;  %v6397_v49 = vpop.f32.mrb[136].mxu1  ;;  %v5035_v53 = vadd.f32 %v5034_v37, %v9147_v2  ;;  %v9983_v37 = vld [vmem:[#allocation22_spill] sm:$0xff] }
 0xacf   :  { %v4913_v6 = vmul.f32 %v6337_v8, %v8950_v11  ;;  %v4973_v52 = vmul.f32 %v6397_v49, %v9320_v31  ;;  %v5052_v56 = vadd.f32 %v5051_v17, %v9972_v55  ;;  %v4392_v44 = vpop.f32.mrb[153].mxu0  ;;  %v4632_v21 = vpop.f32.mrb[137].mxu1  ;;  %v5059_v27 = vadd.f32 %v5058_v0, %v9973_v22  ;;  %v9985_v8 = vld [vmem:[#allocation33_spill] sm:$0xff]  ;;  %v9988_v22 = vld [vmem:[#allocation46_spill] sm:$0xff] }
 0xad0   :  { %v4911_v46 = vmul.f32 %v8950_v11, %v4392_v44  ;;  %v4971_v5 = vmul.f32 %v9320_v31, %v4632_v21  ;;  %v5036_v63 = vadd.f32 %v5035_v53, %v9974_v15  ;;  %v6338_v62 = vpop.f32.mrb[154].mxu0  ;;  %v6398_v48 = vpop.f32.mrb[138].mxu1  ;;  %v5043_v2 = vadd.f32 %v5042_v13, %v9975_v45 }
 0xad1   :  { %v5081_v28 = vadd.f32 %v9272_v18, %v4913_v6  ;;  %v9395_v12 = vadd.f32 %v5052_v56, %v4973_v52  ;;  %v4914_v51 = vmul.f32 %v6338_v62, %v8950_v11  ;;  %v4974_v30 = vmul.f32 %v6398_v48, %v9320_v31  ;;  %v4395_v54 = vpop.f32.mrb[155].mxu0  ;;  %v4635_v1 = vpop.f32.mrb[139].mxu1  ;;  %v9986_v6 = vld [vmem:[#allocation38_spill] sm:$0xff] }
 0xad2   :  { %v5065_v35 = vadd.f32 %v9279_v43, %v4911_v46  ;;  %v9400_v4 = vadd.f32 %v5036_v63, %v4971_v5  ;;  %v5060_v7 = vadd.f32 %v5059_v27, %v9976_v25  ;;  %v4912_v58 = vmul.f32 %v8950_v11, %v4395_v54  ;;  %v9987_v56 = vld [vmem:[#allocation34_spill] sm:$0xff] }
 0xad3   :  { %v5082_v34 = vadd.f32 %v5081_v28, %v9977_v36  ;;  %v5089_v18 = vadd.f32 %v9286_v16, %v4914_v51  ;;  %v4972_v40 = vmul.f32 %v9320_v31, %v4635_v1  ;;  %v5044_v42 = vadd.f32 %v5043_v2, %v9978_v23  ;;  %v9984_v16 = vld [vmem:[#allocation24_spill] sm:$0xff]  ;;  %v5682_v51 = vld.sshfl [vmem:[%s9722_s12 + $0x8] sm:$0x1 pattern:$0x75316420] }
 0xad4   :  { %v5066_v3 = vadd.f32 %v5065_v35, %v9979_v59  ;;  %v9409_v61 = vadd.f32 %v5060_v7, %v4974_v30  ;;  %v5073_v43 = vadd.f32 %v9980_v60, %v4912_v58 }
 0xad5   :  { %v5090_v26 = vadd.f32 %v5089_v18, %v9981_v41  ;;  %v9413_v39 = vadd.f32 %v5044_v42, %v4972_v40  ;;  %v5083_v11 = vadd.f32 %v5082_v34, %v9982_v47 }
 0xad6   :  { %v5074_v33 = vadd.f32 %v5073_v43, %v9983_v37  ;;  %v6401_v0 = vpop.f32.mrb[140].mxu1  ;;  %v5067_v17 = vadd.f32 %v5066_v3, %v9984_v16 }
 0xad7   :  { %v4977_v13 = vmul.f32 %v6401_v0, %v9320_v31  ;;  %v5084_v49 = vadd.f32 %v5083_v11, %v9985_v8  ;;  %v4648_v53 = vpop.f32.mrb[141].mxu1  ;;  %v5091_v52 = vadd.f32 %v5090_v26, %v9986_v6 }
 0xad8   :  { %v4975_v55 = vmul.f32 %v9320_v31, %v4648_v53  ;;  %v5068_v44 = vadd.f32 %v5067_v17, %v9987_v56  ;;  %v6402_v21 = vpop.f32.mrb[142].mxu1  ;;  %v5075_v27 = vadd.f32 %v5074_v33, %v9988_v22 }
 0xad9   :  { %v9424_v46 = vadd.f32 %v5084_v49, %v4977_v13  ;;  %v4978_v5 = vmul.f32 %v6402_v21, %v9320_v31  ;;  %v5092_v15 = vadd.f32 %v5091_v52, %v9302_v20  ;;  %v4651_v63 = vpop.f32.mrb[143].mxu1  ;;  %v9989_v20 = vld [vmem:[#allocation40_spill] sm:$0xff] }
 0xada   :  { %v9428_v62 = vadd.f32 %v5068_v44, %v4975_v55  ;;  %v4976_v48 = vmul.f32 %v9320_v31, %v4651_v63  ;;  %v5076_v45 = vadd.f32 %v5075_v27, %v9307_v24  ;;  %v4809_v35 = vrot.slane %v5682_v51, %v9989_v20 }
 0xadb   :  { %v9432_v2 = vadd.f32 %v5092_v15, %v4978_v5 }
 0xadc   :  { %v9434_v28 = vadd.f32 %v5076_v45, %v4976_v48  ;;  %v9454_v23 = vrot.slane %v4809_v35, %v9954_v57 }
 0xade   :  { %v6405_v30 = vpop.f32.mrb[144].mxu1 }
 0xadf   :  { %v4981_v54 = vmul.f32 %v6405_v30, %v9320_v31  ;;  %v4664_v1 = vpop.f32.mrb[145].mxu1 }
 0xae0   :  { %v4979_v25 = vmul.f32 %v9320_v31, %v4664_v1  ;;  %v6406_v7 = vpop.f32.mrb[146].mxu1 }
 0xae1   :  { %v9443_v58 = vadd.f32 %v9331_v14, %v4981_v54  ;;  %v4982_v24 = vmul.f32 %v6406_v7, %v9320_v31  ;;  %v4667_v36 = vpop.f32.mrb[147].mxu1 }
 0xae2   :  { %v9447_v34 = vadd.f32 %v9336_v10, %v4979_v25  ;;  %v4980_v18 = vmul.f32 %v9320_v31, %v4667_v36  ;;  %v9463_v10 = vld [vmem:[%s9723_s13] ss:$0 sm:$0xff] }
 0xae3   :  { %v9451_v40 = vadd.f32 %v9345_v9, %v4982_v24 }
 0xae4   :  { %v9457_v42 = vadd.f32 %v9349_v32, %v4980_v18 }
 0xae6   :  { %v6409_v59 = vpop.f32.mrb[148].mxu1 }
 0xae7   :  { %v4985_v14 = vmul.f32 %v6409_v59, %v9454_v23  ;;  %v4680_v3 = vpop.f32.mrb[149].mxu1 }
 0xae8   :  { %v4983_v31 = vmul.f32 %v9454_v23, %v4680_v3  ;;  %v6410_v60 = vpop.f32.mrb[150].mxu1 }
 0xae9   :  { %v5022_v9 = vadd.f32 %v9363_v38, %v4985_v14  ;;  %v4986_v57 = vmul.f32 %v6410_v60, %v9454_v23  ;;  %v4683_v43 = vpop.f32.mrb[151].mxu1 }
 0xaea   :  { %v5006_v32 = vadd.f32 %v9368_v29, %v4983_v31  ;;  %v4984_v41 = vmul.f32 %v9454_v23, %v4683_v43 }
 0xaeb   :  { %v9471_v26 = vadd.f32 %v9463_v10, %v5022_v9  ;;  %v5030_v47 = vadd.f32 %v9377_v19, %v4986_v57 }
 0xaec   :  { %v9475_v11 = vadd.f32 %v9463_v10, %v5006_v32  ;;  %v5014_v37 = vadd.f32 %v9381_v50, %v4984_v41 }
 0xaed   :  { %v5152_v38 = vmul.f32 %v9471_v26, %v9471_v26  ;;  %v9481_v33 = vadd.f32 %v9463_v10, %v5030_v47 }
 0xaee   :  { %v5150_v29 = vmul.f32 %v9475_v11, %v9475_v11  ;;  %v9486_v0 = vadd.f32 %v9463_v10, %v5014_v37  ;;  %v6413_v16 = vpop.f32.mrb[152].mxu1 }
 0xaef   :  { %v5168_v19 = vmul.f32 %v5152_v38, %v9471_v26  ;;  %v5153_v17 = vmul.f32 %v9481_v33, %v9481_v33  ;;  %v4989_v50 = vmul.f32 %v6413_v16, %v9454_v23  ;;  %v4696_v13 = vpop.f32.mrb[153].mxu1 }
 0xaf0   :  { %v5166_v8 = vmul.f32 %v5150_v29, %v9475_v11  ;;  %v5151_v49 = vmul.f32 %v9486_v0, %v9486_v0  ;;  %v4987_v53 = vmul.f32 %v9454_v23, %v4696_v13  ;;  %v6414_v6 = vpop.f32.mrb[154].mxu1 }
 0xaf1   :  { %v5184_v52 = vmul.f32 0.044715, %v5168_v19  ;;  %v5169_v55 = vmul.f32 %v5153_v17, %v9481_v33  ;;  %v5054_v56 = vadd.f32 %v9395_v12, %v4989_v50  ;;  %v4990_v44 = vmul.f32 %v6414_v6, %v9454_v23  ;;  %v4699_v21 = vpop.f32.mrb[155].mxu1 }
 0xaf2   :  { %v5182_v22 = vmul.f32 0.044715, %v5166_v8  ;;  %v5167_v27 = vmul.f32 %v5151_v49, %v9486_v0  ;;  %v5038_v5 = vadd.f32 %v9400_v4, %v4987_v53  ;;  %v4988_v15 = vmul.f32 %v9454_v23, %v4699_v21 }
 0xaf3   :  { %v5200_v63 = vadd.f32 %v5184_v52, %v9471_v26  ;;  %v5185_v48 = vmul.f32 0.044715, %v5169_v55  ;;  %v9504_v45 = vadd.f32 %v9463_v10, %v5054_v56  ;;  %v5062_v51 = vadd.f32 %v9409_v61, %v4990_v44 }
 0xaf4   :  { %v5183_v30 = vmul.f32 0.044715, %v5167_v27  ;;  %v9508_v12 = vadd.f32 %v9463_v10, %v5038_v5  ;;  %v5046_v54 = vadd.f32 %v9413_v39, %v4988_v15  ;;  %v5198_v1 = vadd.f32 %v5182_v22, %v9475_v11 }
 0xaf5   :  { %v5216_v20 = vmul.f32 0.7978846, %v5200_v63  ;;  %v5201_v4 = vadd.f32 %v5185_v48, %v9481_v33  ;;  %v5156_v35 = vmul.f32 %v9504_v45, %v9504_v45  ;;  %v9516_v25 = vadd.f32 %v9463_v10, %v5062_v51 }
 0xaf6   :  { %v5154_v61 = vmul.f32 %v9508_v12, %v9508_v12  ;;  %v9521_v7 = vadd.f32 %v9463_v10, %v5046_v54  ;;  %v6417_v24 = vpop.f32.mrb[156].mxu1  ;;  %v5199_v39 = vadd.f32 %v5183_v30, %v9486_v0  ;;  %v5214_v36 = vmul.f32 0.7978846, %v5198_v1 }
 0xaf7   :  { %6916 = vtanh.f32 %v5216_v20  ;;  %v5217_v18 = vmul.f32 0.7978846, %v5201_v4  ;;  %v5172_v59 = vmul.f32 %v5156_v35, %v9504_v45  ;;  %v5157_v14 = vmul.f32 %v9516_v25, %v9516_v25  ;;  %v4712_v3 = vpop.f32.mrb[157].mxu1 }
 0xaf8   :  { %v5170_v31 = vmul.f32 %v5154_v61, %v9508_v12  ;;  %v5155_v60 = vmul.f32 %v9521_v7, %v9521_v7  ;;  %v4993_v9 = vmul.f32 %v6417_v24, %v9454_v23  ;;  %v4991_v57 = vmul.f32 %v9454_v23, %v4712_v3  ;;  %v6418_v43 = vpop.f32.mrb[158].mxu1 }
 0xaf9   :  { %6918 = vtanh.f32 %v5217_v18  ;;  %v5188_v32 = vmul.f32 0.044715, %v5172_v59  ;;  %v5173_v41 = vmul.f32 %v5157_v14, %v9516_v25  ;;  %v4994_v47 = vmul.f32 %v6418_v43, %v9454_v23  ;;  %v4715_v37 = vpop.f32.mrb[159].mxu1 }
 0xafa   :  { %v5186_v38 = vmul.f32 0.044715, %v5170_v31  ;;  %v5171_v29 = vmul.f32 %v5155_v60, %v9521_v7  ;;  %v5086_v16 = vadd.f32 %v9424_v46, %v4993_v9  ;;  %v5070_v19 = vadd.f32 %v9428_v62, %v4991_v57 }
 0xafb   :  { %v9537_v17 = vmul.f32 0.044715, %v5173_v41  ;;  %v5094_v50 = vadd.f32 %v9432_v2, %v4994_v47  ;;  %v4992_v13 = vmul.f32 %v9454_v23, %v4715_v37  ;;  %v5215_v8 = vmul.f32 0.7978846, %v5199_v39 }
 0xafc   :  { %v5187_v49 = vmul.f32 0.044715, %v5171_v29  ;;  %v9542_v53 = vadd.f32 %v9463_v10, %v5086_v16  ;;  %v9545_v6 = vadd.f32 %v9463_v10, %v5070_v19  ;;  %6920 = vtanh.f32 %v5214_v36 }
 0xafd   :  { %v9548_v52 = vadd.f32 %v9463_v10, %v5094_v50  ;;  %v5078_v46 = vadd.f32 %v9434_v28, %v4992_v13  ;;  %6922 = vtanh.f32 %v5215_v8  ;;  %v5202_v62 = vadd.f32 %v5186_v38, %v9508_v12 }
 0xafe   :  { %v5160_v2 = vmul.f32 %v9542_v53, %v9542_v53  ;;  %v5158_v55 = vmul.f32 %v9545_v6, %v9545_v6  ;;  %v6421_v56 = vpop.f32.mrb[160].mxu1  ;;  %v5203_v44 = vadd.f32 %v5187_v49, %v9521_v7  ;;  %v5204_v21 = vadd.f32 %v5188_v32, %v9504_v45 }
 0xaff   :  { %v5161_v22 = vmul.f32 %v9548_v52, %v9548_v52  ;;  %v9561_v27 = vadd.f32 %v9463_v10, %v5078_v46  ;;  %v4997_v28 = vmul.f32 %v6421_v56, %v9454_v23  ;;  %v4728_v5 = vpop.f32.mrb[161].mxu1  ;;  %v5218_v15 = vmul.f32 0.7978846, %v5202_v62 }
 0xb00   :  { %v5176_v63 = vmul.f32 %v5160_v2, %v9542_v53  ;;  %v5174_v48 = vmul.f32 %v5158_v55, %v9545_v6  ;;  %v4995_v51 = vmul.f32 %v9454_v23, %v4728_v5  ;;  %v6422_v30 = vpop.f32.mrb[162].mxu1  ;;  %v5219_v54 = vmul.f32 0.7978846, %v5203_v44 }
 0xb01   :  { %v6917_v1 = vpop.eup %6916  ;;  %v5177_v20 = vmul.f32 %v5161_v22, %v9548_v52  ;;  %v5159_v4 = vmul.f32 %v9561_v27, %v9561_v27  ;;  %v5118_v35 = vadd.f32 %v9443_v58, %v4997_v28  ;;  %v4998_v61 = vmul.f32 %v6422_v30, %v9454_v23  ;;  %v4731_v24 = vpop.f32.mrb[163].mxu1 }
 0xb02   :  { %v5248_v39 = vadd.f32 1.0, %v6917_v1  ;;  %v5192_v36 = vmul.f32 0.044715, %v5176_v63  ;;  %v5190_v18 = vmul.f32 0.044715, %v5174_v48  ;;  %v5102_v59 = vadd.f32 %v9447_v34, %v4995_v51 }
 0xb03   :  { %v6919_v14 = vpop.eup %6918  ;;  %v5193_v3 = vmul.f32 0.044715, %v5177_v20  ;;  %v5175_v31 = vmul.f32 %v5159_v4, %v9561_v27  ;;  %v9575_v60 = vadd.f32 %v9463_v10, %v5118_v35  ;;  %v5126_v9 = vadd.f32 %v9451_v40, %v4998_v61 }
 0xb04   :  { %v5264_v57 = vmul.f32 0.5, %v5248_v39  ;;  %v5249_v43 = vadd.f32 1.0, %v6919_v14  ;;  %v9579_v58 = vadd.f32 %v9463_v10, %v5102_v59  ;;  %v4996_v32 = vmul.f32 %v9454_v23, %v4731_v24 }
 0xb05   :  { %v5191_v41 = vmul.f32 0.044715, %v5175_v31  ;;  %v5164_v34 = vmul.f32 %v9575_v60, %v9575_v60  ;;  %v9585_v47 = vadd.f32 %v9463_v10, %v5126_v9  ;;  %6924 = vtanh.f32 %v5218_v15 }
 0xb06   :  { %v6921_v37 = vpop.eup %6920  ;;  %v5280_v38 = vmul.f32 %v5264_v57, %v9471_v26  ;;  %v5265_v29 = vmul.f32 0.5, %v5249_v43  ;;  %v5162_v40 = vmul.f32 %v9579_v58, %v9579_v58  ;;  %v5110_v16 = vadd.f32 %v9457_v42, %v4996_v32 }
 0xb07   :  { %v6923_v19 = vpop.eup %6922  ;;  %v5180_v23 = vmul.f32 %v5164_v34, %v9575_v60  ;;  %v5165_v50 = vmul.f32 %v9585_v47, %v9585_v47  ;;  %v5246_v13 = vadd.f32 1.0, %v6921_v37  ;;  %6926 = vtanh.f32 %v5219_v54 }
 0xb08   :  { %v5281_v8 = vmul.f32 %v5265_v29, %v9481_v33  ;;  %v5178_v49 = vmul.f32 %v5162_v40, %v9579_v58  ;;  %v9597_v26 = vadd.f32 %v9463_v10, %v5110_v16  ;;  %v5247_v46 = vadd.f32 1.0, %v6923_v19 }
 0xb09   :  { %v5196_v62 = vmul.f32 0.044715, %v5180_v23  ;;  %v5181_v2 = vmul.f32 %v5165_v50, %v9585_v47  ;;  %v5262_v42 = vmul.f32 0.5, %v5246_v13  ;;  %v5205_v55 = vadd.f32 %v9537_v17, %v9516_v25 }
 0xb0a   :  { %v5194_v56 = vmul.f32 0.044715, %v5178_v49  ;;  %v5163_v44 = vmul.f32 %v9597_v26, %v9597_v26  ;;  %v5263_v22 = vmul.f32 0.5, %v5247_v46  ;;  %v5295_v28 = vpack.c.bf16 %v5281_v8, %v5280_v38 }
 0xb0b   :  { %v5197_v33 = vmul.f32 0.044715, %v5181_v2  ;;  %v5278_v5 = vmul.f32 %v5262_v42, %v9475_v11  ;;  %v5220_v15 = vmul.f32 0.7978846, %v5204_v21  ;;  %v5221_v10 = vmul.f32 0.7978846, %v5205_v55 }
 0xb0c   :  { %v5179_v63 = vmul.f32 %v5163_v44, %v9597_v26  ;;  %v5279_v48 = vmul.f32 %v5263_v22, %v9486_v0  ;;  %v5206_v51 = vadd.f32 %v5190_v18, %v9545_v6  ;;  %v5207_v30 = vadd.f32 %v5191_v41, %v9561_v27 }
 0xb0d   :  { %6928 = vtanh.f32 %v5220_v15  ;;  %v5208_v17 = vadd.f32 %v5192_v36, %v9542_v53  ;;  %v5209_v54 = vadd.f32 %v5193_v3, %v9548_v52  ;;  %v5210_v1 = vadd.f32 %v5194_v56, %v9579_v58 }
 0xb0e   :  { %v5195_v20 = vmul.f32 0.044715, %v5179_v63  ;;  %v5294_v4 = vpack.c.bf16 %v5279_v48, %v5278_v5  ;;  %6930 = vtanh.f32 %v5221_v10  ;;  %v5222_v11 = vmul.f32 0.7978846, %v5206_v51 }
 0xb0f   :  { %v6925_v21 = vpop.eup %6924  ;;  %v5223_v35 = vmul.f32 0.7978846, %v5207_v30  ;;  %v5224_v61 = vmul.f32 0.7978846, %v5208_v17  ;;  %v5225_v24 = vmul.f32 0.7978846, %v5209_v54  ;;  %v5212_v0 = vadd.f32 %v5196_v62, %v9575_v60 }
 0xb10   :  { %6439 = vmatprep.mubr.bf16.mxu0 %v5294_v4  ;;  %v5250_v39 = vadd.f32 1.0, %v6925_v21  ;;  %6932 = vtanh.f32 %v5222_v11  ;;  %v5211_v18 = vadd.f32 %v5195_v20, %v9597_v26  ;;  %v5226_v36 = vmul.f32 0.7978846, %v5210_v1 }
 0xb11   :  { %v6927_v59 = vpop.eup %6926  ;;  %6440 = vmatmul.mubr.bf16.vlgmr.msra.gmra.mrb[156].mxu0 %v5295_v28  ;;  %6934 = vtanh.f32 %v5223_v35  ;;  %v5213_v14 = vadd.f32 %v5197_v33, %v9585_v47  ;;  %v5228_v3 = vmul.f32 0.7978846, %v5212_v0 }
 0xb12   :  { %v5251_v31 = vadd.f32 1.0, %v6927_v59  ;;  %v5266_v9 = vmul.f32 0.5, %v5250_v39  ;;  %6936 = vtanh.f32 %v5224_v61  ;;  %v5227_v57 = vmul.f32 0.7978846, %v5211_v18 }
 0xb13   :  { %6938 = vtanh.f32 %v5225_v24  ;;  %v5229_v43 = vmul.f32 0.7978846, %v5213_v14 }
 0xb14   :  { %v5267_v32 = vmul.f32 0.5, %v5251_v31  ;;  %6940 = vtanh.f32 %v5226_v36  ;;  %v5282_v41 = vmul.f32 %v5266_v9, %v9508_v12 }
 0xb15   :  { %6942 = vtanh.f32 %v5227_v57  ;;  %v9992_v57 = vld [vmem:[#allocation11_spill] sm:$0xff] }
 0xb16   :  { %v5283_v34 = vmul.f32 %v5267_v32, %v9521_v7  ;;  %6944 = vtanh.f32 %v5228_v3  ;;  %v9993_v32 = vld [vmem:[#allocation13_spill] sm:$0xff] }
 0xb17   :  { %v6929_v37 = vpop.eup %6928  ;;  %6946 = vtanh.f32 %v5229_v43 }
 0xb18   :  { %v6931_v38 = vpop.eup %6930  ;;  %v5296_v29 = vpack.c.bf16 %v5283_v34, %v5282_v41  ;;  %v5252_v40 = vadd.f32 1.0, %v6929_v37 }
 0xb19   :  { %v5253_v16 = vadd.f32 1.0, %v6931_v38 }
 0xb1a   :  { %v6933_v19 = vpop.eup %6932  ;;  %6443 = vmatprep.mubr.bf16.mxu0 %v5296_v29  ;;  %v5268_v23 = vmul.f32 0.5, %v5252_v40 }
 0xb1b   :  { %v6935_v50 = vpop.eup %6934  ;;  %v5269_v13 = vmul.f32 0.5, %v5253_v16  ;;  %v5254_v8 = vadd.f32 1.0, %v6933_v19  ;;  %v9994_v16 = vld [vmem:[#allocation7_spill] sm:$0xff] }
 0xb1c   :  { %v6937_v49 = vpop.eup %6936  ;;  %v5255_v46 = vadd.f32 1.0, %v6935_v50  ;;  %v5284_v12 = vmul.f32 %v5268_v23, %v9504_v45 }
 0xb1d   :  { %v6939_v62 = vpop.eup %6938  ;;  %v5285_v7 = vmul.f32 %v5269_v13, %v9516_v25  ;;  %v5270_v2 = vmul.f32 0.5, %v5254_v8  ;;  %v5256_v42 = vadd.f32 1.0, %v6937_v49  ;;  %v9995_v13 = vld [vmem:[#allocation12_spill] sm:$0xff] }
 0xb1e   :  { %v6941_v55 = vpop.eup %6940  ;;  %v5271_v56 = vmul.f32 0.5, %v5255_v46  ;;  %v5257_v44 = vadd.f32 1.0, %v6939_v62  ;;  %v9996_v46 = vld [vmem:[#allocation15_spill] sm:$0xff] }
 0xb1f   :  { %v6943_v22 = vpop.eup %6942  ;;  %v5297_v28 = vpack.c.bf16 %v5285_v7, %v5284_v12  ;;  %v5272_v33 = vmul.f32 0.5, %v5256_v42  ;;  %v5258_v5 = vadd.f32 1.0, %v6941_v55  ;;  %v5286_v10 = vmul.f32 %v5270_v2, %v9545_v6  ;;  %v9997_v12 = vld [vmem:[#allocation9_spill] sm:$0xff] }
 0xb20   :  { %v6945_v15 = vpop.eup %6944  ;;  %v5287_v63 = vmul.f32 %v5271_v56, %v9561_v27  ;;  %v5273_v48 = vmul.f32 0.5, %v5257_v44  ;;  %v5259_v51 = vadd.f32 1.0, %v6943_v22  ;;  %v9998_v22 = vld [vmem:[#allocation8_spill] sm:$0xff] }
 0xb21   :  { %v6947_v30 = vpop.eup %6946  ;;  %6444 = vmatmul.mubr.bf16.gmra.mrb[160].mxu0 %v5297_v28  ;;  %v5288_v45 = vmul.f32 %v5272_v33, %v9542_v53  ;;  %v5274_v25 = vmul.f32 0.5, %v5258_v5  ;;  %v5260_v17 = vadd.f32 1.0, %v6945_v15  ;;  %v9999_v15 = vld [vmem:[#allocation16_spill] sm:$0xff] }
 0xb22   :  { %v5298_v54 = vpack.c.bf16 %v5287_v63, %v5286_v10  ;;  %v5289_v1 = vmul.f32 %v5273_v48, %v9548_v52  ;;  %v5275_v20 = vmul.f32 0.5, %v5259_v51  ;;  %v5261_v4 = vadd.f32 1.0, %v6947_v30  ;;  %v5684_v52 = vld [vmem:[%s9725_s15] ss:$0 sm:$0xff]  ;;  %v10001_v30 = vld [vmem:[#allocation18_spill] sm:$0xff] }
 0xb23   :  { %v5276_v11 = vmul.f32 0.5, %v5260_v17  ;;  %v5290_v6 = vmul.f32 %v5274_v25, %v9579_v58  ;;  %v10000_v48 = vld [vmem:[#allocation17_spill] sm:$0xff] }
 0xb24   :  { %6447 = vmatprep.mubr.bf16.mxu0 %v5298_v54  ;;  %v5299_v21 = vpack.c.bf16 %v5289_v1, %v5288_v45  ;;  %v5291_v27 = vmul.f32 %v5275_v20, %v9597_v26  ;;  %v5277_v35 = vmul.f32 0.5, %v5261_v4  ;;  %v9990_v26 = vld [vmem:[#allocation14_spill] sm:$0xff]  ;;  %v10002_v4 = vld [vmem:[#allocation21_spill] sm:$0xff] }
 0xb25   :  { %v5292_v24 = vmul.f32 %v5276_v11, %v9575_v60  ;;  %v9991_v60 = vld [vmem:[#allocation10_spill] sm:$0xff] }
 0xb26   :  { %v5300_v61 = vpack.c.bf16 %v5291_v27, %v5290_v6  ;;  %v5293_v53 = vmul.f32 %v5277_v35, %v9585_v47  ;;  %v10003_v27 = vld [vmem:[#allocation19_spill] sm:$0xff] }
 0xb28   :  { %v5301_v0 = vpack.c.bf16 %v5293_v53, %v5292_v24  ;;  %v10004_v24 = vld [vmem:[#allocation26_spill] sm:$0xff] }
 0xb29   :  { %6448 = vmatmul.mubr.bf16.gmra.mrb[164].mxu0 %v5299_v21 }
 0xb2a   :  { %6451 = vmatprep.mubr.bf16.mxu0 %v5300_v61 }
 0xb31   :  { %6452 = vmatmul.mubr.bf16.gmra.mrb[168].mxu0 %v5301_v0  ;;  %v10005_v0 = vld [vmem:[#allocation20_spill] sm:$0xff] }
 0xbe4   :  { %v6441_v39 = vpop.f32.mrb[156].mxu0 }
 0xbe5   :  { %v5416_v18 = vadd.f32 %v6441_v39, %v5684_v52  ;;  %v5407_v36 = vpop.f32.mrb[157].mxu0 }
 0xbe6   :  { %v5408_v58 = vadd.f32 %v5684_v52, %v5407_v36  ;;  %v6442_v59 = vpop.f32.mrb[158].mxu0 }
 0xbe7   :  { %v5472_v14 = vadd.f32 %v5416_v18, %v9990_v26  ;;  %v5419_v3 = vadd.f32 %v6442_v59, %v5684_v52  ;;  %v5410_v31 = vpop.f32.mrb[159].mxu0 }
 0xbe8   :  { %v5470_v9 = vadd.f32 %v5408_v58, %v9991_v60  ;;  %v5411_v47 = vadd.f32 %v5684_v52, %v5410_v31 }
 0xbe9   :  { %5488 = vst.msk [vmem:[%s9726_s16 + $0x10] sm:$0xff] %vm86_vm0, %v5472_v14  ;;  %v5473_v43 = vadd.f32 %v5419_v3, %v9992_v57 }
 0xbea   :  { %5486 = vst.msk [vmem:[%s9726_s16] sm:$0xff] %vm86_vm0, %v5470_v9  ;;  %v5471_v41 = vadd.f32 %v5411_v47, %v9993_v32 }
 0xbeb   :  { %5489 = vst.msk [vmem:[%s9726_s16 + $0x18] sm:$0xff] %vm86_vm0, %v5473_v43 }
 0xbec   :  { %5487 = vst.msk [vmem:[%s9726_s16 + $0x8] sm:$0xff] %vm86_vm0, %v5471_v41 }
 0xbf4   :  { %v6445_v34 = vpop.f32.mrb[160].mxu0 }
 0xbf5   :  { %v5432_v37 = vadd.f32 %v6445_v34, %v5684_v52  ;;  %v5423_v38 = vpop.f32.mrb[161].mxu0 }
 0xbf6   :  { %v5424_v29 = vadd.f32 %v5684_v52, %v5423_v38  ;;  %v6446_v40 = vpop.f32.mrb[162].mxu0 }
 0xbf7   :  { %v5476_v19 = vadd.f32 %v5432_v37, %v9994_v16  ;;  %v5435_v23 = vadd.f32 %v6446_v40, %v5684_v52  ;;  %v5426_v50 = vpop.f32.mrb[163].mxu0 }
 0xbf8   :  { %v5474_v8 = vadd.f32 %v5424_v29, %v9995_v13  ;;  %v5427_v49 = vadd.f32 %v5684_v52, %v5426_v50 }
 0xbf9   :  { %5492 = vst.msk [vmem:[%s9726_s16 + $0x30] sm:$0xff] %vm86_vm0, %v5476_v19  ;;  %v5477_v62 = vadd.f32 %v5435_v23, %v9996_v46 }
 0xbfa   :  { %5490 = vst.msk [vmem:[%s9726_s16 + $0x20] sm:$0xff] %vm86_vm0, %v5474_v8  ;;  %v5475_v7 = vadd.f32 %v5427_v49, %v9997_v12 }
 0xbfb   :  { %5493 = vst.msk [vmem:[%s9726_s16 + $0x38] sm:$0xff] %vm86_vm0, %v5477_v62 }
 0xbfc   :  { %5491 = vst.msk [vmem:[%s9726_s16 + $0x28] sm:$0xff] %vm86_vm0, %v5475_v7  ;;  %v6449_v2 = vpop.f32.mrb[164].mxu0 }
 0xbfd   :  { %v5448_v42 = vadd.f32 %v6449_v2, %v5684_v52  ;;  %v5439_v55 = vpop.f32.mrb[165].mxu0 }
 0xbfe   :  { %v5440_v56 = vadd.f32 %v5684_v52, %v5439_v55  ;;  %v6450_v44 = vpop.f32.mrb[166].mxu0 }
 0xbff   :  { %v5480_v28 = vadd.f32 %v5448_v42, %v9998_v22  ;;  %v5451_v33 = vadd.f32 %v6450_v44, %v5684_v52  ;;  %v5442_v5 = vpop.f32.mrb[167].mxu0 }
 0xc00   :  { %v5478_v10 = vadd.f32 %v5440_v56, %v9999_v15  ;;  %v5443_v63 = vadd.f32 %v5684_v52, %v5442_v5 }
 0xc01   :  { %5496 = vst.msk [vmem:[%s9726_s16 + $0x50] sm:$0xff] %vm86_vm0, %v5480_v28  ;;  %v5481_v51 = vadd.f32 %v5451_v33, %v10000_v48 }
 0xc02   :  { %5494 = vst.msk [vmem:[%s9726_s16 + $0x40] sm:$0xff] %vm86_vm0, %v5478_v10  ;;  %v5479_v45 = vadd.f32 %v5443_v63, %v10001_v30 }
 0xc03   :  { %5497 = vst.msk [vmem:[%s9726_s16 + $0x58] sm:$0xff] %vm86_vm0, %v5481_v51 }
 0xc04   :  { %5495 = vst.msk [vmem:[%s9726_s16 + $0x48] sm:$0xff] %vm86_vm0, %v5479_v45  ;;  %v6453_v25 = vpop.f32.mrb[168].mxu0 }
 0xc05   :  { %v5464_v17 = vadd.f32 %v6453_v25, %v5684_v52  ;;  %v5455_v54 = vpop.f32.mrb[169].mxu0 }
 0xc06   :  { %v5456_v1 = vadd.f32 %v5684_v52, %v5455_v54  ;;  %v6454_v20 = vpop.f32.mrb[170].mxu0 }
 0xc07   :  { %v5484_v11 = vadd.f32 %v5464_v17, %v10002_v4  ;;  %v5467_v21 = vadd.f32 %v6454_v20, %v5684_v52  ;;  %v5458_v6 = vpop.f32.mrb[171].mxu0 }
 0xc08   :  { %v5482_v35 = vadd.f32 %v5456_v1, %v10003_v27  ;;  %v5459_v61 = vadd.f32 %v5684_v52, %v5458_v6 }
 0xc09   :  { %5500 = vst.msk [vmem:[%s9726_s16 + $0x70] sm:$0xff] %vm86_vm0, %v5484_v11  ;;  %v5485_v53 = vadd.f32 %v5467_v21, %v10004_v24 }
 0xc0a   :  { %5498 = vst.msk [vmem:[%s9726_s16 + $0x60] sm:$0xff] %vm86_vm0, %v5482_v35  ;;  %v5483_v39 = vadd.f32 %v5459_v61, %v10005_v0 }
 0xc0b   :  { %5501 = vst.msk [vmem:[%s9726_s16 + $0x78] sm:$0xff] %vm86_vm0, %v5485_v53 }
 0xc0c   :  { %5499 = vst.msk [vmem:[%s9726_s16 + $0x68] sm:$0xff] %vm86_vm0, %v5483_v39 }
 0xc0d   :  { %5506 = vsyncpa [#allocation3], 1 }

</bundles_post_ra>
